<compile_context>
chip_gen: v5e
topology: v5e:2x2
jax: 0.10.0
libtpu: 0.0.40
codegen_flags: <defaults>
</compile_context>

<pallas_src>
import functools

import jax
import jax.numpy as jnp
import numpy as np
from jax import lax
from jax.experimental import pallas as pl
from jax.experimental.pallas import tpu as pltpu

_W_OFF = 8  # sublane-aligned start of the halo'd interior inside the VMEM scratch


# ---------------------------------------------------------------------------
# Fused Block kernel (one batch element per grid step)
# ---------------------------------------------------------------------------

def _block_kernel(*refs, H, W, Cin, Cout, reps, strides, has_skip, relu_flags):
    Ho = (H - 1) // strides + 1
    Wo = (W - 1) // strides + 1
    Wpad = W + 2 * _W_OFF
    strided = strides != 1

    # refs: x, [dw_w, pw_w(bf16, scale-folded), bias] * reps,
    #       [skip_w(bf16, scale-folded), skip_bias]?, [selW]?,
    #       out, pad_scratch, [pool_scratch, xsub_scratch]?
    it = iter(refs)
    x_ref = next(it)
    rep_refs = [tuple(next(it) for _ in range(3)) for _ in range(reps)]
    if has_skip:
        skip_w_ref, skip_bi_ref = next(it), next(it)
    if strided:
        sel_ref = next(it)
    o_ref = next(it)
    pad_ref = next(it)
    if strided:
        pool_ref, xsub_ref = next(it), next(it)

    def window(kh, kw, c):
        # (H, W, c) window of the halo'd scratch for depthwise tap (kh, kw)
        w0 = _W_OFF - 1 + kw
        return pad_ref[kh:kh + H, w0:w0 + W, :c]

    def fill_border(val):
        # Only the halo border ever needs (re)filling: the interior is fully
        # overwritten before every use.  Row strips + 8-wide column strips.
        cpad = pad_ref.shape[-1]
        row = jnp.full((1, Wpad, cpad), val, jnp.float32)
        col = jnp.full((H + 2, _W_OFF, cpad), val, jnp.float32)
        pad_ref[0:1, :, :] = row
        pad_ref[H + 1:H + 2, :, :] = row
        pad_ref[:, 0:_W_OFF, :] = col
        pad_ref[:, _W_OFF + W:Wpad, :] = col

    x0 = x_ref[0].astype(jnp.float32)                      # (H, W, Cin)

    # Zero halo border once per grid step (covers every rep's depthwise conv).
    fill_border(0.0)

    act = x0
    y2d = None
    for i, (dw_ref, pw_ref, bi_ref) in enumerate(rep_refs):
        C = act.shape[-1]
        # depthwise 3x3, stride 1, zero-pad 1 (VPU; halo lives in VMEM scratch)
        pad_ref[1:H + 1, _W_OFF:_W_OFF + W, :C] = act
        w = dw_ref[...]                                    # (3, 3, C) f32
        acc = window(0, 0, C) * w[0:1, 0:1, :]             # init from first tap
        for kh in range(3):
            for kw in range(3):
                if kh == 0 and kw == 0:
                    continue
                acc = acc + window(kh, kw, C) * w[kh:kh + 1, kw:kw + 1, :]
        # pointwise 1x1 conv with BN scale pre-folded into the bf16 weights;
        # bf16 MXU operands, f32 accumulation, then bias (+ ReLU).
        y2d = jnp.dot(acc.reshape(H * W, C).astype(jnp.bfloat16), pw_ref[...],
                      preferred_element_type=jnp.float32) + bi_ref[...]
        if relu_flags[i]:
            y2d = jnp.maximum(y2d, 0.0)
        act = y2d.reshape(H, W, Cout)

    if strided:
        # Fused MaxPool2d(3, strides, padding=1), evaluated only at the strided
        # row anchors (static row indices) + a tiny (Wo, W) selection matmul
        # for the W subsample.  The strided 1x1 skip conv reuses the same
        # per-row W subsample of the input.
        sel = sel_ref[...]                                 # (Wo, W) f32 0/1
        fill_border(-jnp.inf)
        pad_ref[1:H + 1, _W_OFF:_W_OFF + W, :Cout] = act
        w_lo = _W_OFF - 1
        for ho in range(Ho):
            r0 = strides * ho                              # pad rows r0..r0+2
            r3 = pad_ref[r0:r0 + 3, w_lo:w_lo + W + 2, :Cout]   # (3, W+2, Cout)
            rmax = jnp.maximum(jnp.maximum(r3[0], r3[1]), r3[2])
            m_row = jnp.maximum(jnp.maximum(rmax[0:W], rmax[1:W + 1]),
                                rmax[2:W + 2])             # (W, Cout)
            pool_ref[ho * Wo:(ho + 1) * Wo, :] = jnp.dot(
                sel, m_row, preferred_element_type=jnp.float32)
            xsub_ref[ho * Wo:(ho + 1) * Wo, :] = jnp.dot(
                sel, x0[r0], preferred_element_type=jnp.float32)
        main = pool_ref[...]                               # (Ho*Wo, Cout)
        xs = xsub_ref[...]                                 # (Ho*Wo, Cin)
    else:
        main = y2d                                         # (H*W, Cout)
        xs = x0.reshape(H * W, Cin)

    if has_skip:
        skip = jnp.dot(xs.astype(jnp.bfloat16), skip_w_ref[...],
                       preferred_element_type=jnp.float32) + skip_bi_ref[...]
    else:
        skip = xs                                          # identity (Cin==Cout, s==1)

    o_ref[...] = (main + skip).reshape(1, Ho * Wo, Cout)


# ---------------------------------------------------------------------------
# Wrapper
# ---------------------------------------------------------------------------

def _fold_bn_into_weight(w, gamma, beta, mean, var, eps=1e-5):
    """Fold BN scale into the 1x1 conv weight columns; returns bf16 weight + f32 bias."""
    inv = gamma / jnp.sqrt(var + eps)
    w_bf16 = (w.astype(jnp.float32) * inv[None, :]).astype(jnp.bfloat16)
    bias = (beta - mean * inv).reshape(1, -1).astype(jnp.float32)
    return w_bf16, bias


def _const_spec(shape):
    nd = len(shape)
    return pl.BlockSpec(shape, lambda n, _nd=nd: (0,) * _nd)


def _w_subsample_matrix(W, stride):
    """(Wo, W) 0/1 matrix selecting columns w = stride * wo."""
    Wo = (W - 1) // stride + 1
    sel = np.zeros((Wo, W), np.float32)
    sel[np.arange(Wo), stride * np.arange(Wo)] = 1.0
    return jnp.asarray(sel)


def block_forward(params, x, strides):
    """Fused Pallas forward of Block.  x: (N, H, W, Cin) f32, NHWC."""
    N, H, W, Cin = x.shape
    reps = len(params["dws"])
    Cout = params["dws"][0]["pw_w"].shape[1]
    has_skip = "skip_w" in params
    assert has_skip or (strides == 1 and Cin == Cout), \
        "identity skip requires strides == 1 and Cin == Cout"
    Ho = (H - 1) // strides + 1
    Wo = (W - 1) // strides + 1
    Cmax = max(Cin, Cout)

    inputs = [x.astype(jnp.float32)]
    in_specs = [pl.BlockSpec((1, H, W, Cin), lambda n: (n, 0, 0, 0))]
    relu_flags = []

    for layer in params["dws"]:
        pw_f, bias = _fold_bn_into_weight(layer["pw_w"], layer["bn_gamma"],
                                          layer["bn_beta"], layer["bn_mean"],
                                          layer["bn_var"])
        for arr in (layer["dw_w"].astype(jnp.float32), pw_f, bias):
            inputs.append(arr)
            in_specs.append(_const_spec(arr.shape))
        relu_flags.append(bool(layer["use_relu"]))

    if has_skip:
        sw_f, sbias = _fold_bn_into_weight(params["skip_w"], params["skip_bn_gamma"],
                                           params["skip_bn_beta"], params["skip_bn_mean"],
                                           params["skip_bn_var"])
        for arr in (sw_f, sbias):
            inputs.append(arr)
            in_specs.append(_const_spec(arr.shape))

    if strides != 1:
        sel = _w_subsample_matrix(W, strides)
        inputs.append(sel)
        in_specs.append(_const_spec(sel.shape))

    scratch_shapes = [pltpu.VMEM((H + 2, W + 2 * _W_OFF, Cmax), jnp.float32)]
    if strides != 1:
        scratch_shapes += [pltpu.VMEM((Ho * Wo, Cout), jnp.float32),
                           pltpu.VMEM((Ho * Wo, Cin), jnp.float32)]

    # Explicit VMEM budget from the working set (2x-buffered I/O blocks +
    # resident constants + pad scratch + headroom for live activations),
    # clamped to a range valid on v5e / v6e / v7x.
    const_bytes = sum(int(np.prod(a.shape)) * np.dtype(a.dtype).itemsize
                      for a in inputs[1:])
    pad_bytes = (H + 2) * (W + 2 * _W_OFF) * Cmax * 4
    io_bytes = (H * W * Cin + Ho * Wo * Cout) * 4
    live_bytes = 8 * H * W * Cmax * 4
    working = 2 * io_bytes + 2 * const_bytes + pad_bytes + live_bytes
    vmem_limit = int(min(max(working + (8 << 20), 32 << 20), 64 << 20))

    kernel = functools.partial(
        _block_kernel, H=H, W=W, Cin=Cin, Cout=Cout, reps=reps,
        strides=strides, has_skip=has_skip, relu_flags=tuple(relu_flags))

    out = pl.pallas_call(
        kernel,
        out_shape=jax.ShapeDtypeStruct((N, Ho * Wo, Cout), jnp.float32),
        grid=(N,),
        in_specs=in_specs,
        out_specs=pl.BlockSpec((1, Ho * Wo, Cout), lambda n: (n, 0, 0)),
        scratch_shapes=scratch_shapes,
        compiler_params=pltpu.CompilerParams(
            dimension_semantics=("parallel",),
            vmem_limit_bytes=vmem_limit),
    )(*inputs)
    return out.reshape(N, Ho, Wo, Cout)


# ---------------------------------------------------------------------------
# Parameter construction (deterministic) and pure-JAX reference
# ---------------------------------------------------------------------------

def init_block_params(key, in_filters, out_filters, reps, strides):
    keys = iter(jax.random.split(key, 8 * reps + 8))
    params = {"dws": []}
    filters = in_filters
    for i in range(reps):
        layer = {
            "dw_w": 0.2 * jax.random.normal(next(keys), (3, 3, filters), jnp.float32),
            "pw_w": 0.2 * jax.random.normal(next(keys), (filters, out_filters), jnp.float32),
            "bn_gamma": 1.0 + 0.1 * jax.random.normal(next(keys), (out_filters,), jnp.float32),
            "bn_beta": 0.1 * jax.random.normal(next(keys), (out_filters,), jnp.float32),
            "bn_mean": 0.1 * jax.random.normal(next(keys), (out_filters,), jnp.float32),
            "bn_var": jax.random.uniform(next(keys), (out_filters,), jnp.float32, 0.5, 1.5),
            "use_relu": i != reps - 1,
        }
        params["dws"].append(layer)
        if i == 0:
            filters = out_filters
    if out_filters != in_filters or strides != 1:
        params["skip_w"] = 0.2 * jax.random.normal(next(keys), (in_filters, out_filters), jnp.float32)
        params["skip_bn_gamma"] = 1.0 + 0.1 * jax.random.normal(next(keys), (out_filters,), jnp.float32)
        params["skip_bn_beta"] = 0.1 * jax.random.normal(next(keys), (out_filters,), jnp.float32)
        params["skip_bn_mean"] = 0.1 * jax.random.normal(next(keys), (out_filters,), jnp.float32)
        params["skip_bn_var"] = jax.random.uniform(next(keys), (out_filters,), jnp.float32, 0.5, 1.5)
    return params


def ref_forward(params, x, strides, eps=1e-5):
    dn = ("NHWC", "HWIO", "NHWC")
    out = x
    for layer in params["dws"]:
        C = out.shape[-1]
        out = lax.conv_general_dilated(out, layer["dw_w"].reshape(3, 3, 1, C), (1, 1),
                                       ((1, 1), (1, 1)), dimension_numbers=dn,
                                       feature_group_count=C)
        cin, cout = layer["pw_w"].shape
        out = lax.conv_general_dilated(out, layer["pw_w"].reshape(1, 1, cin, cout), (1, 1),
                                       "VALID", dimension_numbers=dn)
        out = (out - layer["bn_mean"]) / jnp.sqrt(layer["bn_var"] + eps) * layer["bn_gamma"] + layer["bn_beta"]
        if layer["use_relu"]:
            out = jnp.maximum(out, 0.0)
    if strides != 1:
        out = lax.reduce_window(out, -jnp.inf, lax.max, (1, 3, 3, 1), (1, strides, strides, 1),
                                ((0, 0), (1, 1), (1, 1), (0, 0)))
    if "skip_w" in params:
        cin, cout = params["skip_w"].shape
        skip = lax.conv_general_dilated(x, params["skip_w"].reshape(1, 1, cin, cout),
                                        (strides, strides), "VALID", dimension_numbers=dn)
        skip = ((skip - params["skip_bn_mean"]) / jnp.sqrt(params["skip_bn_var"] + eps)
                * params["skip_bn_gamma"] + params["skip_bn_beta"])
    else:
        skip = x
    return out + skip


if __name__ == "__main__":
    key = jax.random.PRNGKey(0)
    k1, k2, k3, k4 = jax.random.split(key, 4)

    # Tolerance: the kernel uses bf16 MXU operands (pointwise / skip matmuls),
    # the reference is pure f32 -> ~1e-3 level discrepancies are expected.
    RTOL = ATOL = 2e-2

    # Config 1: Block(4, 8, reps=2, strides=2) on NHWC input (2, 16, 16, 4)
    # (== PyTorch NCHW input [2, 4, 16, 16]).
    params = init_block_params(k1, 4, 8, 2, 2)
    x = jax.random.normal(k2, (2, 16, 16, 4), jnp.float32)
    out = jax.block_until_ready(block_forward(params, x, 2))
    ref = ref_forward(params, x, 2)
    np.testing.assert_allclose(np.asarray(out), np.asarray(ref), rtol=RTOL, atol=ATOL)

    # Config 2: identity-skip path, Block(8, 8, reps=2, strides=1).
    params2 = init_block_params(k3, 8, 8, 2, 1)
    x2 = jax.random.normal(k4, (2, 16, 16, 8), jnp.float32)
    out2 = jax.block_until_ready(block_forward(params2, x2, 1))
    ref2 = ref_forward(params2, x2, 1)
    np.testing.assert_allclose(np.asarray(out2), np.asarray(ref2), rtol=RTOL, atol=ATOL)

    print("KERNEL_OK")
</pallas_src>

<mosaic_0001>
module attributes {stable_mosaic.version = 11 : i64} {
  func.func @_block_kernel(%arg0: i32, %arg1: memref<1x16x16x4xf32, #tpu.memory_space<vmem>>, %arg2: memref<3x3x4xf32, #tpu.memory_space<vmem>>, %arg3: memref<4x8xbf16, #tpu.memory_space<vmem>>, %arg4: memref<1x8xf32, #tpu.memory_space<vmem>>, %arg5: memref<3x3x8xf32, #tpu.memory_space<vmem>>, %arg6: memref<8x8xbf16, #tpu.memory_space<vmem>>, %arg7: memref<1x8xf32, #tpu.memory_space<vmem>>, %arg8: memref<4x8xbf16, #tpu.memory_space<vmem>>, %arg9: memref<1x8xf32, #tpu.memory_space<vmem>>, %arg10: memref<8x16xf32, #tpu.memory_space<vmem>>, %arg11: memref<1x64x8xf32, #tpu.memory_space<vmem>>, %arg12: memref<18x32x8xf32, #tpu.memory_space<vmem>>, %arg13: memref<64x8xf32, #tpu.memory_space<vmem>>, %arg14: memref<64x4xf32, #tpu.memory_space<vmem>>) attributes {dimension_semantics = [#tpu.dimension_semantics<parallel>], iteration_bounds = array<i64: 2>, scalar_prefetch = 0 : i64, scratch_operands = 3 : i64, tpu.core_type = #tpu.core_type<tc>, window_params = [{transform_indices = @transform_0, window_bounds = array<i64: 1, 16, 16, 4>}, {pipeline_mode = #tpu.pipeline_mode<synchronous>, transform_indices = @transform_1, window_bounds = array<i64: 3, 3, 4>}, {pipeline_mode = #tpu.pipeline_mode<synchronous>, transform_indices = @transform_2, window_bounds = array<i64: 4, 8>}, {pipeline_mode = #tpu.pipeline_mode<synchronous>, transform_indices = @transform_3, window_bounds = array<i64: 1, 8>}, {pipeline_mode = #tpu.pipeline_mode<synchronous>, transform_indices = @transform_4, window_bounds = array<i64: 3, 3, 8>}, {pipeline_mode = #tpu.pipeline_mode<synchronous>, transform_indices = @transform_5, window_bounds = array<i64: 8, 8>}, {pipeline_mode = #tpu.pipeline_mode<synchronous>, transform_indices = @transform_6, window_bounds = array<i64: 1, 8>}, {pipeline_mode = #tpu.pipeline_mode<synchronous>, transform_indices = @transform_7, window_bounds = array<i64: 4, 8>}, {pipeline_mode = #tpu.pipeline_mode<synchronous>, transform_indices = @transform_8, window_bounds = array<i64: 1, 8>}, {pipeline_mode = #tpu.pipeline_mode<synchronous>, transform_indices = @transform_9, window_bounds = array<i64: 8, 16>}, {transform_indices = @transform_10, window_bounds = array<i64: 1, 64, 8>}]} {
    %c0 = arith.constant 0 : index
    %c0_0 = arith.constant 0 : index
    %c0_1 = arith.constant 0 : index
    %c0_2 = arith.constant 0 : index
    %0 = vector.load %arg1[%c0, %c0_0, %c0_1, %c0_2] : memref<1x16x16x4xf32, #tpu.memory_space<vmem>>, vector<1x16x16x4xf32>
    %1 = vector.shape_cast %0 : vector<1x16x16x4xf32> to vector<16x16x4xf32>
    %cst = arith.constant 0.000000e+00 : f32
    %2 = vector.broadcast %cst : f32 to vector<1x32x8xf32>
    %cst_3 = arith.constant 0.000000e+00 : f32
    %3 = vector.broadcast %cst_3 : f32 to vector<18x8x8xf32>
    %c0_4 = arith.constant 0 : index
    %c0_5 = arith.constant 0 : index
    %c0_6 = arith.constant 0 : index
    %4 = vector.load %arg12[%c0_4, %c0_5, %c0_6] : memref<18x32x8xf32, #tpu.memory_space<vmem>>, vector<1x32x8xf32>
    tpu.vector_store %arg12[%c0_4, %c0_5, %c0_6], %2 {strides = array<i32>} : memref<18x32x8xf32, #tpu.memory_space<vmem>>, vector<1x32x8xf32>,
    %c17 = arith.constant 17 : index
    %c0_7 = arith.constant 0 : index
    %c0_8 = arith.constant 0 : index
    %5 = vector.load %arg12[%c17, %c0_7, %c0_8] : memref<18x32x8xf32, #tpu.memory_space<vmem>>, vector<1x32x8xf32>
    tpu.vector_store %arg12[%c17, %c0_7, %c0_8], %2 {strides = array<i32>} : memref<18x32x8xf32, #tpu.memory_space<vmem>>, vector<1x32x8xf32>,
    %c0_9 = arith.constant 0 : index
    %c0_10 = arith.constant 0 : index
    %c0_11 = arith.constant 0 : index
    %6 = vector.load %arg12[%c0_9, %c0_10, %c0_11] : memref<18x32x8xf32, #tpu.memory_space<vmem>>, vector<18x8x8xf32>
    tpu.vector_store %arg12[%c0_9, %c0_10, %c0_11], %3 {strides = array<i32>} : memref<18x32x8xf32, #tpu.memory_space<vmem>>, vector<18x8x8xf32>,
    %c0_12 = arith.constant 0 : index
    %c24 = arith.constant 24 : index
    %c0_13 = arith.constant 0 : index
    %7 = vector.load %arg12[%c0_12, %c24, %c0_13] : memref<18x32x8xf32, #tpu.memory_space<vmem>>, vector<18x8x8xf32>
    tpu.vector_store %arg12[%c0_12, %c24, %c0_13], %3 {strides = array<i32>} : memref<18x32x8xf32, #tpu.memory_space<vmem>>, vector<18x8x8xf32>,
    %c1 = arith.constant 1 : index
    %c8 = arith.constant 8 : index
    %c0_14 = arith.constant 0 : index
    %8 = vector.load %arg12[%c1, %c8, %c0_14] : memref<18x32x8xf32, #tpu.memory_space<vmem>>, vector<16x16x4xf32>
    tpu.vector_store %arg12[%c1, %c8, %c0_14], %1 {strides = array<i32>} : memref<18x32x8xf32, #tpu.memory_space<vmem>>, vector<16x16x4xf32>,
    %c0_15 = arith.constant 0 : index
    %c0_16 = arith.constant 0 : index
    %c0_17 = arith.constant 0 : index
    %9 = vector.load %arg2[%c0_15, %c0_16, %c0_17] : memref<3x3x4xf32, #tpu.memory_space<vmem>>, vector<3x3x4xf32>
    %c0_18 = arith.constant 0 : index
    %c7 = arith.constant 7 : index
    %c0_19 = arith.constant 0 : index
    %10 = vector.load %arg12[%c0_18, %c7, %c0_19] : memref<18x32x8xf32, #tpu.memory_space<vmem>>, vector<16x16x4xf32>
    %11 = vector.extract_strided_slice %9 {offsets = [0, 0, 0], sizes = [1, 1, 4], strides = [1, 1, 1]} : vector<3x3x4xf32> to vector<1x1x4xf32>
    %12 = vector.broadcast %11 : vector<1x1x4xf32> to vector<16x16x4xf32>
    %13 = arith.mulf %10, %12 : vector<16x16x4xf32>
    %c0_20 = arith.constant 0 : index
    %c8_21 = arith.constant 8 : index
    %c0_22 = arith.constant 0 : index
    %14 = vector.load %arg12[%c0_20, %c8_21, %c0_22] : memref<18x32x8xf32, #tpu.memory_space<vmem>>, vector<16x16x4xf32>
    %15 = vector.extract_strided_slice %9 {offsets = [0, 1, 0], sizes = [1, 1, 4], strides = [1, 1, 1]} : vector<3x3x4xf32> to vector<1x1x4xf32>
    %16 = vector.broadcast %15 : vector<1x1x4xf32> to vector<16x16x4xf32>
    %17 = arith.mulf %14, %16 : vector<16x16x4xf32>
    %18 = arith.addf %13, %17 : vector<16x16x4xf32>
    %c0_23 = arith.constant 0 : index
    %c9 = arith.constant 9 : index
    %c0_24 = arith.constant 0 : index
    %19 = vector.load %arg12[%c0_23, %c9, %c0_24] : memref<18x32x8xf32, #tpu.memory_space<vmem>>, vector<16x16x4xf32>
    %20 = vector.extract_strided_slice %9 {offsets = [0, 2, 0], sizes = [1, 1, 4], strides = [1, 1, 1]} : vector<3x3x4xf32> to vector<1x1x4xf32>
    %21 = vector.broadcast %20 : vector<1x1x4xf32> to vector<16x16x4xf32>
    %22 = arith.mulf %19, %21 : vector<16x16x4xf32>
    %23 = arith.addf %18, %22 : vector<16x16x4xf32>
    %c1_25 = arith.constant 1 : index
    %c7_26 = arith.constant 7 : index
    %c0_27 = arith.constant 0 : index
    %24 = vector.load %arg12[%c1_25, %c7_26, %c0_27] : memref<18x32x8xf32, #tpu.memory_space<vmem>>, vector<16x16x4xf32>
    %25 = vector.extract_strided_slice %9 {offsets = [1, 0, 0], sizes = [1, 1, 4], strides = [1, 1, 1]} : vector<3x3x4xf32> to vector<1x1x4xf32>
    %26 = vector.broadcast %25 : vector<1x1x4xf32> to vector<16x16x4xf32>
    %27 = arith.mulf %24, %26 : vector<16x16x4xf32>
    %28 = arith.addf %23, %27 : vector<16x16x4xf32>
    %c1_28 = arith.constant 1 : index
    %c8_29 = arith.constant 8 : index
    %c0_30 = arith.constant 0 : index
    %29 = vector.load %arg12[%c1_28, %c8_29, %c0_30] : memref<18x32x8xf32, #tpu.memory_space<vmem>>, vector<16x16x4xf32>
    %30 = vector.extract_strided_slice %9 {offsets = [1, 1, 0], sizes = [1, 1, 4], strides = [1, 1, 1]} : vector<3x3x4xf32> to vector<1x1x4xf32>
    %31 = vector.broadcast %30 : vector<1x1x4xf32> to vector<16x16x4xf32>
    %32 = arith.mulf %29, %31 : vector<16x16x4xf32>
    %33 = arith.addf %28, %32 : vector<16x16x4xf32>
    %c1_31 = arith.constant 1 : index
    %c9_32 = arith.constant 9 : index
    %c0_33 = arith.constant 0 : index
    %34 = vector.load %arg12[%c1_31, %c9_32, %c0_33] : memref<18x32x8xf32, #tpu.memory_space<vmem>>, vector<16x16x4xf32>
    %35 = vector.extract_strided_slice %9 {offsets = [1, 2, 0], sizes = [1, 1, 4], strides = [1, 1, 1]} : vector<3x3x4xf32> to vector<1x1x4xf32>
    %36 = vector.broadcast %35 : vector<1x1x4xf32> to vector<16x16x4xf32>
    %37 = arith.mulf %34, %36 : vector<16x16x4xf32>
    %38 = arith.addf %33, %37 : vector<16x16x4xf32>
    %c2 = arith.constant 2 : index
    %c7_34 = arith.constant 7 : index
    %c0_35 = arith.constant 0 : index
    %39 = vector.load %arg12[%c2, %c7_34, %c0_35] : memref<18x32x8xf32, #tpu.memory_space<vmem>>, vector<16x16x4xf32>
    %40 = vector.extract_strided_slice %9 {offsets = [2, 0, 0], sizes = [1, 1, 4], strides = [1, 1, 1]} : vector<3x3x4xf32> to vector<1x1x4xf32>
    %41 = vector.broadcast %40 : vector<1x1x4xf32> to vector<16x16x4xf32>
    %42 = arith.mulf %39, %41 : vector<16x16x4xf32>
    %43 = arith.addf %38, %42 : vector<16x16x4xf32>
    %c2_36 = arith.constant 2 : index
    %c8_37 = arith.constant 8 : index
    %c0_38 = arith.constant 0 : index
    %44 = vector.load %arg12[%c2_36, %c8_37, %c0_38] : memref<18x32x8xf32, #tpu.memory_space<vmem>>, vector<16x16x4xf32>
    %45 = vector.extract_strided_slice %9 {offsets = [2, 1, 0], sizes = [1, 1, 4], strides = [1, 1, 1]} : vector<3x3x4xf32> to vector<1x1x4xf32>
    %46 = vector.broadcast %45 : vector<1x1x4xf32> to vector<16x16x4xf32>
    %47 = arith.mulf %44, %46 : vector<16x16x4xf32>
    %48 = arith.addf %43, %47 : vector<16x16x4xf32>
    %c2_39 = arith.constant 2 : index
    %c9_40 = arith.constant 9 : index
    %c0_41 = arith.constant 0 : index
    %49 = vector.load %arg12[%c2_39, %c9_40, %c0_41] : memref<18x32x8xf32, #tpu.memory_space<vmem>>, vector<16x16x4xf32>
    %50 = vector.extract_strided_slice %9 {offsets = [2, 2, 0], sizes = [1, 1, 4], strides = [1, 1, 1]} : vector<3x3x4xf32> to vector<1x1x4xf32>
    %51 = vector.broadcast %50 : vector<1x1x4xf32> to vector<16x16x4xf32>
    %52 = arith.mulf %49, %51 : vector<16x16x4xf32>
    %53 = arith.addf %48, %52 : vector<16x16x4xf32>
    %54 = vector.shape_cast %53 : vector<16x16x4xf32> to vector<256x4xf32>
    %55 = arith.truncf %54 : vector<256x4xf32> to vector<256x4xbf16>
    %c0_42 = arith.constant 0 : index
    %c0_43 = arith.constant 0 : index
    %56 = vector.load %arg3[%c0_42, %c0_43] : memref<4x8xbf16, #tpu.memory_space<vmem>>, vector<4x8xbf16>
    %cst_44 = arith.constant dense<0.000000e+00> : vector<256x8xf32>
    %57 = tpu.matmul %55, %56, %cst_44 {dimension_numbers = #tpu.dot_dimension_numbers<[1], [0], [0], [1], [0, 0, 1, 1], [], []>} : vector<256x4xbf16>, vector<4x8xbf16>, vector<256x8xf32> -> vector<256x8xf32>
    %c0_45 = arith.constant 0 : index
    %c0_46 = arith.constant 0 : index
    %58 = vector.load %arg4[%c0_45, %c0_46] : memref<1x8xf32, #tpu.memory_space<vmem>>, vector<1x8xf32>
    %59 = vector.broadcast %58 : vector<1x8xf32> to vector<256x8xf32>
    %60 = arith.addf %57, %59 : vector<256x8xf32>
    %cst_47 = arith.constant 0.000000e+00 : f32
    %61 = vector.broadcast %cst_47 : f32 to vector<256x8xf32>
    %62 = arith.maximumf %60, %61 : vector<256x8xf32>
    %63 = vector.shape_cast %62 : vector<256x8xf32> to vector<16x16x8xf32>
    %c1_48 = arith.constant 1 : index
    %c8_49 = arith.constant 8 : index
    %c0_50 = arith.constant 0 : index
    %64 = vector.load %arg12[%c1_48, %c8_49, %c0_50] : memref<18x32x8xf32, #tpu.memory_space<vmem>>, vector<16x16x8xf32>
    tpu.vector_store %arg12[%c1_48, %c8_49, %c0_50], %63 {strides = array<i32>} : memref<18x32x8xf32, #tpu.memory_space<vmem>>, vector<16x16x8xf32>,
    %c0_51 = arith.constant 0 : index
    %c0_52 = arith.constant 0 : index
    %c0_53 = arith.constant 0 : index
    %65 = vector.load %arg5[%c0_51, %c0_52, %c0_53] : memref<3x3x8xf32, #tpu.memory_space<vmem>>, vector<3x3x8xf32>
    %c0_54 = arith.constant 0 : index
    %c7_55 = arith.constant 7 : index
    %c0_56 = arith.constant 0 : index
    %66 = vector.load %arg12[%c0_54, %c7_55, %c0_56] : memref<18x32x8xf32, #tpu.memory_space<vmem>>, vector<16x16x8xf32>
    %67 = vector.extract_strided_slice %65 {offsets = [0, 0, 0], sizes = [1, 1, 8], strides = [1, 1, 1]} : vector<3x3x8xf32> to vector<1x1x8xf32>
    %68 = vector.broadcast %67 : vector<1x1x8xf32> to vector<16x16x8xf32>
    %69 = arith.mulf %66, %68 : vector<16x16x8xf32>
    %c0_57 = arith.constant 0 : index
    %c8_58 = arith.constant 8 : index
    %c0_59 = arith.constant 0 : index
    %70 = vector.load %arg12[%c0_57, %c8_58, %c0_59] : memref<18x32x8xf32, #tpu.memory_space<vmem>>, vector<16x16x8xf32>
    %71 = vector.extract_strided_slice %65 {offsets = [0, 1, 0], sizes = [1, 1, 8], strides = [1, 1, 1]} : vector<3x3x8xf32> to vector<1x1x8xf32>
    %72 = vector.broadcast %71 : vector<1x1x8xf32> to vector<16x16x8xf32>
    %73 = arith.mulf %70, %72 : vector<16x16x8xf32>
    %74 = arith.addf %69, %73 : vector<16x16x8xf32>
    %c0_60 = arith.constant 0 : index
    %c9_61 = arith.constant 9 : index
    %c0_62 = arith.constant 0 : index
    %75 = vector.load %arg12[%c0_60, %c9_61, %c0_62] : memref<18x32x8xf32, #tpu.memory_space<vmem>>, vector<16x16x8xf32>
    %76 = vector.extract_strided_slice %65 {offsets = [0, 2, 0], sizes = [1, 1, 8], strides = [1, 1, 1]} : vector<3x3x8xf32> to vector<1x1x8xf32>
    %77 = vector.broadcast %76 : vector<1x1x8xf32> to vector<16x16x8xf32>
    %78 = arith.mulf %75, %77 : vector<16x16x8xf32>
    %79 = arith.addf %74, %78 : vector<16x16x8xf32>
    %c1_63 = arith.constant 1 : index
    %c7_64 = arith.constant 7 : index
    %c0_65 = arith.constant 0 : index
    %80 = vector.load %arg12[%c1_63, %c7_64, %c0_65] : memref<18x32x8xf32, #tpu.memory_space<vmem>>, vector<16x16x8xf32>
    %81 = vector.extract_strided_slice %65 {offsets = [1, 0, 0], sizes = [1, 1, 8], strides = [1, 1, 1]} : vector<3x3x8xf32> to vector<1x1x8xf32>
    %82 = vector.broadcast %81 : vector<1x1x8xf32> to vector<16x16x8xf32>
    %83 = arith.mulf %80, %82 : vector<16x16x8xf32>
    %84 = arith.addf %79, %83 : vector<16x16x8xf32>
    %c1_66 = arith.constant 1 : index
    %c8_67 = arith.constant 8 : index
    %c0_68 = arith.constant 0 : index
    %85 = vector.load %arg12[%c1_66, %c8_67, %c0_68] : memref<18x32x8xf32, #tpu.memory_space<vmem>>, vector<16x16x8xf32>
    %86 = vector.extract_strided_slice %65 {offsets = [1, 1, 0], sizes = [1, 1, 8], strides = [1, 1, 1]} : vector<3x3x8xf32> to vector<1x1x8xf32>
    %87 = vector.broadcast %86 : vector<1x1x8xf32> to vector<16x16x8xf32>
    %88 = arith.mulf %85, %87 : vector<16x16x8xf32>
    %89 = arith.addf %84, %88 : vector<16x16x8xf32>
    %c1_69 = arith.constant 1 : index
    %c9_70 = arith.constant 9 : index
    %c0_71 = arith.constant 0 : index
    %90 = vector.load %arg12[%c1_69, %c9_70, %c0_71] : memref<18x32x8xf32, #tpu.memory_space<vmem>>, vector<16x16x8xf32>
    %91 = vector.extract_strided_slice %65 {offsets = [1, 2, 0], sizes = [1, 1, 8], strides = [1, 1, 1]} : vector<3x3x8xf32> to vector<1x1x8xf32>
    %92 = vector.broadcast %91 : vector<1x1x8xf32> to vector<16x16x8xf32>
    %93 = arith.mulf %90, %92 : vector<16x16x8xf32>
    %94 = arith.addf %89, %93 : vector<16x16x8xf32>
    %c2_72 = arith.constant 2 : index
    %c7_73 = arith.constant 7 : index
    %c0_74 = arith.constant 0 : index
    %95 = vector.load %arg12[%c2_72, %c7_73, %c0_74] : memref<18x32x8xf32, #tpu.memory_space<vmem>>, vector<16x16x8xf32>
    %96 = vector.extract_strided_slice %65 {offsets = [2, 0, 0], sizes = [1, 1, 8], strides = [1, 1, 1]} : vector<3x3x8xf32> to vector<1x1x8xf32>
    %97 = vector.broadcast %96 : vector<1x1x8xf32> to vector<16x16x8xf32>
    %98 = arith.mulf %95, %97 : vector<16x16x8xf32>
    %99 = arith.addf %94, %98 : vector<16x16x8xf32>
    %c2_75 = arith.constant 2 : index
    %c8_76 = arith.constant 8 : index
    %c0_77 = arith.constant 0 : index
    %100 = vector.load %arg12[%c2_75, %c8_76, %c0_77] : memref<18x32x8xf32, #tpu.memory_space<vmem>>, vector<16x16x8xf32>
    %101 = vector.extract_strided_slice %65 {offsets = [2, 1, 0], sizes = [1, 1, 8], strides = [1, 1, 1]} : vector<3x3x8xf32> to vector<1x1x8xf32>
    %102 = vector.broadcast %101 : vector<1x1x8xf32> to vector<16x16x8xf32>
    %103 = arith.mulf %100, %102 : vector<16x16x8xf32>
    %104 = arith.addf %99, %103 : vector<16x16x8xf32>
    %c2_78 = arith.constant 2 : index
    %c9_79 = arith.constant 9 : index
    %c0_80 = arith.constant 0 : index
    %105 = vector.load %arg12[%c2_78, %c9_79, %c0_80] : memref<18x32x8xf32, #tpu.memory_space<vmem>>, vector<16x16x8xf32>
    %106 = vector.extract_strided_slice %65 {offsets = [2, 2, 0], sizes = [1, 1, 8], strides = [1, 1, 1]} : vector<3x3x8xf32> to vector<1x1x8xf32>
    %107 = vector.broadcast %106 : vector<1x1x8xf32> to vector<16x16x8xf32>
    %108 = arith.mulf %105, %107 : vector<16x16x8xf32>
    %109 = arith.addf %104, %108 : vector<16x16x8xf32>
    %110 = vector.shape_cast %109 : vector<16x16x8xf32> to vector<256x8xf32>
    %111 = arith.truncf %110 : vector<256x8xf32> to vector<256x8xbf16>
    %c0_81 = arith.constant 0 : index
    %c0_82 = arith.constant 0 : index
    %112 = vector.load %arg6[%c0_81, %c0_82] : memref<8x8xbf16, #tpu.memory_space<vmem>>, vector<8x8xbf16>
    %cst_83 = arith.constant dense<0.000000e+00> : vector<256x8xf32>
    %113 = tpu.matmul %111, %112, %cst_83 {dimension_numbers = #tpu.dot_dimension_numbers<[1], [0], [0], [1], [0, 0, 1, 1], [], []>} : vector<256x8xbf16>, vector<8x8xbf16>, vector<256x8xf32> -> vector<256x8xf32>
    %c0_84 = arith.constant 0 : index
    %c0_85 = arith.constant 0 : index
    %114 = vector.load %arg7[%c0_84, %c0_85] : memref<1x8xf32, #tpu.memory_space<vmem>>, vector<1x8xf32>
    %115 = vector.broadcast %114 : vector<1x8xf32> to vector<256x8xf32>
    %116 = arith.addf %113, %115 : vector<256x8xf32>
    %117 = vector.shape_cast %116 : vector<256x8xf32> to vector<16x16x8xf32>
    %c0_86 = arith.constant 0 : index
    %c0_87 = arith.constant 0 : index
    %118 = vector.load %arg10[%c0_86, %c0_87] : memref<8x16xf32, #tpu.memory_space<vmem>>, vector<8x16xf32>
    %cst_88 = arith.constant 0xFF800000 : f32
    %119 = vector.broadcast %cst_88 : f32 to vector<1x32x8xf32>
    %cst_89 = arith.constant 0xFF800000 : f32
    %120 = vector.broadcast %cst_89 : f32 to vector<18x8x8xf32>
    %c0_90 = arith.constant 0 : index
    %c0_91 = arith.constant 0 : index
    %c0_92 = arith.constant 0 : index
    %121 = vector.load %arg12[%c0_90, %c0_91, %c0_92] : memref<18x32x8xf32, #tpu.memory_space<vmem>>, vector<1x32x8xf32>
    tpu.vector_store %arg12[%c0_90, %c0_91, %c0_92], %119 {strides = array<i32>} : memref<18x32x8xf32, #tpu.memory_space<vmem>>, vector<1x32x8xf32>,
    %c17_93 = arith.constant 17 : index
    %c0_94 = arith.constant 0 : index
    %c0_95 = arith.constant 0 : index
    %122 = vector.load %arg12[%c17_93, %c0_94, %c0_95] : memref<18x32x8xf32, #tpu.memory_space<vmem>>, vector<1x32x8xf32>
    tpu.vector_store %arg12[%c17_93, %c0_94, %c0_95], %119 {strides = array<i32>} : memref<18x32x8xf32, #tpu.memory_space<vmem>>, vector<1x32x8xf32>,
    %c0_96 = arith.constant 0 : index
    %c0_97 = arith.constant 0 : index
    %c0_98 = arith.constant 0 : index
    %123 = vector.load %arg12[%c0_96, %c0_97, %c0_98] : memref<18x32x8xf32, #tpu.memory_space<vmem>>, vector<18x8x8xf32>
    tpu.vector_store %arg12[%c0_96, %c0_97, %c0_98], %120 {strides = array<i32>} : memref<18x32x8xf32, #tpu.memory_space<vmem>>, vector<18x8x8xf32>,
    %c0_99 = arith.constant 0 : index
    %c24_100 = arith.constant 24 : index
    %c0_101 = arith.constant 0 : index
    %124 = vector.load %arg12[%c0_99, %c24_100, %c0_101] : memref<18x32x8xf32, #tpu.memory_space<vmem>>, vector<18x8x8xf32>
    tpu.vector_store %arg12[%c0_99, %c24_100, %c0_101], %120 {strides = array<i32>} : memref<18x32x8xf32, #tpu.memory_space<vmem>>, vector<18x8x8xf32>,
    %c1_102 = arith.constant 1 : index
    %c8_103 = arith.constant 8 : index
    %c0_104 = arith.constant 0 : index
    %125 = vector.load %arg12[%c1_102, %c8_103, %c0_104] : memref<18x32x8xf32, #tpu.memory_space<vmem>>, vector<16x16x8xf32>
    tpu.vector_store %arg12[%c1_102, %c8_103, %c0_104], %117 {strides = array<i32>} : memref<18x32x8xf32, #tpu.memory_space<vmem>>, vector<16x16x8xf32>,
    %c0_105 = arith.constant 0 : index
    %c7_106 = arith.constant 7 : index
    %c0_107 = arith.constant 0 : index
    %126 = vector.load %arg12[%c0_105, %c7_106, %c0_107] : memref<18x32x8xf32, #tpu.memory_space<vmem>>, vector<3x18x8xf32>
    %127 = vector.extract_strided_slice %126 {offsets = [0, 0, 0], sizes = [1, 18, 8], strides = [1, 1, 1]} : vector<3x18x8xf32> to vector<1x18x8xf32>
    %128 = vector.shape_cast %127 : vector<1x18x8xf32> to vector<18x8xf32>
    %129 = vector.extract_strided_slice %126 {offsets = [1, 0, 0], sizes = [1, 18, 8], strides = [1, 1, 1]} : vector<3x18x8xf32> to vector<1x18x8xf32>
    %130 = vector.shape_cast %129 : vector<1x18x8xf32> to vector<18x8xf32>
    %131 = arith.maximumf %128, %130 : vector<18x8xf32>
    %132 = vector.extract_strided_slice %126 {offsets = [2, 0, 0], sizes = [1, 18, 8], strides = [1, 1, 1]} : vector<3x18x8xf32> to vector<1x18x8xf32>
    %133 = vector.shape_cast %132 : vector<1x18x8xf32> to vector<18x8xf32>
    %134 = arith.maximumf %131, %133 : vector<18x8xf32>
    %135 = vector.extract_strided_slice %134 {offsets = [0, 0], sizes = [16, 8], strides = [1, 1]} : vector<18x8xf32> to vector<16x8xf32>
    %136 = vector.extract_strided_slice %134 {offsets = [1, 0], sizes = [16, 8], strides = [1, 1]} : vector<18x8xf32> to vector<16x8xf32>
    %137 = arith.maximumf %135, %136 : vector<16x8xf32>
    %138 = vector.extract_strided_slice %134 {offsets = [2, 0], sizes = [16, 8], strides = [1, 1]} : vector<18x8xf32> to vector<16x8xf32>
    %139 = arith.maximumf %137, %138 : vector<16x8xf32>
    %cst_108 = arith.constant dense<0.000000e+00> : vector<8x8xf32>
    %140 = tpu.matmul %118, %139, %cst_108 {dimension_numbers = #tpu.dot_dimension_numbers<[1], [0], [0], [1], [0, 0, 1, 1], [], []>} : vector<8x16xf32>, vector<16x8xf32>, vector<8x8xf32> -> vector<8x8xf32>
    %c0_109 = arith.constant 0 : index
    %c0_110 = arith.constant 0 : index
    %141 = vector.load %arg13[%c0_109, %c0_110] : memref<64x8xf32, #tpu.memory_space<vmem>>, vector<8x8xf32>
    tpu.vector_store %arg13[%c0_109, %c0_110], %140 {strides = array<i32>} : memref<64x8xf32, #tpu.memory_space<vmem>>, vector<8x8xf32>,
    %142 = vector.extract_strided_slice %1 {offsets = [0, 0, 0], sizes = [1, 16, 4], strides = [1, 1, 1]} : vector<16x16x4xf32> to vector<1x16x4xf32>
    %143 = vector.shape_cast %142 : vector<1x16x4xf32> to vector<16x4xf32>
    %cst_111 = arith.constant dense<0.000000e+00> : vector<8x4xf32>
    %144 = tpu.matmul %118, %143, %cst_111 {dimension_numbers = #tpu.dot_dimension_numbers<[1], [0], [0], [1], [0, 0, 1, 1], [], []>} : vector<8x16xf32>, vector<16x4xf32>, vector<8x4xf32> -> vector<8x4xf32>
    %c0_112 = arith.constant 0 : index
    %c0_113 = arith.constant 0 : index
    %145 = vector.load %arg14[%c0_112, %c0_113] : memref<64x4xf32, #tpu.memory_space<vmem>>, vector<8x4xf32>
    tpu.vector_store %arg14[%c0_112, %c0_113], %144 {strides = array<i32>} : memref<64x4xf32, #tpu.memory_space<vmem>>, vector<8x4xf32>,
    %c2_114 = arith.constant 2 : index
    %c7_115 = arith.constant 7 : index
    %c0_116 = arith.constant 0 : index
    %146 = vector.load %arg12[%c2_114, %c7_115, %c0_116] : memref<18x32x8xf32, #tpu.memory_space<vmem>>, vector<3x18x8xf32>
    %147 = vector.extract_strided_slice %146 {offsets = [0, 0, 0], sizes = [1, 18, 8], strides = [1, 1, 1]} : vector<3x18x8xf32> to vector<1x18x8xf32>
    %148 = vector.shape_cast %147 : vector<1x18x8xf32> to vector<18x8xf32>
    %149 = vector.extract_strided_slice %146 {offsets = [1, 0, 0], sizes = [1, 18, 8], strides = [1, 1, 1]} : vector<3x18x8xf32> to vector<1x18x8xf32>
    %150 = vector.shape_cast %149 : vector<1x18x8xf32> to vector<18x8xf32>
    %151 = arith.maximumf %148, %150 : vector<18x8xf32>
    %152 = vector.extract_strided_slice %146 {offsets = [2, 0, 0], sizes = [1, 18, 8], strides = [1, 1, 1]} : vector<3x18x8xf32> to vector<1x18x8xf32>
    %153 = vector.shape_cast %152 : vector<1x18x8xf32> to vector<18x8xf32>
    %154 = arith.maximumf %151, %153 : vector<18x8xf32>
    %155 = vector.extract_strided_slice %154 {offsets = [0, 0], sizes = [16, 8], strides = [1, 1]} : vector<18x8xf32> to vector<16x8xf32>
    %156 = vector.extract_strided_slice %154 {offsets = [1, 0], sizes = [16, 8], strides = [1, 1]} : vector<18x8xf32> to vector<16x8xf32>
    %157 = arith.maximumf %155, %156 : vector<16x8xf32>
    %158 = vector.extract_strided_slice %154 {offsets = [2, 0], sizes = [16, 8], strides = [1, 1]} : vector<18x8xf32> to vector<16x8xf32>
    %159 = arith.maximumf %157, %158 : vector<16x8xf32>
    %cst_117 = arith.constant dense<0.000000e+00> : vector<8x8xf32>
    %160 = tpu.matmul %118, %159, %cst_117 {dimension_numbers = #tpu.dot_dimension_numbers<[1], [0], [0], [1], [0, 0, 1, 1], [], []>} : vector<8x16xf32>, vector<16x8xf32>, vector<8x8xf32> -> vector<8x8xf32>
    %c8_118 = arith.constant 8 : index
    %c0_119 = arith.constant 0 : index
    %161 = vector.load %arg13[%c8_118, %c0_119] : memref<64x8xf32, #tpu.memory_space<vmem>>, vector<8x8xf32>
    tpu.vector_store %arg13[%c8_118, %c0_119], %160 {strides = array<i32>} : memref<64x8xf32, #tpu.memory_space<vmem>>, vector<8x8xf32>,
    %162 = vector.extract_strided_slice %1 {offsets = [2, 0, 0], sizes = [1, 16, 4], strides = [1, 1, 1]} : vector<16x16x4xf32> to vector<1x16x4xf32>
    %163 = vector.shape_cast %162 : vector<1x16x4xf32> to vector<16x4xf32>
    %cst_120 = arith.constant dense<0.000000e+00> : vector<8x4xf32>
    %164 = tpu.matmul %118, %163, %cst_120 {dimension_numbers = #tpu.dot_dimension_numbers<[1], [0], [0], [1], [0, 0, 1, 1], [], []>} : vector<8x16xf32>, vector<16x4xf32>, vector<8x4xf32> -> vector<8x4xf32>
    %c8_121 = arith.constant 8 : index
    %c0_122 = arith.constant 0 : index
    %165 = vector.load %arg14[%c8_121, %c0_122] : memref<64x4xf32, #tpu.memory_space<vmem>>, vector<8x4xf32>
    tpu.vector_store %arg14[%c8_121, %c0_122], %164 {strides = array<i32>} : memref<64x4xf32, #tpu.memory_space<vmem>>, vector<8x4xf32>,
    %c4 = arith.constant 4 : index
    %c7_123 = arith.constant 7 : index
    %c0_124 = arith.constant 0 : index
    %166 = vector.load %arg12[%c4, %c7_123, %c0_124] : memref<18x32x8xf32, #tpu.memory_space<vmem>>, vector<3x18x8xf32>
    %167 = vector.extract_strided_slice %166 {offsets = [0, 0, 0], sizes = [1, 18, 8], strides = [1, 1, 1]} : vector<3x18x8xf32> to vector<1x18x8xf32>
    %168 = vector.shape_cast %167 : vector<1x18x8xf32> to vector<18x8xf32>
    %169 = vector.extract_strided_slice %166 {offsets = [1, 0, 0], sizes = [1, 18, 8], strides = [1, 1, 1]} : vector<3x18x8xf32> to vector<1x18x8xf32>
    %170 = vector.shape_cast %169 : vector<1x18x8xf32> to vector<18x8xf32>
    %171 = arith.maximumf %168, %170 : vector<18x8xf32>
    %172 = vector.extract_strided_slice %166 {offsets = [2, 0, 0], sizes = [1, 18, 8], strides = [1, 1, 1]} : vector<3x18x8xf32> to vector<1x18x8xf32>
    %173 = vector.shape_cast %172 : vector<1x18x8xf32> to vector<18x8xf32>
    %174 = arith.maximumf %171, %173 : vector<18x8xf32>
    %175 = vector.extract_strided_slice %174 {offsets = [0, 0], sizes = [16, 8], strides = [1, 1]} : vector<18x8xf32> to vector<16x8xf32>
    %176 = vector.extract_strided_slice %174 {offsets = [1, 0], sizes = [16, 8], strides = [1, 1]} : vector<18x8xf32> to vector<16x8xf32>
    %177 = arith.maximumf %175, %176 : vector<16x8xf32>
    %178 = vector.extract_strided_slice %174 {offsets = [2, 0], sizes = [16, 8], strides = [1, 1]} : vector<18x8xf32> to vector<16x8xf32>
    %179 = arith.maximumf %177, %178 : vector<16x8xf32>
    %cst_125 = arith.constant dense<0.000000e+00> : vector<8x8xf32>
    %180 = tpu.matmul %118, %179, %cst_125 {dimension_numbers = #tpu.dot_dimension_numbers<[1], [0], [0], [1], [0, 0, 1, 1], [], []>} : vector<8x16xf32>, vector<16x8xf32>, vector<8x8xf32> -> vector<8x8xf32>
    %c16 = arith.constant 16 : index
    %c0_126 = arith.constant 0 : index
    %181 = vector.load %arg13[%c16, %c0_126] : memref<64x8xf32, #tpu.memory_space<vmem>>, vector<8x8xf32>
    tpu.vector_store %arg13[%c16, %c0_126], %180 {strides = array<i32>} : memref<64x8xf32, #tpu.memory_space<vmem>>, vector<8x8xf32>,
    %182 = vector.extract_strided_slice %1 {offsets = [4, 0, 0], sizes = [1, 16, 4], strides = [1, 1, 1]} : vector<16x16x4xf32> to vector<1x16x4xf32>
    %183 = vector.shape_cast %182 : vector<1x16x4xf32> to vector<16x4xf32>
    %cst_127 = arith.constant dense<0.000000e+00> : vector<8x4xf32>
    %184 = tpu.matmul %118, %183, %cst_127 {dimension_numbers = #tpu.dot_dimension_numbers<[1], [0], [0], [1], [0, 0, 1, 1], [], []>} : vector<8x16xf32>, vector<16x4xf32>, vector<8x4xf32> -> vector<8x4xf32>
    %c16_128 = arith.constant 16 : index
    %c0_129 = arith.constant 0 : index
    %185 = vector.load %arg14[%c16_128, %c0_129] : memref<64x4xf32, #tpu.memory_space<vmem>>, vector<8x4xf32>
    tpu.vector_store %arg14[%c16_128, %c0_129], %184 {strides = array<i32>} : memref<64x4xf32, #tpu.memory_space<vmem>>, vector<8x4xf32>,
    %c6 = arith.constant 6 : index
    %c7_130 = arith.constant 7 : index
    %c0_131 = arith.constant 0 : index
    %186 = vector.load %arg12[%c6, %c7_130, %c0_131] : memref<18x32x8xf32, #tpu.memory_space<vmem>>, vector<3x18x8xf32>
    %187 = vector.extract_strided_slice %186 {offsets = [0, 0, 0], sizes = [1, 18, 8], strides = [1, 1, 1]} : vector<3x18x8xf32> to vector<1x18x8xf32>
    %188 = vector.shape_cast %187 : vector<1x18x8xf32> to vector<18x8xf32>
    %189 = vector.extract_strided_slice %186 {offsets = [1, 0, 0], sizes = [1, 18, 8], strides = [1, 1, 1]} : vector<3x18x8xf32> to vector<1x18x8xf32>
    %190 = vector.shape_cast %189 : vector<1x18x8xf32> to vector<18x8xf32>
    %191 = arith.maximumf %188, %190 : vector<18x8xf32>
    %192 = vector.extract_strided_slice %186 {offsets = [2, 0, 0], sizes = [1, 18, 8], strides = [1, 1, 1]} : vector<3x18x8xf32> to vector<1x18x8xf32>
    %193 = vector.shape_cast %192 : vector<1x18x8xf32> to vector<18x8xf32>
    %194 = arith.maximumf %191, %193 : vector<18x8xf32>
    %195 = vector.extract_strided_slice %194 {offsets = [0, 0], sizes = [16, 8], strides = [1, 1]} : vector<18x8xf32> to vector<16x8xf32>
    %196 = vector.extract_strided_slice %194 {offsets = [1, 0], sizes = [16, 8], strides = [1, 1]} : vector<18x8xf32> to vector<16x8xf32>
    %197 = arith.maximumf %195, %196 : vector<16x8xf32>
    %198 = vector.extract_strided_slice %194 {offsets = [2, 0], sizes = [16, 8], strides = [1, 1]} : vector<18x8xf32> to vector<16x8xf32>
    %199 = arith.maximumf %197, %198 : vector<16x8xf32>
    %cst_132 = arith.constant dense<0.000000e+00> : vector<8x8xf32>
    %200 = tpu.matmul %118, %199, %cst_132 {dimension_numbers = #tpu.dot_dimension_numbers<[1], [0], [0], [1], [0, 0, 1, 1], [], []>} : vector<8x16xf32>, vector<16x8xf32>, vector<8x8xf32> -> vector<8x8xf32>
    %c24_133 = arith.constant 24 : index
    %c0_134 = arith.constant 0 : index
    %201 = vector.load %arg13[%c24_133, %c0_134] : memref<64x8xf32, #tpu.memory_space<vmem>>, vector<8x8xf32>
    tpu.vector_store %arg13[%c24_133, %c0_134], %200 {strides = array<i32>} : memref<64x8xf32, #tpu.memory_space<vmem>>, vector<8x8xf32>,
    %202 = vector.extract_strided_slice %1 {offsets = [6, 0, 0], sizes = [1, 16, 4], strides = [1, 1, 1]} : vector<16x16x4xf32> to vector<1x16x4xf32>
    %203 = vector.shape_cast %202 : vector<1x16x4xf32> to vector<16x4xf32>
    %cst_135 = arith.constant dense<0.000000e+00> : vector<8x4xf32>
    %204 = tpu.matmul %118, %203, %cst_135 {dimension_numbers = #tpu.dot_dimension_numbers<[1], [0], [0], [1], [0, 0, 1, 1], [], []>} : vector<8x16xf32>, vector<16x4xf32>, vector<8x4xf32> -> vector<8x4xf32>
    %c24_136 = arith.constant 24 : index
    %c0_137 = arith.constant 0 : index
    %205 = vector.load %arg14[%c24_136, %c0_137] : memref<64x4xf32, #tpu.memory_space<vmem>>, vector<8x4xf32>
    tpu.vector_store %arg14[%c24_136, %c0_137], %204 {strides = array<i32>} : memref<64x4xf32, #tpu.memory_space<vmem>>, vector<8x4xf32>,
    %c8_138 = arith.constant 8 : index
    %c7_139 = arith.constant 7 : index
    %c0_140 = arith.constant 0 : index
    %206 = vector.load %arg12[%c8_138, %c7_139, %c0_140] : memref<18x32x8xf32, #tpu.memory_space<vmem>>, vector<3x18x8xf32>
    %207 = vector.extract_strided_slice %206 {offsets = [0, 0, 0], sizes = [1, 18, 8], strides = [1, 1, 1]} : vector<3x18x8xf32> to vector<1x18x8xf32>
    %208 = vector.shape_cast %207 : vector<1x18x8xf32> to vector<18x8xf32>
    %209 = vector.extract_strided_slice %206 {offsets = [1, 0, 0], sizes = [1, 18, 8], strides = [1, 1, 1]} : vector<3x18x8xf32> to vector<1x18x8xf32>
    %210 = vector.shape_cast %209 : vector<1x18x8xf32> to vector<18x8xf32>
    %211 = arith.maximumf %208, %210 : vector<18x8xf32>
    %212 = vector.extract_strided_slice %206 {offsets = [2, 0, 0], sizes = [1, 18, 8], strides = [1, 1, 1]} : vector<3x18x8xf32> to vector<1x18x8xf32>
    %213 = vector.shape_cast %212 : vector<1x18x8xf32> to vector<18x8xf32>
    %214 = arith.maximumf %211, %213 : vector<18x8xf32>
    %215 = vector.extract_strided_slice %214 {offsets = [0, 0], sizes = [16, 8], strides = [1, 1]} : vector<18x8xf32> to vector<16x8xf32>
    %216 = vector.extract_strided_slice %214 {offsets = [1, 0], sizes = [16, 8], strides = [1, 1]} : vector<18x8xf32> to vector<16x8xf32>
    %217 = arith.maximumf %215, %216 : vector<16x8xf32>
    %218 = vector.extract_strided_slice %214 {offsets = [2, 0], sizes = [16, 8], strides = [1, 1]} : vector<18x8xf32> to vector<16x8xf32>
    %219 = arith.maximumf %217, %218 : vector<16x8xf32>
    %cst_141 = arith.constant dense<0.000000e+00> : vector<8x8xf32>
    %220 = tpu.matmul %118, %219, %cst_141 {dimension_numbers = #tpu.dot_dimension_numbers<[1], [0], [0], [1], [0, 0, 1, 1], [], []>} : vector<8x16xf32>, vector<16x8xf32>, vector<8x8xf32> -> vector<8x8xf32>
    %c32 = arith.constant 32 : index
    %c0_142 = arith.constant 0 : index
    %221 = vector.load %arg13[%c32, %c0_142] : memref<64x8xf32, #tpu.memory_space<vmem>>, vector<8x8xf32>
    tpu.vector_store %arg13[%c32, %c0_142], %220 {strides = array<i32>} : memref<64x8xf32, #tpu.memory_space<vmem>>, vector<8x8xf32>,
    %222 = vector.extract_strided_slice %1 {offsets = [8, 0, 0], sizes = [1, 16, 4], strides = [1, 1, 1]} : vector<16x16x4xf32> to vector<1x16x4xf32>
    %223 = vector.shape_cast %222 : vector<1x16x4xf32> to vector<16x4xf32>
    %cst_143 = arith.constant dense<0.000000e+00> : vector<8x4xf32>
    %224 = tpu.matmul %118, %223, %cst_143 {dimension_numbers = #tpu.dot_dimension_numbers<[1], [0], [0], [1], [0, 0, 1, 1], [], []>} : vector<8x16xf32>, vector<16x4xf32>, vector<8x4xf32> -> vector<8x4xf32>
    %c32_144 = arith.constant 32 : index
    %c0_145 = arith.constant 0 : index
    %225 = vector.load %arg14[%c32_144, %c0_145] : memref<64x4xf32, #tpu.memory_space<vmem>>, vector<8x4xf32>
    tpu.vector_store %arg14[%c32_144, %c0_145], %224 {strides = array<i32>} : memref<64x4xf32, #tpu.memory_space<vmem>>, vector<8x4xf32>,
    %c10 = arith.constant 10 : index
    %c7_146 = arith.constant 7 : index
    %c0_147 = arith.constant 0 : index
    %226 = vector.load %arg12[%c10, %c7_146, %c0_147] : memref<18x32x8xf32, #tpu.memory_space<vmem>>, vector<3x18x8xf32>
    %227 = vector.extract_strided_slice %226 {offsets = [0, 0, 0], sizes = [1, 18, 8], strides = [1, 1, 1]} : vector<3x18x8xf32> to vector<1x18x8xf32>
    %228 = vector.shape_cast %227 : vector<1x18x8xf32> to vector<18x8xf32>
    %229 = vector.extract_strided_slice %226 {offsets = [1, 0, 0], sizes = [1, 18, 8], strides = [1, 1, 1]} : vector<3x18x8xf32> to vector<1x18x8xf32>
    %230 = vector.shape_cast %229 : vector<1x18x8xf32> to vector<18x8xf32>
    %231 = arith.maximumf %228, %230 : vector<18x8xf32>
    %232 = vector.extract_strided_slice %226 {offsets = [2, 0, 0], sizes = [1, 18, 8], strides = [1, 1, 1]} : vector<3x18x8xf32> to vector<1x18x8xf32>
    %233 = vector.shape_cast %232 : vector<1x18x8xf32> to vector<18x8xf32>
    %234 = arith.maximumf %231, %233 : vector<18x8xf32>
    %235 = vector.extract_strided_slice %234 {offsets = [0, 0], sizes = [16, 8], strides = [1, 1]} : vector<18x8xf32> to vector<16x8xf32>
    %236 = vector.extract_strided_slice %234 {offsets = [1, 0], sizes = [16, 8], strides = [1, 1]} : vector<18x8xf32> to vector<16x8xf32>
    %237 = arith.maximumf %235, %236 : vector<16x8xf32>
    %238 = vector.extract_strided_slice %234 {offsets = [2, 0], sizes = [16, 8], strides = [1, 1]} : vector<18x8xf32> to vector<16x8xf32>
    %239 = arith.maximumf %237, %238 : vector<16x8xf32>
    %cst_148 = arith.constant dense<0.000000e+00> : vector<8x8xf32>
    %240 = tpu.matmul %118, %239, %cst_148 {dimension_numbers = #tpu.dot_dimension_numbers<[1], [0], [0], [1], [0, 0, 1, 1], [], []>} : vector<8x16xf32>, vector<16x8xf32>, vector<8x8xf32> -> vector<8x8xf32>
    %c40 = arith.constant 40 : index
    %c0_149 = arith.constant 0 : index
    %241 = vector.load %arg13[%c40, %c0_149] : memref<64x8xf32, #tpu.memory_space<vmem>>, vector<8x8xf32>
    tpu.vector_store %arg13[%c40, %c0_149], %240 {strides = array<i32>} : memref<64x8xf32, #tpu.memory_space<vmem>>, vector<8x8xf32>,
    %242 = vector.extract_strided_slice %1 {offsets = [10, 0, 0], sizes = [1, 16, 4], strides = [1, 1, 1]} : vector<16x16x4xf32> to vector<1x16x4xf32>
    %243 = vector.shape_cast %242 : vector<1x16x4xf32> to vector<16x4xf32>
    %cst_150 = arith.constant dense<0.000000e+00> : vector<8x4xf32>
    %244 = tpu.matmul %118, %243, %cst_150 {dimension_numbers = #tpu.dot_dimension_numbers<[1], [0], [0], [1], [0, 0, 1, 1], [], []>} : vector<8x16xf32>, vector<16x4xf32>, vector<8x4xf32> -> vector<8x4xf32>
    %c40_151 = arith.constant 40 : index
    %c0_152 = arith.constant 0 : index
    %245 = vector.load %arg14[%c40_151, %c0_152] : memref<64x4xf32, #tpu.memory_space<vmem>>, vector<8x4xf32>
    tpu.vector_store %arg14[%c40_151, %c0_152], %244 {strides = array<i32>} : memref<64x4xf32, #tpu.memory_space<vmem>>, vector<8x4xf32>,
    %c12 = arith.constant 12 : index
    %c7_153 = arith.constant 7 : index
    %c0_154 = arith.constant 0 : index
    %246 = vector.load %arg12[%c12, %c7_153, %c0_154] : memref<18x32x8xf32, #tpu.memory_space<vmem>>, vector<3x18x8xf32>
    %247 = vector.extract_strided_slice %246 {offsets = [0, 0, 0], sizes = [1, 18, 8], strides = [1, 1, 1]} : vector<3x18x8xf32> to vector<1x18x8xf32>
    %248 = vector.shape_cast %247 : vector<1x18x8xf32> to vector<18x8xf32>
    %249 = vector.extract_strided_slice %246 {offsets = [1, 0, 0], sizes = [1, 18, 8], strides = [1, 1, 1]} : vector<3x18x8xf32> to vector<1x18x8xf32>
    %250 = vector.shape_cast %249 : vector<1x18x8xf32> to vector<18x8xf32>
    %251 = arith.maximumf %248, %250 : vector<18x8xf32>
    %252 = vector.extract_strided_slice %246 {offsets = [2, 0, 0], sizes = [1, 18, 8], strides = [1, 1, 1]} : vector<3x18x8xf32> to vector<1x18x8xf32>
    %253 = vector.shape_cast %252 : vector<1x18x8xf32> to vector<18x8xf32>
    %254 = arith.maximumf %251, %253 : vector<18x8xf32>
    %255 = vector.extract_strided_slice %254 {offsets = [0, 0], sizes = [16, 8], strides = [1, 1]} : vector<18x8xf32> to vector<16x8xf32>
    %256 = vector.extract_strided_slice %254 {offsets = [1, 0], sizes = [16, 8], strides = [1, 1]} : vector<18x8xf32> to vector<16x8xf32>
    %257 = arith.maximumf %255, %256 : vector<16x8xf32>
    %258 = vector.extract_strided_slice %254 {offsets = [2, 0], sizes = [16, 8], strides = [1, 1]} : vector<18x8xf32> to vector<16x8xf32>
    %259 = arith.maximumf %257, %258 : vector<16x8xf32>
    %cst_155 = arith.constant dense<0.000000e+00> : vector<8x8xf32>
    %260 = tpu.matmul %118, %259, %cst_155 {dimension_numbers = #tpu.dot_dimension_numbers<[1], [0], [0], [1], [0, 0, 1, 1], [], []>} : vector<8x16xf32>, vector<16x8xf32>, vector<8x8xf32> -> vector<8x8xf32>
    %c48 = arith.constant 48 : index
    %c0_156 = arith.constant 0 : index
    %261 = vector.load %arg13[%c48, %c0_156] : memref<64x8xf32, #tpu.memory_space<vmem>>, vector<8x8xf32>
    tpu.vector_store %arg13[%c48, %c0_156], %260 {strides = array<i32>} : memref<64x8xf32, #tpu.memory_space<vmem>>, vector<8x8xf32>,
    %262 = vector.extract_strided_slice %1 {offsets = [12, 0, 0], sizes = [1, 16, 4], strides = [1, 1, 1]} : vector<16x16x4xf32> to vector<1x16x4xf32>
    %263 = vector.shape_cast %262 : vector<1x16x4xf32> to vector<16x4xf32>
    %cst_157 = arith.constant dense<0.000000e+00> : vector<8x4xf32>
    %264 = tpu.matmul %118, %263, %cst_157 {dimension_numbers = #tpu.dot_dimension_numbers<[1], [0], [0], [1], [0, 0, 1, 1], [], []>} : vector<8x16xf32>, vector<16x4xf32>, vector<8x4xf32> -> vector<8x4xf32>
    %c48_158 = arith.constant 48 : index
    %c0_159 = arith.constant 0 : index
    %265 = vector.load %arg14[%c48_158, %c0_159] : memref<64x4xf32, #tpu.memory_space<vmem>>, vector<8x4xf32>
    tpu.vector_store %arg14[%c48_158, %c0_159], %264 {strides = array<i32>} : memref<64x4xf32, #tpu.memory_space<vmem>>, vector<8x4xf32>,
    %c14 = arith.constant 14 : index
    %c7_160 = arith.constant 7 : index
    %c0_161 = arith.constant 0 : index
    %266 = vector.load %arg12[%c14, %c7_160, %c0_161] : memref<18x32x8xf32, #tpu.memory_space<vmem>>, vector<3x18x8xf32>
    %267 = vector.extract_strided_slice %266 {offsets = [0, 0, 0], sizes = [1, 18, 8], strides = [1, 1, 1]} : vector<3x18x8xf32> to vector<1x18x8xf32>
    %268 = vector.shape_cast %267 : vector<1x18x8xf32> to vector<18x8xf32>
    %269 = vector.extract_strided_slice %266 {offsets = [1, 0, 0], sizes = [1, 18, 8], strides = [1, 1, 1]} : vector<3x18x8xf32> to vector<1x18x8xf32>
    %270 = vector.shape_cast %269 : vector<1x18x8xf32> to vector<18x8xf32>
    %271 = arith.maximumf %268, %270 : vector<18x8xf32>
    %272 = vector.extract_strided_slice %266 {offsets = [2, 0, 0], sizes = [1, 18, 8], strides = [1, 1, 1]} : vector<3x18x8xf32> to vector<1x18x8xf32>
    %273 = vector.shape_cast %272 : vector<1x18x8xf32> to vector<18x8xf32>
    %274 = arith.maximumf %271, %273 : vector<18x8xf32>
    %275 = vector.extract_strided_slice %274 {offsets = [0, 0], sizes = [16, 8], strides = [1, 1]} : vector<18x8xf32> to vector<16x8xf32>
    %276 = vector.extract_strided_slice %274 {offsets = [1, 0], sizes = [16, 8], strides = [1, 1]} : vector<18x8xf32> to vector<16x8xf32>
    %277 = arith.maximumf %275, %276 : vector<16x8xf32>
    %278 = vector.extract_strided_slice %274 {offsets = [2, 0], sizes = [16, 8], strides = [1, 1]} : vector<18x8xf32> to vector<16x8xf32>
    %279 = arith.maximumf %277, %278 : vector<16x8xf32>
    %cst_162 = arith.constant dense<0.000000e+00> : vector<8x8xf32>
    %280 = tpu.matmul %118, %279, %cst_162 {dimension_numbers = #tpu.dot_dimension_numbers<[1], [0], [0], [1], [0, 0, 1, 1], [], []>} : vector<8x16xf32>, vector<16x8xf32>, vector<8x8xf32> -> vector<8x8xf32>
    %c56 = arith.constant 56 : index
    %c0_163 = arith.constant 0 : index
    %281 = vector.load %arg13[%c56, %c0_163] : memref<64x8xf32, #tpu.memory_space<vmem>>, vector<8x8xf32>
    tpu.vector_store %arg13[%c56, %c0_163], %280 {strides = array<i32>} : memref<64x8xf32, #tpu.memory_space<vmem>>, vector<8x8xf32>,
    %282 = vector.extract_strided_slice %1 {offsets = [14, 0, 0], sizes = [1, 16, 4], strides = [1, 1, 1]} : vector<16x16x4xf32> to vector<1x16x4xf32>
    %283 = vector.shape_cast %282 : vector<1x16x4xf32> to vector<16x4xf32>
    %cst_164 = arith.constant dense<0.000000e+00> : vector<8x4xf32>
    %284 = tpu.matmul %118, %283, %cst_164 {dimension_numbers = #tpu.dot_dimension_numbers<[1], [0], [0], [1], [0, 0, 1, 1], [], []>} : vector<8x16xf32>, vector<16x4xf32>, vector<8x4xf32> -> vector<8x4xf32>
    %c56_165 = arith.constant 56 : index
    %c0_166 = arith.constant 0 : index
    %285 = vector.load %arg14[%c56_165, %c0_166] : memref<64x4xf32, #tpu.memory_space<vmem>>, vector<8x4xf32>
    tpu.vector_store %arg14[%c56_165, %c0_166], %284 {strides = array<i32>} : memref<64x4xf32, #tpu.memory_space<vmem>>, vector<8x4xf32>,
    %c0_167 = arith.constant 0 : index
    %c0_168 = arith.constant 0 : index
    %286 = vector.load %arg13[%c0_167, %c0_168] : memref<64x8xf32, #tpu.memory_space<vmem>>, vector<64x8xf32>
    %c0_169 = arith.constant 0 : index
    %c0_170 = arith.constant 0 : index
    %287 = vector.load %arg14[%c0_169, %c0_170] : memref<64x4xf32, #tpu.memory_space<vmem>>, vector<64x4xf32>
    %288 = arith.truncf %287 : vector<64x4xf32> to vector<64x4xbf16>
    %c0_171 = arith.constant 0 : index
    %c0_172 = arith.constant 0 : index
    %289 = vector.load %arg8[%c0_171, %c0_172] : memref<4x8xbf16, #tpu.memory_space<vmem>>, vector<4x8xbf16>
    %cst_173 = arith.constant dense<0.000000e+00> : vector<64x8xf32>
    %290 = tpu.matmul %288, %289, %cst_173 {dimension_numbers = #tpu.dot_dimension_numbers<[1], [0], [0], [1], [0, 0, 1, 1], [], []>} : vector<64x4xbf16>, vector<4x8xbf16>, vector<64x8xf32> -> vector<64x8xf32>
    %c0_174 = arith.constant 0 : index
    %c0_175 = arith.constant 0 : index
    %291 = vector.load %arg9[%c0_174, %c0_175] : memref<1x8xf32, #tpu.memory_space<vmem>>, vector<1x8xf32>
    %292 = vector.broadcast %291 : vector<1x8xf32> to vector<64x8xf32>
    %293 = arith.addf %290, %292 : vector<64x8xf32>
    %294 = arith.addf %286, %293 : vector<64x8xf32>
    %295 = vector.shape_cast %294 : vector<64x8xf32> to vector<1x64x8xf32>
    %c0_176 = arith.constant 0 : index
    %c0_177 = arith.constant 0 : index
    %c0_178 = arith.constant 0 : index
    %296 = vector.load %arg11[%c0_176, %c0_177, %c0_178] : memref<1x64x8xf32, #tpu.memory_space<vmem>>, vector<1x64x8xf32>
    tpu.vector_store %arg11[%c0_176, %c0_177, %c0_178], %295 {strides = array<i32>} : memref<1x64x8xf32, #tpu.memory_space<vmem>>, vector<1x64x8xf32>,
    return
  }
  func.func @transform_0(%arg0: i32) -> (i32, i32, i32, i32) {
    %c0_i32 = arith.constant 0 : i32
    %c0_i32_0 = arith.constant 0 : i32
    %c0_i32_1 = arith.constant 0 : i32
    %c0_i32_2 = arith.constant 0 : i32
    return %arg0, %c0_i32, %c0_i32_0, %c0_i32_1 : i32, i32, i32, i32
  }
  func.func @transform_1(%arg0: i32) -> (i32, i32, i32) {
    %c0_i32 = arith.constant 0 : i32
    %c0_i32_0 = arith.constant 0 : i32
    %c0_i32_1 = arith.constant 0 : i32
    %c0_i32_2 = arith.constant 0 : i32
    return %c0_i32, %c0_i32_0, %c0_i32_1 : i32, i32, i32
  }
  func.func @transform_2(%arg0: i32) -> (i32, i32) {
    %c0_i32 = arith.constant 0 : i32
    %c0_i32_0 = arith.constant 0 : i32
    %c0_i32_1 = arith.constant 0 : i32
    return %c0_i32, %c0_i32_0 : i32, i32
  }
  func.func @transform_3(%arg0: i32) -> (i32, i32) {
    %c0_i32 = arith.constant 0 : i32
    %c0_i32_0 = arith.constant 0 : i32
    %c0_i32_1 = arith.constant 0 : i32
    return %c0_i32, %c0_i32_0 : i32, i32
  }
  func.func @transform_4(%arg0: i32) -> (i32, i32, i32) {
    %c0_i32 = arith.constant 0 : i32
    %c0_i32_0 = arith.constant 0 : i32
    %c0_i32_1 = arith.constant 0 : i32
    %c0_i32_2 = arith.constant 0 : i32
    return %c0_i32, %c0_i32_0, %c0_i32_1 : i32, i32, i32
  }
  func.func @transform_5(%arg0: i32) -> (i32, i32) {
    %c0_i32 = arith.constant 0 : i32
    %c0_i32_0 = arith.constant 0 : i32
    %c0_i32_1 = arith.constant 0 : i32
    return %c0_i32, %c0_i32_0 : i32, i32
  }
  func.func @transform_6(%arg0: i32) -> (i32, i32) {
    %c0_i32 = arith.constant 0 : i32
    %c0_i32_0 = arith.constant 0 : i32
    %c0_i32_1 = arith.constant 0 : i32
    return %c0_i32, %c0_i32_0 : i32, i32
  }
  func.func @transform_7(%arg0: i32) -> (i32, i32) {
    %c0_i32 = arith.constant 0 : i32
    %c0_i32_0 = arith.constant 0 : i32
    %c0_i32_1 = arith.constant 0 : i32
    return %c0_i32, %c0_i32_0 : i32, i32
  }
  func.func @transform_8(%arg0: i32) -> (i32, i32) {
    %c0_i32 = arith.constant 0 : i32
    %c0_i32_0 = arith.constant 0 : i32
    %c0_i32_1 = arith.constant 0 : i32
    return %c0_i32, %c0_i32_0 : i32, i32
  }
  func.func @transform_9(%arg0: i32) -> (i32, i32) {
    %c0_i32 = arith.constant 0 : i32
    %c0_i32_0 = arith.constant 0 : i32
    %c0_i32_1 = arith.constant 0 : i32
    return %c0_i32, %c0_i32_0 : i32, i32
  }
  func.func @transform_10(%arg0: i32) -> (i32, i32, i32) {
    %c0_i32 = arith.constant 0 : i32
    %c0_i32_0 = arith.constant 0 : i32
    %c0_i32_1 = arith.constant 0 : i32
    return %arg0, %c0_i32, %c0_i32_0 : i32, i32, i32
  }
}

</mosaic_0001>

<bundles_post_ra>
// kernel: tpu_custom_call.1
= control target key start
LH: loop header
LB: loop body
LE: loop exit
PB: predicated region body
PF: predicated region fallthrough
CT: control target
= control target key end

     0   :  { %s3550_s13 = smov 0   ;;  %s5462_s0 = inlined_call_operand.vmem [shape: f32[2,16,16,4], index: 0, kind: input, shape index: {}]   ;;  %s5463_s1 = inlined_call_operand.vmem [shape: f32[3,3,4], index: 1, kind: input, shape index: {}]   ;;  %s5464_s2 = inlined_call_operand.vmem [shape: bf16[4,8], index: 2, kind: input, shape index: {}]   ;;  %s5465_s3 = inlined_call_operand.vmem [shape: f32[1,8], index: 3, kind: input, shape index: {}]   ;;  %s5466_s4 = inlined_call_operand.vmem [shape: f32[3,3,8], index: 4, kind: input, shape index: {}]   ;;  %s5467_s5 = inlined_call_operand.vmem [shape: bf16[8,8], index: 5, kind: input, shape index: {}]   ;;  %s5468_s6 = inlined_call_operand.vmem [shape: f32[1,8], index: 6, kind: input, shape index: {}]   ;;  %s5469_s7 = inlined_call_operand.vmem [shape: bf16[4,8], index: 7, kind: input, shape index: {}]   ;;  %s5470_s8 = inlined_call_operand.vmem [shape: f32[1,8], index: 8, kind: input, shape index: {}]   ;;  %s5471_s9 = inlined_call_operand.vmem [shape: f32[8,16], index: 9, kind: input, shape index: {}]   ;;  %s5472_s10 = inlined_call_operand.vmem [shape: f32[2,64,8], index: 10, kind: output, shape index: {}]  }
   0x1 LB: > { %s3403_s14 = sadd.s32 4294967295, %s3491_s13   ;;  %p3407_p0 = scmp.ge.s32.totalorder %s3491_s13, 1  ;;  %s3491_s13 = sphi %s3550_s13, %s20_s13  }
   0x2   : > { %p312_p1 = scmp.lt.s32.totalorder %s3491_s13, 3 }
   0x4   : > { %p313_p2 = pnand %p3407_p0, %p312_p1 }
   0x6   : > { %316 = sbr.rel (%p313_p2) target bundleno = 798 (0x31e), region = 60 }
   0xb   : > { %v1334_v0 = vld [vmem:[%s5464_s2] sm:$0x3]  ;;  %vm1387_vm0 = vcmask 1041408   ;;  %p350_p3 = scmp.lt.s32.totalorder %s3403_s14, 1  ;;  %vm393_vm1 = vcmask 64512   ;;  %v3493_v2 = vmov 0.0  }
   0xc   : > { %v1389_v1 = vsel %vm1387_vm0, %v1334_v0, 0  ;;  %394 = vst.msk [vmem:[#allocation2] sm:$0xff] %vm393_vm1, %v3493_v2  ;;  %v473_v3 = vld [vmem:[%s5463_s1] sm:$0x7]  ;;  %vm440_vm2 = vcmask 31744   ;;  %vm2457_vm3 = vcmask 1043456  }
   0xd   : > { %1398 = vmatpush.bf16.msra.mxu0 %v1389_v1  ;;  %s5582_s14 = smov (!%p350_p3, %s3403_s14), 1  ;;  %3468 = vmatpush.bf16.msra.mxu3 %v1389_v1  ;;  %395 = vst.msk [vmem:[#allocation2 + $0x8] sm:$0xff] %vm393_vm1, %v3493_v2  ;;  %v3587_v4 = vperm.slane %v473_v3, 0  ;;  %v3589_v5 = vperm.slane %v473_v3, 1  ;;  %v3602_v10 = vperm.slane %v473_v3, 2  ;;  %vm2645_vm4 = vcmask 1046528  }
   0xe   : > { %s3466_s17 = sshll.u32 %s5582_s14, 8  ;;  %396 = vst.msk [vmem:[#allocation2 + $0x10] sm:$0xff] %vm393_vm1, %v3493_v2  ;;  %v474_v18 = vld [vmem:[%s5463_s1 + $0x4] sm:$0x7]  ;;  %v475_v27 = vld [vmem:[%s5463_s1 + $0x8] sm:$0x7] }
   0xf   : > { %397 = vst.msk [vmem:[#allocation2 + $0x18] sm:$0xff] %vm393_vm1, %v3493_v2  ;;  %s3579_s22 = scalar_lea.vmem %s5462_s0, %s3466_s17  ;;  %v3621_v25 = vperm.slane %v474_v18, 0  ;;  %v3623_v26 = vperm.slane %v474_v18, 1  ;;  %v3633_v30 = vperm.slane %v474_v18, 2  ;;  %v3641_v39 = vperm.slane %v475_v27, 0  ;;  %s3467_s29 = sshll.u32 %s5582_s14, 6 }
  0x10   : > { %403 = vst.msk [vmem:[#allocation2] sm:$0xff] %vm393_vm1, %v3493_v2  ;;  %v3592_v6 = vld [vmem:[%s3579_s22] sm:$0xff]  ;;  %v3597_v7 = vld [vmem:[%s3579_s22 + $0x8] sm:$0xff]  ;;  %v363_v8 = vld [vmem:[%s3579_s22 + $0x10] sm:$0xff]  ;;  %v3654_v47 = vperm.slane %v475_v27, 1  ;;  %v3667_v54 = vperm.slane %v475_v27, 2  ;;  %s5441_s12 = scalar_lea.vmem %s5472_s10, %s3467_s29 }
  0x11   : > { %404 = vst.msk [vmem:[#allocation2 + $0x20] sm:$0xff] %vm393_vm1, %v3493_v2  ;;  %v364_v14 = vld [vmem:[%s3579_s22 + $0x18] sm:$0xff]  ;;  %vm2655_vm5 = vcmask 1045504   ;;  %vm2665_vm6 = vcmask 130048  }
  0x12   : > { %405 = vst.msk [vmem:[#allocation2 + $0x40] sm:$0xff] %vm393_vm1, %v3493_v2 }
  0x13   : > { %5510 = vst [vmem:[#allocation5_spill] sm:$0xff] %v3592_v6 }
  0x14   : > { %421 = vst.msk [vmem:[#allocation2 + $0x18] sm:$0xff] %vm393_vm1, %v3493_v2  ;;  %v541_v9 = vld [vmem:[#allocation2 + $0x8] sm:$0xff] }
  0x15   : > { %5511 = vst [vmem:[#allocation6_spill] sm:$0xff] %v3597_v7  ;;  %v477_v11 = vld [vmem:[#allocation2 + $0xf] sm:$0xff]  ;;  %v574_v16 = vmul.f32 %v3589_v5, %v541_v9 }
  0x16   : > { %422 = vst.msk [vmem:[#allocation2 + $0x38] sm:$0xff] %vm393_vm1, %v3493_v2  ;;  %v542_v12 = vld [vmem:[#allocation2 + $0x10] sm:$0xff]  ;;  %v510_v15 = vmul.f32 %v3587_v4, %v477_v11 }
  0x17   : > { %423 = vst.msk [vmem:[#allocation2 + $0x58] sm:$0xff] %vm393_vm1, %v3493_v2  ;;  %v638_v13 = vld [vmem:[#allocation2 + $0x9] sm:$0xff]  ;;  %v575_v17 = vmul.f32 %v3589_v5, %v542_v12 }
  0x18   : > { %441 = vst.msk [vmem:[#allocation2 + $0x28] sm:$0xff] %vm440_vm2, %v3592_v6  ;;  %v476_v19 = vld [vmem:[#allocation2 + $0x7] sm:$0xff]  ;;  %v671_v21 = vmul.f32 %v3602_v10, %v638_v13 }
  0x19   : > { %442 = vst.msk [vmem:[#allocation2 + $0x30] sm:$0xff] %vm440_vm2, %v3597_v7  ;;  %v509_v20 = vmul.f32 %v3587_v4, %v476_v19  ;;  %v607_v22 = vadd.f32 %v575_v17, %v510_v15  ;;  %v4389_v7 = vld [vmem:[%s5465_s3] ss:$0 sm:$0xff] }
  0x1a   : > { %443 = vst.msk [vmem:[#allocation2 + $0x48] sm:$0xff] %vm440_vm2, %v363_v8 }
  0x1b   : > { %444 = vst.msk [vmem:[#allocation2 + $0x50] sm:$0xff] %vm440_vm2, %v364_v14  ;;  %v606_v23 = vadd.f32 %v574_v16, %v509_v20  ;;  %v639_v24 = vld [vmem:[#allocation2 + $0x11] sm:$0xff] }
  0x1c   : > { %399 = vst.msk [vmem:[#allocation2 + $0x220] sm:$0xff] %vm393_vm1, %v3493_v2  ;;  %v672_v28 = vmul.f32 %v3602_v10, %v639_v24 }
  0x1d   : > { %400 = vst.msk [vmem:[#allocation2 + $0x228] sm:$0xff] %vm393_vm1, %v3493_v2  ;;  %v703_v29 = vadd.f32 %v671_v21, %v606_v23 }
  0x1e   : > { %401 = vst.msk [vmem:[#allocation2 + $0x230] sm:$0xff] %vm393_vm1, %v3493_v2  ;;  %v704_v31 = vadd.f32 %v672_v28, %v607_v22  ;;  %v3739_v28 = vld [vmem:[%s3579_s22 + $0x20] sm:$0xff] }
  0x1f   : > { %v735_v32 = vld [vmem:[#allocation2 + $0x27] sm:$0xff]  ;;  %402 = vst.msk [vmem:[#allocation2 + $0x238] sm:$0xff] %vm393_vm1, %v3493_v2 }
  0x20   : > { %v832_v33 = vld [vmem:[#allocation2 + $0x28] sm:$0xff]  ;;  %v768_v35 = vmul.f32 %v3621_v25, %v735_v32  ;;  %v833_v36 = vld [vmem:[#allocation2 + $0x30] sm:$0xff]  ;;  %406 = vst.msk [vmem:[#allocation2 + $0x60] sm:$0xff] %vm393_vm1, %v3493_v2  ;;  %v511_v13 = vmul.f32 %v735_v32, %v3587_v4 }
  0x21   : > { %v736_v34 = vld [vmem:[#allocation2 + $0x2f] sm:$0xff]  ;;  %v865_v37 = vmul.f32 %v3623_v26, %v832_v33  ;;  %v866_v41 = vmul.f32 %v3623_v26, %v833_v36  ;;  %v3647_v43 = vld [vmem:[#allocation2 + $0x47] sm:$0xff]  ;;  %407 = vst.msk [vmem:[#allocation2 + $0x80] sm:$0xff] %vm393_vm1, %v3493_v2  ;;  %v576_v14 = vmul.f32 %v832_v33, %v3589_v5  ;;  %v577_v17 = vmul.f32 %v833_v36, %v3589_v5 }
  0x22   : > { %v929_v38 = vld [vmem:[#allocation2 + $0x29] sm:$0xff]  ;;  %v769_v40 = vmul.f32 %v3621_v25, %v736_v34  ;;  %v930_v42 = vld [vmem:[#allocation2 + $0x31] sm:$0xff]  ;;  %v800_v44 = vadd.f32 %v768_v35, %v703_v29  ;;  %408 = vst.msk [vmem:[#allocation2 + $0xa0] sm:$0xff] %vm393_vm1, %v3493_v2  ;;  %v1060_v52 = vmul.f32 %v3641_v39, %v3647_v43  ;;  %v512_v16 = vmul.f32 %v736_v34, %v3587_v4 }
  0x23   : > { %v962_v45 = vmul.f32 %v3633_v30, %v929_v38  ;;  %v3652_v46 = vld [vmem:[#allocation2 + $0x4f] sm:$0xff]  ;;  %v963_v49 = vmul.f32 %v3633_v30, %v930_v42  ;;  %409 = vst.msk [vmem:[#allocation2 + $0xc0] sm:$0xff] %vm393_vm1, %v3493_v2  ;;  %v608_v18 = vadd.f32 %v576_v14, %v511_v13  ;;  %v673_v19 = vmul.f32 %v929_v38, %v3602_v10 }
  0x24   : > { %v801_v48 = vadd.f32 %v769_v40, %v704_v31  ;;  %v3659_v50 = vld [vmem:[#allocation2 + $0x48] sm:$0xff]  ;;  %v897_v51 = vadd.f32 %v865_v37, %v800_v44  ;;  %v3665_v53 = vld [vmem:[#allocation2 + $0x50] sm:$0xff]  ;;  %410 = vst.msk [vmem:[#allocation2 + $0xe0] sm:$0xff] %vm393_vm1, %v3493_v2  ;;  %v1061_v56 = vmul.f32 %v3641_v39, %v3652_v46  ;;  %v609_v20 = vadd.f32 %v577_v17, %v512_v16 }
  0x25   : > { %v3673_v57 = vld [vmem:[#allocation2 + $0x49] sm:$0xff]  ;;  %411 = vst.msk [vmem:[#allocation2 + $0x100] sm:$0xff] %vm393_vm1, %v3493_v2  ;;  %v1157_v59 = vmul.f32 %v3654_v47, %v3659_v50  ;;  %v3679_v60 = vld [vmem:[#allocation2 + $0x51] sm:$0xff]  ;;  %v1158_v62 = vmul.f32 %v3654_v47, %v3665_v53  ;;  %v674_v21 = vmul.f32 %v930_v42, %v3602_v10  ;;  %v705_v22 = vadd.f32 %v673_v19, %v608_v18 }
  0x26   : > { %v898_v55 = vadd.f32 %v866_v41, %v801_v48  ;;  %v994_v58 = vadd.f32 %v962_v45, %v897_v51  ;;  %412 = vst.msk [vmem:[#allocation2 + $0x120] sm:$0xff] %vm393_vm1, %v3493_v2  ;;  %v1254_v0 = vmul.f32 %v3667_v54, %v3673_v57  ;;  %v1255_v3 = vmul.f32 %v3667_v54, %v3679_v60  ;;  %v3744_v29 = vld [vmem:[%s3579_s22 + $0x28] sm:$0xff]  ;;  %v367_v40 = vld [vmem:[%s3579_s22 + $0x30] sm:$0xff]  ;;  %v3779_v51 = vld [vmem:[%s3579_s22 + $0x40] sm:$0xff] }
  0x27   : > { %413 = vst.msk [vmem:[#allocation2 + $0x140] sm:$0xff] %vm393_vm1, %v3493_v2  ;;  %v770_v23 = vmul.f32 %v3647_v43, %v3621_v25  ;;  %v706_v24 = vadd.f32 %v674_v21, %v609_v20  ;;  %v771_v27 = vmul.f32 %v3652_v46, %v3621_v25  ;;  %v867_v32 = vmul.f32 %v3659_v50, %v3623_v26 }
  0x28   : > { %v995_v61 = vadd.f32 %v963_v49, %v898_v55  ;;  %v1092_v63 = vadd.f32 %v1060_v52, %v994_v58  ;;  %414 = vst.msk [vmem:[#allocation2 + $0x160] sm:$0xff] %vm393_vm1, %v3493_v2  ;;  %v513_v33 = vmul.f32 %v3647_v43, %v3587_v4  ;;  %v578_v34 = vmul.f32 %v3659_v50, %v3589_v5  ;;  %v368_v43 = vld [vmem:[%s3579_s22 + $0x38] sm:$0xff]  ;;  %v3783_v52 = vld [vmem:[%s3579_s22 + $0x48] sm:$0xff] }
  0x29   : > { %415 = vst.msk [vmem:[#allocation2 + $0x180] sm:$0xff] %vm393_vm1, %v3493_v2  ;;  %v802_v31 = vadd.f32 %v770_v23, %v705_v22  ;;  %v803_v35 = vadd.f32 %v771_v27, %v706_v24  ;;  %v868_v36 = vmul.f32 %v3665_v53, %v3623_v26  ;;  %v514_v37 = vmul.f32 %v3652_v46, %v3587_v4 }
  0x2a   : > { %v1093_v1 = vadd.f32 %v1061_v56, %v995_v61  ;;  %v1189_v8 = vadd.f32 %v1157_v59, %v1092_v63  ;;  %416 = vst.msk [vmem:[#allocation2 + $0x1a0] sm:$0xff] %vm393_vm1, %v3493_v2  ;;  %v579_v38 = vmul.f32 %v3665_v53, %v3589_v5  ;;  %v964_v42 = vmul.f32 %v3673_v57, %v3633_v30 }
  0x2b   : > { %417 = vst.msk [vmem:[#allocation2 + $0x1c0] sm:$0xff] %vm393_vm1, %v3493_v2  ;;  %v899_v41 = vadd.f32 %v867_v32, %v802_v31  ;;  %v610_v44 = vadd.f32 %v578_v34, %v513_v33  ;;  %v675_v45 = vmul.f32 %v3673_v57, %v3602_v10  ;;  %v900_v46 = vadd.f32 %v868_v36, %v803_v35 }
  0x2c   : > { %v1190_v9 = vadd.f32 %v1158_v62, %v1093_v1  ;;  %v1286_v11 = vadd.f32 %v1254_v0, %v1189_v8  ;;  %418 = vst.msk [vmem:[#allocation2 + $0x1e0] sm:$0xff] %vm393_vm1, %v3493_v2  ;;  %v965_v48 = vmul.f32 %v3679_v60, %v3633_v30  ;;  %v611_v49 = vadd.f32 %v579_v38, %v514_v37 }
  0x2d   : > { %419 = vst.msk [vmem:[#allocation2 + $0x200] sm:$0xff] %vm393_vm1, %v3493_v2  ;;  %v676_v50 = vmul.f32 %v3679_v60, %v3602_v10  ;;  %v996_v53 = vadd.f32 %v964_v42, %v899_v41  ;;  %v707_v55 = vadd.f32 %v675_v45, %v610_v44 }
  0x2e   : > { %v1287_v12 = vadd.f32 %v1255_v3, %v1190_v9  ;;  %424 = vst.msk [vmem:[#allocation2 + $0x78] sm:$0xff] %vm393_vm1, %v3493_v2  ;;  %v997_v56 = vadd.f32 %v965_v48, %v900_v46 }
  0x2f   : > { %425 = vst.msk [vmem:[#allocation2 + $0x98] sm:$0xff] %vm393_vm1, %v3493_v2  ;;  %v708_v58 = vadd.f32 %v676_v50, %v611_v49  ;;  %v371_v49 = vld [vmem:[%s3579_s22 + $0x50] sm:$0xff]  ;;  %v372_v50 = vld [vmem:[%s3579_s22 + $0x58] sm:$0xff] }
  0x30   : > { %v1318_v15 = vpack.c.bf16 %v1287_v12, %v1286_v11  ;;  %426 = vst.msk [vmem:[#allocation2 + $0xb8] sm:$0xff] %vm393_vm1, %v3493_v2 }
  0x31   : > { %427 = vst.msk [vmem:[#allocation2 + $0xd8] sm:$0xff] %vm393_vm1, %v3493_v2 }
  0x32   : > { %3412 = vmatmul.msk.bf16.vlgmr.msra.gmra.mxu0 %vm440_vm2, %v1318_v15  ;;  %428 = vst.msk [vmem:[#allocation2 + $0xf8] sm:$0xff] %vm393_vm1, %v3493_v2 }
  0x33   : > { %429 = vst.msk [vmem:[#allocation2 + $0x118] sm:$0xff] %vm393_vm1, %v3493_v2 }
  0x34   : > { %430 = vst.msk [vmem:[#allocation2 + $0x138] sm:$0xff] %vm393_vm1, %v3493_v2 }
  0x35   : > { %431 = vst.msk [vmem:[#allocation2 + $0x158] sm:$0xff] %vm393_vm1, %v3493_v2 }
  0x36   : > { %432 = vst.msk [vmem:[#allocation2 + $0x178] sm:$0xff] %vm393_vm1, %v3493_v2 }
  0x37   : > { %433 = vst.msk [vmem:[#allocation2 + $0x198] sm:$0xff] %vm393_vm1, %v3493_v2 }
  0x38   : > { %434 = vst.msk [vmem:[#allocation2 + $0x1b8] sm:$0xff] %vm393_vm1, %v3493_v2 }
  0x39   : > { %435 = vst.msk [vmem:[#allocation2 + $0x1d8] sm:$0xff] %vm393_vm1, %v3493_v2 }
  0x3a   : > { %5512 = vst [vmem:[#allocation7_spill] sm:$0xff] %v3739_v28 }
  0x3b   : > { %436 = vst.msk [vmem:[#allocation2 + $0x1f8] sm:$0xff] %vm393_vm1, %v3493_v2 }
  0x3c   : > { %5513 = vst [vmem:[#allocation8_spill] sm:$0xff] %v3744_v29 }
  0x3d   : > { %437 = vst.msk [vmem:[#allocation2 + $0x218] sm:$0xff] %vm393_vm1, %v3493_v2 }
  0x3e   : > { %445 = vst.msk [vmem:[#allocation2 + $0x68] sm:$0xff] %vm440_vm2, %v3739_v28 }
  0x3f   : > { %446 = vst.msk [vmem:[#allocation2 + $0x70] sm:$0xff] %vm440_vm2, %v3744_v29 }
  0x40   : > { %420 = vst.msk [vmem:[#allocation2 + $0x220] sm:$0xff] %vm393_vm1, %v3493_v2 }
  0x41   : > { %438 = vst.msk [vmem:[#allocation2 + $0x238] sm:$0xff] %vm393_vm1, %v3493_v2 }
  0x42   : > { %5514 = vst [vmem:[#allocation9_spill] sm:$0xff] %v3779_v51 }
  0x43   : > { %447 = vst.msk [vmem:[#allocation2 + $0x88] sm:$0xff] %vm440_vm2, %v367_v40 }
  0x44   : > { %5515 = vst [vmem:[#allocation10_spill] sm:$0xff] %v3783_v52 }
  0x45   : > { %448 = vst.msk [vmem:[#allocation2 + $0x90] sm:$0xff] %vm440_vm2, %v368_v43  ;;  %v1029_v57 = vld [vmem:[#allocation2 + $0x67] sm:$0xff] }
  0x46   : > { %449 = vst.msk [vmem:[#allocation2 + $0xa8] sm:$0xff] %vm440_vm2, %v3779_v51  ;;  %v1126_v2 = vld [vmem:[#allocation2 + $0x68] sm:$0xff]  ;;  %v1062_v60 = vmul.f32 %v3641_v39, %v1029_v57  ;;  %v1127_v61 = vld [vmem:[#allocation2 + $0x70] sm:$0xff]  ;;  %v772_v0 = vmul.f32 %v1029_v57, %v3621_v25  ;;  %v515_v42 = vmul.f32 %v1029_v57, %v3587_v4 }
  0x47   : > { %450 = vst.msk [vmem:[#allocation2 + $0xb0] sm:$0xff] %vm440_vm2, %v3783_v52  ;;  %v1030_v59 = vld [vmem:[#allocation2 + $0x6f] sm:$0xff]  ;;  %v1159_v62 = vmul.f32 %v3654_v47, %v1126_v2  ;;  %v869_v1 = vmul.f32 %v1126_v2, %v3623_v26  ;;  %v1160_v8 = vmul.f32 %v3654_v47, %v1127_v61  ;;  %v870_v16 = vmul.f32 %v1127_v61, %v3623_v26 }
  0x48   : > { %v1223_v63 = vld [vmem:[#allocation2 + $0x69] sm:$0xff]  ;;  %v1063_v3 = vmul.f32 %v3641_v39, %v1030_v59  ;;  %v1224_v9 = vld [vmem:[#allocation2 + $0x71] sm:$0xff]  ;;  %v773_v12 = vmul.f32 %v1030_v59, %v3621_v25  ;;  %v1094_v13 = vadd.f32 %v1062_v60, %v996_v53  ;;  %v804_v15 = vadd.f32 %v772_v0, %v707_v55  ;;  %451 = vst.msk [vmem:[#allocation2 + $0xc8] sm:$0xff] %vm440_vm2, %v371_v49 }
  0x49   : > { %v1256_v11 = vmul.f32 %v3667_v54, %v1223_v63  ;;  %v1257_v14 = vmul.f32 %v3667_v54, %v1224_v9  ;;  %v966_v19 = vmul.f32 %v1223_v63, %v3633_v30  ;;  %v967_v20 = vmul.f32 %v1224_v9, %v3633_v30  ;;  %452 = vst.msk [vmem:[#allocation2 + $0xd0] sm:$0xff] %vm440_vm2, %v372_v50 }
  0x4a   : > { %v1095_v17 = vadd.f32 %v1063_v3, %v997_v56  ;;  %v805_v18 = vadd.f32 %v773_v12, %v708_v58  ;;  %v1031_v21 = vld [vmem:[#allocation2 + $0x87] sm:$0xff]  ;;  %v1191_v23 = vadd.f32 %v1159_v62, %v1094_v13  ;;  %v901_v24 = vadd.f32 %v869_v1, %v804_v15 }
  0x4b   : > { %v1128_v22 = vld [vmem:[#allocation2 + $0x88] sm:$0xff]  ;;  %v1064_v33 = vmul.f32 %v3641_v39, %v1031_v21  ;;  %v516_v43 = vmul.f32 %v1030_v59, %v3587_v4  ;;  %v580_v45 = vmul.f32 %v1126_v2, %v3589_v5  ;;  %v581_v46 = vmul.f32 %v1127_v61, %v3589_v5 }
  0x4c   : > { %v1032_v27 = vld [vmem:[#allocation2 + $0x8f] sm:$0xff]  ;;  %v1192_v31 = vadd.f32 %v1160_v8, %v1095_v17  ;;  %v902_v32 = vadd.f32 %v870_v16, %v805_v18  ;;  %v1288_v36 = vadd.f32 %v1256_v11, %v1191_v23  ;;  %v998_v37 = vadd.f32 %v966_v19, %v901_v24 }
  0x4d   : > { %v1065_v34 = vmul.f32 %v3641_v39, %v1032_v27  ;;  %v1129_v35 = vld [vmem:[#allocation2 + $0x90] sm:$0xff]  ;;  %v1161_v38 = vmul.f32 %v3654_v47, %v1128_v22  ;;  %v677_v48 = vmul.f32 %v1223_v63, %v3602_v10  ;;  %v678_v58 = vmul.f32 %v1224_v9, %v3602_v10  ;;  %v1033_v23 = vld [vmem:[#allocation2 + $0xa7] sm:$0xff] }
  0x4e   : > { %v1289_v40 = vadd.f32 %v1257_v14, %v1192_v31  ;;  %v999_v41 = vadd.f32 %v967_v20, %v902_v32  ;;  %v1162_v44 = vmul.f32 %v3654_v47, %v1129_v35  ;;  %v1096_v55 = vadd.f32 %v1064_v33, %v998_v37  ;;  %v1225_v57 = vld [vmem:[#allocation2 + $0x89] sm:$0xff]  ;;  %v1226_v61 = vld [vmem:[#allocation2 + $0x91] sm:$0xff] }
  0x4f   : > { %v612_v60 = vadd.f32 %v580_v45, %v515_v42  ;;  %v613_v59 = vadd.f32 %v581_v46, %v516_v43  ;;  %v774_v62 = vmul.f32 %v1031_v21, %v3621_v25  ;;  %v775_v2 = vmul.f32 %v1032_v27, %v3621_v25  ;;  %v1034_v24 = vld [vmem:[#allocation2 + $0xaf] sm:$0xff] }
  0x50   : > { %v1319_v53 = vpack.c.bf16 %v1289_v40, %v1288_v36  ;;  %v1097_v56 = vadd.f32 %v1065_v34, %v999_v41  ;;  %v871_v1 = vmul.f32 %v1128_v22, %v3623_v26  ;;  %v872_v3 = vmul.f32 %v1129_v35, %v3623_v26  ;;  %v3837_v41 = vld [vmem:[%s3579_s22 + $0xa8] sm:$0xff]  ;;  %v1131_v50 = vld [vmem:[#allocation2 + $0xb0] sm:$0xff] }
  0x51   : > { %v709_v63 = vadd.f32 %v677_v48, %v612_v60  ;;  %v710_v0 = vadd.f32 %v678_v58, %v613_v59  ;;  %v1193_v8 = vadd.f32 %v1161_v38, %v1096_v55  ;;  %v1258_v9 = vmul.f32 %v3667_v54, %v1225_v57  ;;  %5517 = vst [vmem:[#allocation12_spill] sm:$0xff] %v3837_v41  ;;  %v1227_v55 = vld [vmem:[#allocation2 + $0xa9] sm:$0xff]  ;;  %v384_v59 = vld [vmem:[%s3579_s22 + $0xb8] sm:$0xff] }
  0x52   : > { %3413 = vmatmul.msk.bf16.gmra.mxu0 %vm440_vm2, %v1319_v53  ;;  %v1194_v11 = vadd.f32 %v1162_v44, %v1097_v56  ;;  %v1259_v12 = vmul.f32 %v3667_v54, %v1226_v61  ;;  %v968_v15 = vmul.f32 %v1225_v57, %v3633_v30  ;;  %v969_v16 = vmul.f32 %v1226_v61, %v3633_v30  ;;  %v1130_v44 = vld [vmem:[#allocation2 + $0xa8] sm:$0xff]  ;;  %v383_v60 = vld [vmem:[%s3579_s22 + $0xb0] sm:$0xff] }
  0x53   : > { %v806_v13 = vadd.f32 %v774_v62, %v709_v63  ;;  %v807_v14 = vadd.f32 %v775_v2, %v710_v0  ;;  %v517_v17 = vmul.f32 %v1031_v21, %v3587_v4  ;;  %v518_v18 = vmul.f32 %v1032_v27, %v3587_v4  ;;  %v3834_v27 = vld [vmem:[%s3579_s22 + $0xa0] sm:$0xff]  ;;  %462 = vst.msk [vmem:[#allocation2 + $0x170] sm:$0xff] %vm440_vm2, %v3837_v41 }
  0x54   : > { %v582_v31 = vmul.f32 %v1128_v22, %v3589_v5  ;;  %v583_v32 = vmul.f32 %v1129_v35, %v3589_v5  ;;  %v1290_v33 = vadd.f32 %v1258_v9, %v1193_v8  ;;  %v679_v34 = vmul.f32 %v1225_v57, %v3602_v10  ;;  %5516 = vst [vmem:[#allocation11_spill] sm:$0xff] %v3834_v27 }
  0x55   : > { %v903_v19 = vadd.f32 %v871_v1, %v806_v13  ;;  %v904_v20 = vadd.f32 %v872_v3, %v807_v14  ;;  %v680_v36 = vmul.f32 %v1226_v61, %v3602_v10  ;;  %v776_v21 = vmul.f32 %v1033_v23, %v3621_v25  ;;  %461 = vst.msk [vmem:[#allocation2 + $0x168] sm:$0xff] %vm440_vm2, %v3834_v27  ;;  %v3851_v61 = vld [vmem:[#allocation2 + $0xc7] sm:$0xff]  ;;  %v1228_v13 = vld [vmem:[#allocation2 + $0xb1] sm:$0xff] }
  0x56   : > { %v614_v37 = vadd.f32 %v582_v31, %v517_v17  ;;  %v615_v38 = vadd.f32 %v583_v32, %v518_v18  ;;  %v777_v40 = vmul.f32 %v1034_v24, %v3621_v25  ;;  %v1291_v42 = vadd.f32 %v1259_v12, %v1194_v11  ;;  %463 = vst.msk [vmem:[#allocation2 + $0x188] sm:$0xff] %vm440_vm2, %v383_v60  ;;  %v3858_v11 = vld [vmem:[%s3579_s22 + $0x60] sm:$0xff]  ;;  %v3861_v12 = vld [vmem:[%s3579_s22 + $0x68] sm:$0xff] }
  0x57   : > { %v1000_v43 = vadd.f32 %v968_v15, %v903_v19  ;;  %v1066_v22 = vmul.f32 %v3641_v39, %v1033_v23  ;;  %v1067_v35 = vmul.f32 %v3641_v39, %v1034_v24  ;;  %v1001_v45 = vadd.f32 %v969_v16, %v904_v20  ;;  %5518 = vst [vmem:[#allocation13_spill] sm:$0xff] %v3858_v11 }
  0x58   : > { %v711_v46 = vadd.f32 %v679_v34, %v614_v37  ;;  %v712_v48 = vadd.f32 %v680_v36, %v615_v38  ;;  %v873_v49 = vmul.f32 %v1130_v44, %v3623_v26  ;;  %v1163_v53 = vmul.f32 %v3654_v47, %v1130_v44  ;;  %5519 = vst [vmem:[#allocation14_spill] sm:$0xff] %v3861_v12 }
  0x59   : > { %v874_v57 = vmul.f32 %v1131_v50, %v3623_v26  ;;  %v1320_v62 = vpack.c.bf16 %v1291_v42, %v1290_v33  ;;  %v970_v2 = vmul.f32 %v1227_v55, %v3633_v30  ;;  %v519_v63 = vmul.f32 %v1033_v23, %v3587_v4  ;;  %464 = vst.msk [vmem:[#allocation2 + $0x190] sm:$0xff] %vm440_vm2, %v384_v59  ;;  %v3875_v23 = vld [vmem:[#allocation2 + $0xcf] sm:$0xff] }
  0x5a   : > { %v808_v56 = vadd.f32 %v776_v21, %v711_v46  ;;  %v809_v58 = vadd.f32 %v777_v40, %v712_v48  ;;  %v520_v0 = vmul.f32 %v1034_v24, %v3587_v4  ;;  %v1098_v1 = vadd.f32 %v1066_v22, %v1000_v43  ;;  %453 = vst.msk [vmem:[#allocation2 + $0xe8] sm:$0xff] %vm440_vm2, %v3858_v11  ;;  %v3877_v24 = vld [vmem:[#allocation2 + $0xc8] sm:$0xff]  ;;  %v3885_v40 = vld [vmem:[%s3579_s22 + $0xc0] sm:$0xff]  ;;  %v376_v11 = vld [vmem:[%s3579_s22 + $0x78] sm:$0xff] }
  0x5b   : > { %v1099_v3 = vadd.f32 %v1067_v35, %v1001_v45  ;;  %v1164_v8 = vmul.f32 %v3654_v47, %v1131_v50  ;;  %v584_v14 = vmul.f32 %v1130_v44, %v3589_v5  ;;  %v585_v15 = vmul.f32 %v1131_v50, %v3589_v5  ;;  %454 = vst.msk [vmem:[#allocation2 + $0xf0] sm:$0xff] %vm440_vm2, %v3861_v12  ;;  %v3888_v42 = vld [vmem:[%s3579_s22 + $0xc8] sm:$0xff]  ;;  %v3898_v45 = vld [vmem:[#allocation2 + $0x170] sm:$0xff] }
  0x5c   : > { %v905_v9 = vadd.f32 %v873_v49, %v808_v56  ;;  %v681_v16 = vmul.f32 %v1227_v55, %v3602_v10  ;;  %v906_v17 = vadd.f32 %v874_v57, %v809_v58  ;;  %v971_v18 = vmul.f32 %v1228_v13, %v3633_v30  ;;  %v3880_v34 = vld [vmem:[#allocation2 + $0x167] sm:$0xff]  ;;  %5520 = vst [vmem:[#allocation15_spill] sm:$0xff] %v3885_v40  ;;  %v3896_v44 = vld [vmem:[#allocation2 + $0x16f] sm:$0xff] }
  0x5d   : > { %v1068_v19 = vmul.f32 %v3641_v39, %v3851_v61  ;;  %v616_v31 = vadd.f32 %v584_v14, %v519_v63  ;;  %v617_v32 = vadd.f32 %v585_v15, %v520_v0  ;;  %v682_v33 = vmul.f32 %v1228_v13, %v3602_v10  ;;  %5521 = vst [vmem:[#allocation16_spill] sm:$0xff] %v3888_v42  ;;  %v3890_v43 = vld [vmem:[#allocation2 + $0x168] sm:$0xff]  ;;  %v3902_v49 = vld [vmem:[#allocation2 + $0xd0] sm:$0xff] }
  0x5e   : > { %v1002_v20 = vadd.f32 %v970_v2, %v905_v9  ;;  %v1195_v36 = vadd.f32 %v1163_v53, %v1098_v1  ;;  %v1196_v37 = vadd.f32 %v1164_v8, %v1099_v3  ;;  %v1260_v38 = vmul.f32 %v3667_v54, %v1227_v55  ;;  %465 = vst.msk [vmem:[#allocation2 + $0x1a8] sm:$0xff] %vm440_vm2, %v3885_v40  ;;  %v3910_v55 = vld [vmem:[#allocation2 + $0x169] sm:$0xff]  ;;  %v3914_v57 = vld [vmem:[#allocation2 + $0xd1] sm:$0xff] }
  0x5f   : > { %v1261_v21 = vmul.f32 %v3667_v54, %v1228_v13  ;;  %v713_v22 = vadd.f32 %v681_v16, %v616_v31  ;;  %v778_v35 = vmul.f32 %v3851_v61, %v3621_v25  ;;  %v1003_v46 = vadd.f32 %v971_v18, %v906_v17  ;;  %466 = vst.msk [vmem:[#allocation2 + $0x1b0] sm:$0xff] %vm440_vm2, %v3888_v42  ;;  %v3912_v58 = vld [vmem:[#allocation2 + $0xc9] sm:$0xff]  ;;  %v3920_v2 = vld [vmem:[#allocation2 + $0x171] sm:$0xff] }
  0x60   : > { %v1069_v48 = vmul.f32 %v3641_v39, %v3875_v23  ;;  %v1165_v50 = vmul.f32 %v3654_v47, %v3877_v24  ;;  %v779_v53 = vmul.f32 %v3875_v23, %v3621_v25  ;;  %v1100_v56 = vadd.f32 %v1068_v19, %v1002_v20  ;;  %v3934_v15 = vld [vmem:[#allocation2 + $0x187] sm:$0xff]  ;;  %v3936_v16 = vld [vmem:[#allocation2 + $0x18f] sm:$0xff]  ;;  %456 = vst.msk [vmem:[#allocation2 + $0x110] sm:$0xff] %vm440_vm2, %v376_v11 }
  0x61   : > { %v714_v60 = vadd.f32 %v682_v33, %v617_v32  ;;  %v531_v59 = vmul.f32 %v3587_v4, %v3880_v34  ;;  %v3922_v63 = vadd.f32 %v1260_v38, %v1195_v36  ;;  %v1293_v0 = vadd.f32 %v1261_v21, %v1196_v37  ;;  %v3944_v31 = vld [vmem:[#allocation2 + $0x188] sm:$0xff]  ;;  %v3948_v38 = vld [vmem:[#allocation2 + $0x190] sm:$0xff] }
  0x62   : > { %3414 = vmatmul.msk.bf16.gmra.mxu0 %vm440_vm2, %v1320_v62  ;;  %v596_v62 = vmul.f32 %v3589_v5, %v3890_v43  ;;  %v532_v1 = vmul.f32 %v3587_v4, %v3896_v44  ;;  %v597_v3 = vmul.f32 %v3589_v5, %v3898_v45  ;;  %v1166_v8 = vmul.f32 %v3654_v47, %v3902_v49  ;;  %v4016_v11 = vld [vmem:[#allocation2 + $0xf0] sm:$0xff] }
  0x63   : > { %v810_v9 = vadd.f32 %v778_v35, %v713_v22  ;;  %v875_v13 = vmul.f32 %v3877_v24, %v3623_v26  ;;  %v693_v14 = vmul.f32 %v3602_v10, %v3910_v55  ;;  %v1101_v17 = vadd.f32 %v1069_v48, %v1003_v46  ;;  %v3955_v48 = vld [vmem:[#allocation2 + $0x189] sm:$0xff] }
  0x64   : > { %v1262_v18 = vmul.f32 %v3667_v54, %v3912_v58  ;;  %v1263_v19 = vmul.f32 %v3667_v54, %v3914_v57  ;;  %v694_v20 = vmul.f32 %v3602_v10, %v3920_v2  ;;  %v1197_v32 = vadd.f32 %v1165_v50, %v1100_v56  ;;  %v3961_v56 = vld [vmem:[#allocation2 + $0xef] sm:$0xff] }
  0x65   : > { %v811_v33 = vadd.f32 %v779_v53, %v714_v60  ;;  %v876_v36 = vmul.f32 %v3902_v49, %v3623_v26  ;;  %v628_v37 = vadd.f32 %v596_v62, %v531_v59  ;;  %v1321_v21 = vpack.c.bf16 %v1293_v0, %v3922_v63  ;;  %v3959_v53 = vld [vmem:[#allocation2 + $0xe7] sm:$0xff]  ;;  %v3965_v62 = vld [vmem:[#allocation2 + $0x191] sm:$0xff] }
  0x66   : > { %v629_v22 = vadd.f32 %v597_v3, %v532_v1  ;;  %v790_v35 = vmul.f32 %v3621_v25, %v3934_v15  ;;  %v791_v46 = vmul.f32 %v3621_v25, %v3936_v16  ;;  %v907_v40 = vadd.f32 %v875_v13, %v810_v9  ;;  %v3971_v9 = vld [vmem:[#allocation2 + $0x1a7] sm:$0xff]  ;;  %v3977_v27 = vld [vmem:[#allocation2 + $0x1af] sm:$0xff] }
  0x67   : > { %v972_v50 = vmul.f32 %v3912_v58, %v3633_v30  ;;  %v725_v60 = vadd.f32 %v693_v14, %v628_v37  ;;  %v887_v59 = vmul.f32 %v3623_v26, %v3944_v31  ;;  %v1198_v63 = vadd.f32 %v1166_v8, %v1101_v17  ;;  %v3992_v41 = vld [vmem:[#allocation2 + $0x1b0] sm:$0xff] }
  0x68   : > { %v973_v0 = vmul.f32 %v3914_v57, %v3633_v30  ;;  %v726_v1 = vadd.f32 %v694_v20, %v629_v22  ;;  %v888_v3 = vmul.f32 %v3623_v26, %v3948_v38  ;;  %v3973_v13 = vadd.f32 %v1262_v18, %v1197_v32  ;;  %v3985_v18 = vld [vmem:[#allocation2 + $0x1a8] sm:$0xff]  ;;  %v375_v32 = vld [vmem:[%s3579_s22 + $0x70] sm:$0xff] }
  0x69   : > { %v908_v14 = vadd.f32 %v876_v36, %v811_v33  ;;  %v822_v37 = vadd.f32 %v790_v35, %v725_v60  ;;  %v984_v42 = vmul.f32 %v3633_v30, %v3955_v48  ;;  %v1070_v8 = vmul.f32 %v3641_v39, %v3959_v53  ;;  %v3988_v36 = vld [vmem:[#allocation2 + $0xe8] sm:$0xff]  ;;  %455 = vst.msk [vmem:[#allocation2 + $0x108] sm:$0xff] %vm440_vm2, %v375_v32  ;;  %v4164_v29 = vld [vmem:[#allocation2 + $0x111] sm:$0xff] }
  0x6a   : > { %v1071_v17 = vmul.f32 %v3641_v39, %v3961_v56  ;;  %v823_v20 = vadd.f32 %v791_v46, %v726_v1  ;;  %v985_v22 = vmul.f32 %v3633_v30, %v3965_v62  ;;  %v1004_v33 = vadd.f32 %v972_v50, %v907_v40  ;;  %v4000_v40 = vld [vmem:[#allocation2 + $0x1a9] sm:$0xff] }
  0x6b   : > { %v919_v35 = vadd.f32 %v887_v59, %v822_v37  ;;  %v1082_v60 = vmul.f32 %v3641_v39, %v3971_v9  ;;  %v521_v46 = vmul.f32 %v3851_v61, %v3587_v4  ;;  %v1083_v12 = vmul.f32 %v3641_v39, %v3977_v27 }
  0x6c   : > { %v920_v1 = vadd.f32 %v888_v3, %v823_v20  ;;  %v522_v50 = vmul.f32 %v3875_v23, %v3587_v4  ;;  %v586_v59 = vmul.f32 %v3877_v24, %v3589_v5  ;;  %v1005_v37 = vadd.f32 %v973_v0, %v908_v14  ;;  %v4010_v20 = vld [vmem:[#allocation2 + $0x1b1] sm:$0xff]  ;;  %v4024_v14 = vld [vmem:[#allocation2 + $0xe9] sm:$0xff] }
  0x6d   : > { %v1016_v61 = vadd.f32 %v984_v42, %v919_v35  ;;  %v1179_v3 = vmul.f32 %v3654_v47, %v3985_v18  ;;  %v587_v32 = vmul.f32 %v3902_v49, %v3589_v5  ;;  %v4014_v51 = vadd.f32 %v1263_v19, %v1198_v63  ;;  %v387_v42 = vld [vmem:[%s3579_s22 + $0xd0] sm:$0xff]  ;;  %v388_v0 = vld [vmem:[%s3579_s22 + $0xd8] sm:$0xff] }
  0x6e   : > { %v1167_v23 = vmul.f32 %v3654_v47, %v3988_v36  ;;  %v1017_v24 = vadd.f32 %v985_v22, %v920_v1  ;;  %v1276_v52 = vmul.f32 %v3667_v54, %v4000_v40  ;;  %v618_v49 = vadd.f32 %v586_v59, %v521_v46  ;;  %467 = vst.msk [vmem:[#allocation2 + $0x1c8] sm:$0xff] %vm440_vm2, %v387_v42  ;;  %v4038_v59 = vld [vmem:[#allocation2 + $0xf1] sm:$0xff] }
  0x6f   : > { %v1114_v35 = vadd.f32 %v1082_v60, %v1016_v61  ;;  %v683_v19 = vmul.f32 %v3912_v58, %v3602_v10  ;;  %v1277_v22 = vmul.f32 %v3667_v54, %v4010_v20  ;;  %v619_v1 = vadd.f32 %v587_v32, %v522_v50  ;;  %468 = vst.msk [vmem:[#allocation2 + $0x1d0] sm:$0xff] %vm440_vm2, %v388_v0 }
  0x70   : > { %v1115_v63 = vadd.f32 %v1083_v12, %v1017_v24  ;;  %v684_v28 = vmul.f32 %v3914_v57, %v3602_v10  ;;  %v1102_v60 = vadd.f32 %v1070_v8, %v1004_v33  ;;  %v1103_v61 = vadd.f32 %v1071_v17, %v1005_v37 }
  0x71   : > { %v1168_v46 = vmul.f32 %v3654_v47, %v4016_v11  ;;  %v1211_v58 = vadd.f32 %v1179_v3, %v1114_v35  ;;  %v1264_v12 = vmul.f32 %v3667_v54, %v4024_v14  ;;  %v533_v50 = vmul.f32 %v3934_v15, %v3587_v4 }
  0x72   : > { %3415 = vmatmul.msk.bf16.gmra.mxu0 %vm440_vm2, %v1321_v21  ;;  %v1180_v21 = vmul.f32 %v3654_v47, %v3992_v41  ;;  %v598_v57 = vmul.f32 %v3944_v31, %v3589_v5  ;;  %v715_v42 = vadd.f32 %v683_v19, %v618_v49  ;;  %v780_v8 = vmul.f32 %v3959_v53, %v3621_v25 }
  0x73   : > { %v1308_v32 = vadd.f32 %v1276_v52, %v1211_v58  ;;  %v534_v17 = vmul.f32 %v3936_v16, %v3587_v4  ;;  %v1265_v33 = vmul.f32 %v3667_v54, %v4038_v59  ;;  %v716_v3 = vadd.f32 %v684_v28, %v619_v1 }
  0x74   : > { %v1212_v24 = vadd.f32 %v1180_v21, %v1115_v63  ;;  %v781_v21 = vmul.f32 %v3961_v56, %v3621_v25  ;;  %v1199_v15 = vadd.f32 %v1167_v23, %v1102_v60  ;;  %v1200_v0 = vadd.f32 %v1168_v46, %v1103_v61 }
  0x75   : > { %v877_v52 = vmul.f32 %v3988_v36, %v3623_v26  ;;  %v599_v31 = vmul.f32 %v3948_v38, %v3589_v5  ;;  %v878_v16 = vmul.f32 %v4016_v11, %v3623_v26  ;;  %v630_v49 = vadd.f32 %v598_v57, %v533_v50  ;;  %v4075_v58 = vld [vmem:[#allocation2 + $0x1c7] sm:$0xff] }
  0x76   : > { %v1309_v37 = vadd.f32 %v1277_v22, %v1212_v24  ;;  %v695_v19 = vmul.f32 %v3955_v48, %v3602_v10  ;;  %v812_v28 = vadd.f32 %v780_v8, %v715_v42  ;;  %v696_v23 = vmul.f32 %v3965_v62, %v3602_v10  ;;  %v4083_v42 = vld [vmem:[#allocation2 + $0x1cf] sm:$0xff] }
  0x77   : > { %v631_v63 = vadd.f32 %v599_v31, %v534_v17  ;;  %v792_v22 = vmul.f32 %v3971_v9, %v3621_v25  ;;  %v813_v38 = vadd.f32 %v781_v21, %v716_v3  ;;  %v793_v60 = vmul.f32 %v3977_v27, %v3621_v25  ;;  %v4085_v8 = vld [vmem:[#allocation2 + $0x1c8] sm:$0xff]  ;;  %v4088_v17 = vld [vmem:[%s3579_s22 + $0x80] sm:$0xff] }
  0x78   : > { %v1329_v35 = vpack.c.bf16 %v1309_v37, %v1308_v32  ;;  %v727_v1 = vadd.f32 %v695_v19, %v630_v49  ;;  %v889_v61 = vmul.f32 %v3985_v18, %v3623_v26  ;;  %v1322_v48 = vpack.c.bf16 %v4014_v51, %v3973_v13  ;;  %5522 = vst [vmem:[#allocation17_spill] sm:$0xff] %v4088_v17  ;;  %v4097_v37 = vld [vmem:[%s3579_s22 + $0x88] sm:$0xff]  ;;  %v4107_v49 = vld [vmem:[#allocation2 + $0x1d0] sm:$0xff] }
  0x79   : > { %v728_v46 = vadd.f32 %v696_v23, %v631_v63  ;;  %v890_v62 = vmul.f32 %v3992_v41, %v3623_v26  ;;  %v4077_v24 = vadd.f32 %v1264_v12, %v1199_v15  ;;  %v4079_v50 = vadd.f32 %v1265_v33, %v1200_v0  ;;  %5523 = vst [vmem:[#allocation18_spill] sm:$0xff] %v4097_v37  ;;  %v4101_v15 = vld [vmem:[#allocation2 + $0x107] sm:$0xff]  ;;  %v4103_v0 = vld [vmem:[#allocation2 + $0x10f] sm:$0xff] }
  0x7a   : > { %3423 = vmatmul.msk.bf16.vlgmr.msra.gmra.mxu3 %vm440_vm2, %v1329_v35  ;;  %v824_v57 = vadd.f32 %v792_v22, %v727_v1  ;;  %v986_v32 = vmul.f32 %v4000_v40, %v3633_v30  ;;  %v974_v51 = vmul.f32 %v4024_v14, %v3633_v30  ;;  %v975_v13 = vmul.f32 %v4038_v59, %v3633_v30  ;;  %v4120_v22 = vld [vmem:[#allocation2 + $0x1d1] sm:$0xff] }
  0x7b   : > { %v825_v12 = vadd.f32 %v793_v60, %v728_v46  ;;  %v987_v33 = vmul.f32 %v4010_v20, %v3633_v30  ;;  %457 = vst.msk [vmem:[#allocation2 + $0x128] sm:$0xff] %vm440_vm2, %v4088_v17  ;;  %v909_v3 = vadd.f32 %v877_v52, %v812_v28  ;;  %v910_v21 = vadd.f32 %v878_v16, %v813_v38  ;;  %v4116_v28 = vld [vmem:[#allocation2 + $0x1c9] sm:$0xff] }
  0x7c   : > { %v921_v31 = vadd.f32 %v889_v61, %v824_v57  ;;  %v1084_v35 = vmul.f32 %v3641_v39, %v4075_v58  ;;  %458 = vst.msk [vmem:[#allocation2 + $0x130] sm:$0xff] %vm440_vm2, %v4097_v37  ;;  %v1085_v52 = vmul.f32 %v3641_v39, %v4083_v42  ;;  %v1181_v16 = vmul.f32 %v3654_v47, %v4085_v8  ;;  %v4129_v61 = vld [vmem:[%s3579_s22 + $0xe0] sm:$0xff] }
  0x7d   : > { %v922_v19 = vadd.f32 %v890_v62, %v825_v12  ;;  %v523_v63 = vmul.f32 %v3959_v53, %v3587_v4  ;;  %v524_v38 = vmul.f32 %v3961_v56, %v3587_v4  ;;  %v588_v1 = vmul.f32 %v3988_v36, %v3589_v5  ;;  %5524 = vst [vmem:[#allocation19_spill] sm:$0xff] %v4129_v61 }
  0x7e   : > { %v1018_v23 = vadd.f32 %v986_v32, %v921_v31  ;;  %v589_v60 = vmul.f32 %v4016_v11, %v3589_v5  ;;  %v1072_v46 = vmul.f32 %v3641_v39, %v4101_v15  ;;  %v1073_v53 = vmul.f32 %v3641_v39, %v4103_v0  ;;  %469 = vst.msk [vmem:[#allocation2 + $0x1e8] sm:$0xff] %vm440_vm2, %v4129_v61  ;;  %v4142_v11 = vld [vmem:[#allocation2 + $0x108] sm:$0xff]  ;;  %v4148_v31 = vld [vmem:[#allocation2 + $0x110] sm:$0xff] }
  0x7f   : > { %v1019_v62 = vadd.f32 %v987_v33, %v922_v19  ;;  %v1182_v56 = vmul.f32 %v3654_v47, %v4107_v49  ;;  %v1006_v36 = vadd.f32 %v974_v51, %v909_v3  ;;  %v1007_v57 = vadd.f32 %v975_v13, %v910_v21  ;;  %v4154_v51 = vld [vmem:[#allocation2 + $0x109] sm:$0xff] }
  0x80   : > { %v1116_v32 = vadd.f32 %v1084_v35, %v1018_v23  ;;  %v1278_v12 = vmul.f32 %v3667_v54, %v4116_v28  ;;  %v1279_v19 = vmul.f32 %v3667_v54, %v4120_v22  ;;  %v685_v61 = vmul.f32 %v4024_v14, %v3602_v10 }
  0x81   : > { %v1117_v33 = vadd.f32 %v1085_v52, %v1019_v62  ;;  %v620_v3 = vadd.f32 %v588_v1, %v523_v63  ;;  %v621_v21 = vadd.f32 %v589_v60, %v524_v38  ;;  %v686_v35 = vmul.f32 %v4038_v59, %v3602_v10 }
  0x82   : > { %3416 = vmatmul.msk.bf16.gmra.mxu0 %vm440_vm2, %v1322_v48  ;;  %v4132_v48 = vld [vmem:[%s3579_s22 + $0xe8] sm:$0xff]  ;;  %v1213_v13 = vadd.f32 %v1181_v16, %v1116_v32  ;;  %v1323_v23 = vpack.c.bf16 %v4079_v50, %v4077_v24  ;;  %v1169_v52 = vmul.f32 %v3654_v47, %v4142_v11  ;;  %v1105_v17 = vadd.f32 %v1073_v53, %v1007_v57 }
  0x83   : > { %5525 = vst [vmem:[#allocation20_spill] sm:$0xff] %v4132_v48  ;;  %v1214_v62 = vadd.f32 %v1182_v56, %v1117_v33  ;;  %v1170_v14 = vmul.f32 %v3654_v47, %v4148_v31  ;;  %v1266_v16 = vmul.f32 %v3667_v54, %v4154_v51  ;;  %v782_v59 = vmul.f32 %v4101_v15, %v3621_v25 }
  0x84   : > { %470 = vst.msk [vmem:[#allocation2 + $0x1f0] sm:$0xff] %vm440_vm2, %v4132_v48  ;;  %v1104_v48 = vadd.f32 %v1072_v46, %v1006_v36  ;;  %v1310_v37 = vadd.f32 %v1278_v12, %v1213_v13  ;;  %v783_v24 = vmul.f32 %v4103_v0, %v3621_v25  ;;  %v717_v50 = vadd.f32 %v685_v61, %v620_v3 }
  0x85   : > { %v1311_v63 = vadd.f32 %v1279_v19, %v1214_v62  ;;  %v718_v38 = vadd.f32 %v686_v35, %v621_v21  ;;  %v535_v1 = vmul.f32 %v3971_v9, %v3587_v4  ;;  %v536_v60 = vmul.f32 %v3977_v27, %v3587_v4  ;;  %v4200_v21 = vld [vmem:[#allocation2 + $0x1e7] sm:$0xff]  ;;  %v380_v35 = vld [vmem:[%s3579_s22 + $0x98] sm:$0xff] }
  0x86   : > { %v600_v53 = vmul.f32 %v3985_v18, %v3589_v5  ;;  %v601_v56 = vmul.f32 %v3992_v41, %v3589_v5  ;;  %v697_v36 = vmul.f32 %v4000_v40, %v3602_v10  ;;  %v1201_v57 = vadd.f32 %v1169_v52, %v1104_v48  ;;  %460 = vst.msk [vmem:[#allocation2 + $0x150] sm:$0xff] %vm440_vm2, %v380_v35 }
  0x87   : > { %v1330_v46 = vpack.c.bf16 %v1311_v63, %v1310_v37  ;;  %v1202_v61 = vadd.f32 %v1170_v14, %v1105_v17  ;;  %v1267_v32 = vmul.f32 %v3667_v54, %v4164_v29  ;;  %v698_v9 = vmul.f32 %v4010_v20, %v3602_v10  ;;  %v379_v20 = vld [vmem:[%s3579_s22 + $0x90] sm:$0xff] }
  0x88   : > { %v632_v27 = vadd.f32 %v600_v53, %v535_v1  ;;  %v633_v18 = vadd.f32 %v601_v56, %v536_v60  ;;  %v794_v37 = vmul.f32 %v4075_v58, %v3621_v25  ;;  %v795_v41 = vmul.f32 %v4083_v42, %v3621_v25  ;;  %459 = vst.msk [vmem:[#allocation2 + $0x148] sm:$0xff] %vm440_vm2, %v379_v20  ;;  %v4220_v1 = vld [vmem:[#allocation2 + $0x1e8] sm:$0xff] }
  0x89   : > { %v814_v40 = vadd.f32 %v782_v59, %v717_v50  ;;  %v815_v48 = vadd.f32 %v783_v24, %v718_v38  ;;  %v879_v17 = vmul.f32 %v4142_v11, %v3623_v26  ;;  %v880_v12 = vmul.f32 %v4148_v31, %v3623_v26 }
  0x8a   : > { %3424 = vmatmul.msk.bf16.gmra.mxu3 %vm440_vm2, %v1330_v46  ;;  %v729_v33 = vadd.f32 %v697_v36, %v632_v27  ;;  %v730_v19 = vadd.f32 %v698_v9, %v633_v18  ;;  %v891_v13 = vmul.f32 %v4085_v8, %v3623_v26  ;;  %v892_v3 = vmul.f32 %v4107_v49, %v3623_v26  ;;  %v391_v36 = vld [vmem:[%s3579_s22 + $0xf0] sm:$0xff] }
  0x8b   : > { %v4204_v52 = vadd.f32 %v1266_v16, %v1201_v57  ;;  %v4206_v62 = vadd.f32 %v1267_v32, %v1202_v61  ;;  %v976_v14 = vmul.f32 %v4154_v51, %v3633_v30  ;;  %v977_v63 = vmul.f32 %v4164_v29, %v3633_v30  ;;  %v4212_v59 = vld [vmem:[#allocation2 + $0x1ef] sm:$0xff]  ;;  %v392_v57 = vld [vmem:[%s3579_s22 + $0xf8] sm:$0xff]  ;;  %v4230_v61 = vld [vmem:[#allocation2 + $0x127] sm:$0xff]  ;;  %471 = vst.msk [vmem:[#allocation2 + $0x208] sm:$0xff] %vm440_vm2, %v391_v36 }
  0x8c   : > { %v826_v24 = vadd.f32 %v794_v37, %v729_v33  ;;  %v827_v50 = vadd.f32 %v795_v41, %v730_v19  ;;  %v988_v16 = vmul.f32 %v4116_v28, %v3633_v30  ;;  %v989_v38 = vmul.f32 %v4120_v22, %v3633_v30  ;;  %v4222_v60 = vld [vmem:[#allocation2 + $0x1f0] sm:$0xff]  ;;  %472 = vst.msk [vmem:[#allocation2 + $0x210] sm:$0xff] %vm440_vm2, %v392_v57 }
  0x8d   : > { %v911_v46 = vadd.f32 %v879_v17, %v814_v40  ;;  %v912_v53 = vadd.f32 %v880_v12, %v815_v48  ;;  %v1086_v56 = vmul.f32 %v3641_v39, %v4200_v21  ;;  %v4232_v32 = vld [vmem:[#allocation2 + $0x12f] sm:$0xff]  ;;  %v1087_v18 = vmul.f32 %v3641_v39, %v4212_v59 }
  0x8e   : > { %v923_v9 = vadd.f32 %v891_v13, %v826_v24  ;;  %v924_v27 = vadd.f32 %v892_v3, %v827_v50  ;;  %v590_v37 = vmul.f32 %v4142_v11, %v3589_v5  ;;  %v1183_v41 = vmul.f32 %v3654_v47, %v4220_v1  ;;  %v4243_v40 = vld [vmem:[#allocation2 + $0x1e9] sm:$0xff]  ;;  %v4245_v48 = vld [vmem:[#allocation2 + $0x1f1] sm:$0xff] }
  0x8f   : > { %v526_v17 = vmul.f32 %v4103_v0, %v3587_v4  ;;  %v591_v12 = vmul.f32 %v4148_v31, %v3589_v5  ;;  %v4252_v11 = vld [vmem:[#allocation2 + $0x128] sm:$0xff]  ;;  %v687_v13 = vmul.f32 %v4154_v51, %v3602_v10  ;;  %v1008_v3 = vadd.f32 %v976_v14, %v911_v46  ;;  %v4260_v50 = vld [vmem:[#allocation2 + $0x130] sm:$0xff] }
  0x90   : > { %v1020_v20 = vadd.f32 %v988_v16, %v923_v9  ;;  %v1021_v33 = vadd.f32 %v989_v38, %v924_v27  ;;  %v1009_v35 = vadd.f32 %v977_v63, %v912_v53  ;;  %v1074_v24 = vmul.f32 %v3641_v39, %v4230_v61 }
  0x91   : > { %v1075_v0 = vmul.f32 %v3641_v39, %v4232_v32  ;;  %v1280_v16 = vmul.f32 %v3667_v54, %v4243_v40  ;;  %v1281_v38 = vmul.f32 %v3667_v54, %v4245_v48  ;;  %v1324_v51 = vpack.c.bf16 %v4206_v62, %v4204_v52  ;;  %v4278_v62 = vld [vmem:[#allocation2 + $0x129] sm:$0xff] }
  0x92   : > { %3417 = vmatmul.msk.bf16.gmra.mxu0 %vm440_vm2, %v1323_v23  ;;  %v525_v23 = vmul.f32 %v4101_v15, %v3587_v4  ;;  %v1184_v15 = vmul.f32 %v3654_v47, %v4222_v60  ;;  %v1118_v31 = vadd.f32 %v1086_v56, %v1020_v20  ;;  %v1119_v36 = vadd.f32 %v1087_v18, %v1021_v33 }
  0x93   : > { %v1171_v14 = vmul.f32 %v3654_v47, %v4252_v11  ;;  %v623_v63 = vadd.f32 %v591_v12, %v526_v17  ;;  %v688_v46 = vmul.f32 %v4164_v29, %v3602_v10  ;;  %v784_v57 = vmul.f32 %v4230_v61, %v3621_v25 }
  0x94   : > { %v622_v19 = vadd.f32 %v590_v37, %v525_v23  ;;  %v1215_v53 = vadd.f32 %v1183_v41, %v1118_v31  ;;  %v1216_v23 = vadd.f32 %v1184_v15, %v1119_v36  ;;  %v1106_v9 = vadd.f32 %v1074_v24, %v1008_v3  ;;  %v4284_v15 = vld [vmem:[#allocation2 + $0x131] sm:$0xff] }
  0x95   : > { %v1107_v27 = vadd.f32 %v1075_v0, %v1009_v35  ;;  %v1172_v18 = vmul.f32 %v3654_v47, %v4260_v50  ;;  %v785_v52 = vmul.f32 %v4232_v32, %v3621_v25  ;;  %v881_v29 = vmul.f32 %v4252_v11, %v3623_v26 }
  0x96   : > { %v719_v56 = vadd.f32 %v687_v13, %v622_v19  ;;  %v1312_v37 = vadd.f32 %v1280_v16, %v1215_v53  ;;  %v1313_v17 = vadd.f32 %v1281_v38, %v1216_v23  ;;  %v537_v41 = vmul.f32 %v4075_v58, %v3587_v4 }
  0x97   : > { %v720_v12 = vadd.f32 %v688_v46, %v623_v63  ;;  %v538_v20 = vmul.f32 %v4083_v42, %v3587_v4  ;;  %v602_v33 = vmul.f32 %v4085_v8, %v3589_v5  ;;  %v603_v19 = vmul.f32 %v4107_v49, %v3589_v5 }
  0x98   : > { %v1331_v13 = vpack.c.bf16 %v1313_v17, %v1312_v37  ;;  %v816_v3 = vadd.f32 %v784_v57, %v719_v56  ;;  %v699_v35 = vmul.f32 %v4116_v28, %v3602_v10  ;;  %v700_v58 = vmul.f32 %v4120_v22, %v3602_v10  ;;  %v4314_v56 = vld [vmem:[#allocation2 + $0x207] sm:$0xff]  ;;  %v4316_v57 = vld [vmem:[#allocation2 + $0x20f] sm:$0xff] }
  0x99   : > { %v1268_v24 = vmul.f32 %v3667_v54, %v4278_v62  ;;  %v634_v0 = vadd.f32 %v602_v33, %v537_v41  ;;  %v635_v31 = vadd.f32 %v603_v19, %v538_v20  ;;  %v796_v42 = vmul.f32 %v4200_v21, %v3621_v25  ;;  %v4330_v41 = vld [vmem:[#allocation2 + $0x210] sm:$0xff] }
  0x9a   : > { %v1203_v8 = vadd.f32 %v1171_v14, %v1106_v9  ;;  %v1204_v36 = vadd.f32 %v1172_v18, %v1107_v27  ;;  %v1269_v49 = vmul.f32 %v3667_v54, %v4284_v15  ;;  %3425 = vmatmul.msk.bf16.gmra.mxu3 %vm440_vm2, %v1331_v13  ;;  %v797_v28 = vmul.f32 %v4212_v59, %v3621_v25  ;;  %v4318_v9 = vld [vmem:[#allocation2 + $0x147] sm:$0xff] }
  0x9b   : > { %v731_v16 = vadd.f32 %v699_v35, %v634_v0  ;;  %v732_v22 = vadd.f32 %v700_v58, %v635_v31  ;;  %v893_v38 = vmul.f32 %v4220_v1, %v3623_v26  ;;  %v894_v63 = vmul.f32 %v4222_v60, %v3623_v26  ;;  %v4342_v0 = vld [vmem:[#allocation2 + $0x211] sm:$0xff] }
  0x9c   : > { %v817_v14 = vadd.f32 %v785_v52, %v720_v12  ;;  %v882_v46 = vmul.f32 %v4260_v50, %v3623_v26  ;;  %v913_v53 = vadd.f32 %v881_v29, %v816_v3  ;;  %v978_v23 = vmul.f32 %v4278_v62, %v3633_v30  ;;  %v4328_v29 = vld [vmem:[#allocation2 + $0x208] sm:$0xff] }
  0x9d   : > { %v828_v27 = vadd.f32 %v796_v42, %v731_v16  ;;  %v829_v18 = vadd.f32 %v797_v28, %v732_v22  ;;  %v990_v37 = vmul.f32 %v4243_v40, %v3633_v30  ;;  %v4324_v52 = vadd.f32 %v1268_v24, %v1203_v8  ;;  %v4340_v24 = vld [vmem:[#allocation2 + $0x209] sm:$0xff] }
  0x9e   : > { %v4326_v17 = vadd.f32 %v1269_v49, %v1204_v36  ;;  %v1088_v33 = vmul.f32 %v3641_v39, %v4314_v56  ;;  %v1089_v19 = vmul.f32 %v3641_v39, %v4316_v57  ;;  %v914_v13 = vadd.f32 %v882_v46, %v817_v14  ;;  %v4344_v31 = vld [vmem:[#allocation2 + $0x14f] sm:$0xff] }
  0x9f   : > { %v925_v12 = vadd.f32 %v893_v38, %v828_v27  ;;  %v926_v20 = vadd.f32 %v894_v63, %v829_v18  ;;  %v979_v3 = vmul.f32 %v4284_v15, %v3633_v30  ;;  %v1010_v35 = vadd.f32 %v978_v23, %v913_v53  ;;  %v4346_v42 = vld [vmem:[#allocation2 + $0x148] sm:$0xff]  ;;  %v4352_v16 = vld [vmem:[#allocation2 + $0x150] sm:$0xff] }
  0xa0   : > { %v1076_v58 = vmul.f32 %v3641_v39, %v4318_v9  ;;  %v1185_v49 = vmul.f32 %v3654_v47, %v4328_v29  ;;  %v1186_v28 = vmul.f32 %v3654_v47, %v4330_v41  ;;  %v4354_v22 = vld [vmem:[#allocation2 + $0x149] sm:$0xff]  ;;  %v527_v38 = vmul.f32 %v4230_v61, %v3587_v4 }
  0xa1   : > { %v1022_v8 = vadd.f32 %v990_v37, %v925_v12  ;;  %v528_v63 = vmul.f32 %v4232_v32, %v3587_v4  ;;  %v592_v14 = vmul.f32 %v4252_v11, %v3589_v5  ;;  %v593_v46 = vmul.f32 %v4260_v50, %v3589_v5 }
  0xa2   : > { %3418 = vmatmul.msk.bf16.gmra.mxu0 %vm440_vm2, %v1324_v51  ;;  %v991_v51 = vmul.f32 %v4245_v48, %v3633_v30  ;;  %v1282_v27 = vmul.f32 %v3667_v54, %v4340_v24  ;;  %v1283_v18 = vmul.f32 %v3667_v54, %v4342_v0  ;;  %v1325_v61 = vpack.c.bf16 %v4326_v17, %v4324_v52 }
  0xa3   : > { %v1120_v53 = vadd.f32 %v1088_v33, %v1022_v8  ;;  %v1011_v37 = vadd.f32 %v979_v3, %v914_v13  ;;  %v1077_v32 = vmul.f32 %v3641_v39, %v4344_v31  ;;  %v1173_v11 = vmul.f32 %v3654_v47, %v4346_v42 }
  0xa4   : > { %v1023_v36 = vadd.f32 %v991_v51, %v926_v20  ;;  %v4374_v51 = vld [vmem:[#allocation2 + $0x151] sm:$0xff]  ;;  %v1174_v50 = vmul.f32 %v3654_v47, %v4352_v16  ;;  %v1270_v12 = vmul.f32 %v3667_v54, %v4354_v22  ;;  %v625_v8 = vadd.f32 %v593_v46, %v528_v63 }
  0xa5   : > { %v1217_v20 = vadd.f32 %v1185_v49, %v1120_v53  ;;  %v689_v52 = vmul.f32 %v4278_v62, %v3602_v10  ;;  %v690_v17 = vmul.f32 %v4284_v15, %v3602_v10  ;;  %v1108_v13 = vadd.f32 %v1076_v58, %v1010_v35 }
  0xa6   : > { %v1121_v23 = vadd.f32 %v1089_v19, %v1023_v36  ;;  %v624_v19 = vadd.f32 %v592_v14, %v527_v38  ;;  %v1271_v3 = vmul.f32 %v3667_v54, %v4374_v51  ;;  %v1109_v49 = vadd.f32 %v1077_v32, %v1011_v37 }
  0xa7   : > { %v1314_v36 = vadd.f32 %v1282_v27, %v1217_v20  ;;  %v539_v62 = vmul.f32 %v4200_v21, %v3587_v4  ;;  %v540_v15 = vmul.f32 %v4212_v59, %v3587_v4  ;;  %v604_v58 = vmul.f32 %v4220_v1, %v3589_v5 }
  0xa8   : > { %v1218_v33 = vadd.f32 %v1186_v28, %v1121_v23  ;;  %v786_v28 = vmul.f32 %v4318_v9, %v3621_v25  ;;  %v605_v38 = vmul.f32 %v4222_v60, %v3589_v5  ;;  %v701_v63 = vmul.f32 %v4243_v40, %v3602_v10 }
  0xa9   : > { %v721_v14 = vadd.f32 %v689_v52, %v624_v19  ;;  %v722_v46 = vadd.f32 %v690_v17, %v625_v8  ;;  %v787_v53 = vmul.f32 %v4344_v31, %v3621_v25  ;;  %v702_v21 = vmul.f32 %v4245_v48, %v3602_v10  ;;  %v1057_v8 = vld [vmem:[#allocation2 + $0x227] sm:$0xff] }
  0xaa   : > { %v1315_v6 = vadd.f32 %v1283_v18, %v1218_v33  ;;  %v637_v59 = vadd.f32 %v605_v38, %v540_v15  ;;  %v798_v1 = vmul.f32 %v4314_v56, %v3621_v25  ;;  %v799_v60 = vmul.f32 %v4316_v57, %v3621_v25 }
  0xab   : > { %v1205_v27 = vadd.f32 %v1173_v11, %v1108_v13  ;;  %v1206_v18 = vadd.f32 %v1174_v50, %v1109_v49  ;;  %v883_v48 = vmul.f32 %v4346_v42, %v3623_v26  ;;  %v895_v20 = vmul.f32 %v4328_v29, %v3623_v26  ;;  %v1058_v11 = vld [vmem:[#allocation2 + $0x22f] sm:$0xff] }
  0xac   : > { %v1332_v35 = vpack.c.bf16 %v1315_v6, %v1314_v36  ;;  %v636_v6 = vadd.f32 %v604_v58, %v539_v62  ;;  %v734_v32 = vadd.f32 %v702_v21, %v637_v59  ;;  %v896_v56 = vmul.f32 %v4330_v41, %v3623_v26  ;;  %v1154_v29 = vld [vmem:[#allocation2 + $0x228] sm:$0xff] }
  0xad   : > { %v818_v19 = vadd.f32 %v786_v28, %v721_v14  ;;  %v819_v57 = vadd.f32 %v787_v53, %v722_v46  ;;  %v992_v17 = vmul.f32 %v4340_v24, %v3633_v30  ;;  %v993_v13 = vmul.f32 %v4342_v0, %v3633_v30  ;;  %v1155_v28 = vld [vmem:[#allocation2 + $0x230] sm:$0xff] }
  0xae   : > { %3426 = vmatmul.msk.bf16.gmra.mxu3 %vm440_vm2, %v1332_v35  ;;  %v733_v37 = vadd.f32 %v701_v63, %v636_v6  ;;  %v831_v52 = vadd.f32 %v799_v60, %v734_v32  ;;  %v1302_v41 = vadd.f32 %v1270_v12, %v1205_v27  ;;  %v1303_v36 = vadd.f32 %v1271_v3, %v1206_v18  ;;  %v1251_v14 = vld [vmem:[#allocation2 + $0x229] sm:$0xff]  ;;  %v1252_v12 = vld [vmem:[#allocation2 + $0x231] sm:$0xff] }
  0xaf   : > { %v1400_v23 = vpop.f32.mrf.mxu0  ;;  %v980_v49 = vmul.f32 %v4354_v22, %v3633_v30  ;;  %v1090_v35 = vmul.f32 %v3641_v39, %v1057_v8  ;;  %v1091_v58 = vmul.f32 %v3641_v39, %v1058_v11  ;;  %v915_v38 = vadd.f32 %v883_v48, %v818_v19  ;;  %v756_v8 = vld [vmem:[#allocation2 + $0x16f] sm:$0xff] }
  0xb0   : > { %v1401_v40 = vadd.f32 %v4389_v7, %v1400_v23  ;;  %v830_v50 = vadd.f32 %v798_v1, %v733_v37  ;;  %v928_v15 = vadd.f32 %v896_v56, %v831_v52  ;;  %v981_v0 = vmul.f32 %v4374_v51, %v3633_v30 }
  0xb1   : > { %v1187_v63 = vmul.f32 %v3654_v47, %v1154_v29  ;;  %v1188_v21 = vmul.f32 %v3654_v47, %v1155_v28  ;;  %v529_v23 = vmul.f32 %v4318_v9, %v3587_v4  ;;  %v530_v59 = vmul.f32 %v4344_v31, %v3587_v4 }
  0xb2   : > { %3419 = vmatmul.msk.bf16.gmra.mxu0 %vm440_vm2, %v1325_v61  ;;  %v1480_v33 = vmax.f32 %v1401_v40, 0.0  ;;  %v884_v61 = vmul.f32 %v4352_v16, %v3623_v26  ;;  %v927_v62 = vadd.f32 %v895_v20, %v830_v50  ;;  %v1025_v53 = vadd.f32 %v993_v13, %v928_v15 }
  0xb3   : > { %v594_v1 = vmul.f32 %v4346_v42, %v3589_v5  ;;  %v595_v60 = vmul.f32 %v4352_v16, %v3589_v5  ;;  %v1284_v18 = vmul.f32 %v3667_v54, %v1251_v14  ;;  %v1285_v48 = vmul.f32 %v3667_v54, %v1252_v12 }
  0xb4   : > { %1512 = vst.msk [vmem:[#allocation2 + $0x28] sm:$0xff] %vm393_vm1, %v1480_v33  ;;  %v916_v24 = vadd.f32 %v884_v61, %v819_v57  ;;  %v1024_v46 = vadd.f32 %v992_v17, %v927_v62  ;;  %v1123_v27 = vadd.f32 %v1091_v58, %v1025_v53  ;;  %v1326_v37 = vpack.c.bf16 %v1303_v36, %v1302_v41  ;;  %v853_v41 = vld [vmem:[#allocation2 + $0x170] sm:$0xff] }
  0xb5   : > { %v1078_v9 = vmul.f32 %v3641_v39, %v3880_v34  ;;  %v1079_v4 = vmul.f32 %v3641_v39, %v3896_v44  ;;  %v1012_v31 = vadd.f32 %v980_v49, %v915_v38  ;;  %v626_v5 = vadd.f32 %v594_v1, %v529_v23  ;;  %v755_v34 = vld [vmem:[#allocation2 + $0x167] sm:$0xff]  ;;  %v1544_v38 = vld [vmem:[%s5466_s4] sm:$0x7] }
  0xb6   : > { %v1122_v40 = vadd.f32 %v1090_v35, %v1024_v46  ;;  %v1013_v20 = vadd.f32 %v981_v0, %v916_v24  ;;  %v1220_v56 = vadd.f32 %v1188_v21, %v1123_v27  ;;  %v627_v16 = vadd.f32 %v595_v60, %v530_v59  ;;  %v949_v58 = vld [vmem:[#allocation2 + $0x169] sm:$0xff] }
  0xb7   : > { %v1402_v3 = vpop.f32.mrf.mxu0  ;;  %v691_v33 = vmul.f32 %v4354_v22, %v3602_v10  ;;  %v692_v19 = vmul.f32 %v4374_v51, %v3602_v10  ;;  %v1175_v44 = vmul.f32 %v3654_v47, %v3890_v43  ;;  %v1110_v11 = vadd.f32 %v1078_v9, %v1012_v31  ;;  %v852_v51 = vld [vmem:[#allocation2 + $0x168] sm:$0xff]  ;;  %v1145_v9 = vld [vmem:[#allocation2 + $0x190] sm:$0xff] }
  0xb8   : > { %v1403_v6 = vadd.f32 %v4389_v7, %v1402_v3  ;;  %v1219_v42 = vadd.f32 %v1187_v63, %v1122_v40  ;;  %v1317_v61 = vadd.f32 %v1285_v48, %v1220_v56  ;;  %v1111_v50 = vadd.f32 %v1079_v4, %v1013_v20  ;;  %v1048_v46 = vld [vmem:[#allocation2 + $0x18f] sm:$0xff]  ;;  %v1547_v23 = vld [vmem:[#allocation2 + $0x7] sm:$0xff] }
  0xb9   : > { %v1176_v52 = vmul.f32 %v3654_v47, %v3898_v45  ;;  %v723_v13 = vadd.f32 %v691_v33, %v626_v5  ;;  %v724_v22 = vadd.f32 %v692_v19, %v627_v16  ;;  %v788_v29 = vmul.f32 %v3621_v25, %v755_v34  ;;  %v1548_v60 = vld [vmem:[#allocation2 + $0xf] sm:$0xff]  ;;  %v5527_v5 = vld [vmem:[#allocation5_spill] sm:$0xff] }
  0xba   : > { %v1481_v32 = vmax.f32 %v1403_v6, 0.0  ;;  %v1316_v57 = vadd.f32 %v1284_v18, %v1219_v42  ;;  %v789_v10 = vmul.f32 %v3621_v25, %v756_v8  ;;  %v1207_v36 = vadd.f32 %v1175_v44, %v1110_v11  ;;  %v950_v25 = vld [vmem:[#allocation2 + $0x171] sm:$0xff]  ;;  %v1612_v6 = vld [vmem:[#allocation2 + $0x8] sm:$0xff] }
  0xbb   : > { %v1208_v43 = vadd.f32 %v1176_v52, %v1111_v50  ;;  %v1272_v49 = vmul.f32 %v3667_v54, %v3910_v55  ;;  %v1273_v45 = vmul.f32 %v3667_v54, %v3920_v2  ;;  %v820_v28 = vadd.f32 %v788_v29, %v723_v13  ;;  %v2404_v55 = vld [vmem:[%s5467_s5] sm:$0xf]  ;;  %v1613_v40 = vld [vmem:[#allocation2 + $0x10] sm:$0xff]  ;;  %v5526_v27 = vld [vmem:[#allocation6_spill] sm:$0xff] }
  0xbc   : > { %1513 = vst.msk [vmem:[#allocation2 + $0x30] sm:$0xff] %vm393_vm1, %v1481_v32  ;;  %v1333_v17 = vpack.c.bf16 %v1317_v61, %v1316_v57  ;;  %v821_v62 = vadd.f32 %v789_v10, %v724_v22  ;;  %v885_v15 = vmul.f32 %v3623_v26, %v852_v51  ;;  %v886_v35 = vmul.f32 %v3623_v26, %v853_v41  ;;  %v1047_v26 = vld [vmem:[#allocation2 + $0x187] sm:$0xff]  ;;  %v1710_v20 = vld [vmem:[#allocation2 + $0x11] sm:$0xff] }
  0xbd   : > { %v1304_v24 = vadd.f32 %v1272_v49, %v1207_v36  ;;  %v1305_v0 = vadd.f32 %v1273_v45, %v1208_v43  ;;  %v982_v63 = vmul.f32 %v3633_v30, %v949_v58  ;;  %v983_v12 = vmul.f32 %v3633_v30, %v950_v25  ;;  %v1709_v57 = vld [vmem:[#allocation2 + $0x9] sm:$0xff]  ;;  %v1242_v52 = vld [vmem:[#allocation2 + $0x191] sm:$0xff] }
  0xbe   : > { %3427 = vmatmul.msk.bf16.gmra.mxu3 %vm440_vm2, %v1333_v17  ;;  %v917_v2 = vadd.f32 %v885_v15, %v820_v28  ;;  %v918_v14 = vadd.f32 %v886_v35, %v821_v62  ;;  %v2459_v3 = vsel %vm2457_vm3, %v2404_v55, 0  ;;  %v4477_v53 = vperm.slane %v1544_v38, 0  ;;  %v1241_v50 = vld [vmem:[#allocation2 + $0x189] sm:$0xff] }
  0xbf   : > { %2468 = vmatpush.bf16.msra.mxu1 %v2459_v3  ;;  %v4479_v21 = vperm.slane %v1544_v38, 1  ;;  %3470 = vmatpush.bf16.msrb.mxu3 %v2459_v3  ;;  %v1327_v59 = vpack.c.bf16 %v1305_v0, %v1304_v24  ;;  %v1080_v1 = vmul.f32 %v3641_v39, %v1047_v26  ;;  %v1081_v48 = vmul.f32 %v3641_v39, %v1048_v46  ;;  %v1545_v39 = vld [vmem:[%s5466_s4 + $0x4] sm:$0x7]  ;;  %v1806_v51 = vld [vmem:[#allocation2 + $0x27] sm:$0xff] }
  0xc0   : > { %3469 = vmatpush.bf16.msra.mxu2 %v2459_v3  ;;  %v1014_v30 = vadd.f32 %v982_v63, %v917_v2  ;;  %v1015_v18 = vadd.f32 %v983_v12, %v918_v14  ;;  %v1580_v4 = vmul.f32 %v4477_v53, %v1547_v23  ;;  %v4486_v42 = vperm.slane %v1544_v38, 2  ;;  %v1546_v58 = vld [vmem:[%s5466_s4 + $0x8] sm:$0x7] }
  0xc1   : > { %v1645_v31 = vmul.f32 %v4479_v21, %v1612_v6  ;;  %v5497_v56 = vmov -inf   ;;  %v1581_v33 = vmul.f32 %v4477_v53, %v1548_v60  ;;  %v1646_v19 = vmul.f32 %v4479_v21, %v1613_v40  ;;  %v1903_v2 = vld [vmem:[#allocation2 + $0x28] sm:$0xff] }
  0xc2   : > { %3420 = vmatmul.msk.bf16.gmra.mxu0 %vm440_vm2, %v1326_v37  ;;  %v1144_v37 = vld [vmem:[#allocation2 + $0x188] sm:$0xff]  ;;  %2551 = vst.msk [vmem:[#allocation2] sm:$0xff] %vm393_vm1, %v5497_v56  ;;  %v1112_v8 = vadd.f32 %v1080_v1, %v1014_v30  ;;  %v1113_v44 = vadd.f32 %v1081_v48, %v1015_v18  ;;  %v1178_v11 = vmul.f32 %v3654_v47, %v1145_v9  ;;  %v4507_v22 = vperm.slane %v1545_v39, 0 }
  0xc3   : > { %2704 = vmatpush.msra.mxu3 %v5526_v27  ;;  %2554 = vst.msk [vmem:[#allocation2 + $0x18] sm:$0xff] %vm393_vm1, %v5497_v56  ;;  %v1177_v61 = vmul.f32 %v3654_v47, %v1144_v37  ;;  %v1677_v17 = vadd.f32 %v1645_v31, %v1580_v4  ;;  %v1742_v13 = vmul.f32 %v4486_v42, %v1709_v57  ;;  %v1807_v47 = vld [vmem:[#allocation2 + $0x2f] sm:$0xff]  ;;  %v4527_v38 = vperm.slane %v1545_v39, 1 }
  0xc4   : > { %2559 = vst.msk [vmem:[#allocation2] sm:$0xff] %vm393_vm1, %v5497_v56  ;;  %v1678_v29 = vadd.f32 %v1646_v19, %v1581_v33  ;;  %v1743_v10 = vmul.f32 %v4486_v42, %v1710_v20  ;;  %v1210_v36 = vadd.f32 %v1178_v11, %v1113_v44  ;;  %v1274_v43 = vmul.f32 %v3667_v54, %v1241_v50  ;;  %v2001_v45 = vld [vmem:[#allocation2 + $0x31] sm:$0xff]  ;;  %v2000_v14 = vld [vmem:[#allocation2 + $0x29] sm:$0xff] }
  0xc5   : > { %2705 = vmatpush.msra.mxu3 %v5527_v5  ;;  %2577 = vst.msk [vmem:[#allocation2 + $0x18] sm:$0xff] %vm393_vm1, %v5497_v56  ;;  %v1209_v41 = vadd.f32 %v1177_v61, %v1112_v8  ;;  %v1275_v49 = vmul.f32 %v3667_v54, %v1242_v52  ;;  %v1774_v62 = vadd.f32 %v1742_v13, %v1677_v17  ;;  %v4529_v24 = vperm.slane %v1545_v39, 2  ;;  %v1904_v26 = vld [vmem:[#allocation2 + $0x30] sm:$0xff] }
  0xc6   : > { %2552 = vst.msk [vmem:[#allocation2 + $0x8] sm:$0xff] %vm393_vm1, %v5497_v56  ;;  %v1839_v15 = vmul.f32 %v4507_v22, %v1806_v51  ;;  %v1775_v25 = vadd.f32 %v1743_v10, %v1678_v29  ;;  %v1840_v54 = vmul.f32 %v4507_v22, %v1807_v47  ;;  %v4531_v3 = vperm.slane %v1546_v58, 0 }
  0xc7   : > { %2553 = vst.msk [vmem:[#allocation2 + $0x10] sm:$0xff] %vm393_vm1, %v5497_v56  ;;  %v1306_v63 = vadd.f32 %v1274_v43, %v1209_v41  ;;  %v1307_v55 = vadd.f32 %v1275_v49, %v1210_v36  ;;  %v1936_v6 = vmul.f32 %v4527_v38, %v1903_v2  ;;  %v1937_v60 = vmul.f32 %v4527_v38, %v1904_v26 }
  0xc8   : > { %2560 = vst.msk [vmem:[#allocation2 + $0x20] sm:$0xff] %vm393_vm1, %v5497_v56  ;;  %v1871_v12 = vadd.f32 %v1839_v15, %v1774_v62  ;;  %v1872_v46 = vadd.f32 %v1840_v54, %v1775_v25  ;;  %v4546_v9 = vperm.slane %v1546_v58, 2  ;;  %v2034_v31 = vmul.f32 %v4529_v24, %v2001_v45 }
  0xc9   : > { %2578 = vst.msk [vmem:[#allocation2 + $0x38] sm:$0xff] %vm393_vm1, %v5497_v56  ;;  %v1328_v1 = vpack.c.bf16 %v1307_v55, %v1306_v63  ;;  %v1583_v5 = vmul.f32 %v1807_v47, %v4477_v53  ;;  %v1582_v61 = vmul.f32 %v1806_v51, %v4477_v53  ;;  %v1744_v52 = vmul.f32 %v2000_v14, %v4486_v42 }
  0xca   : > { %v1968_v27 = vadd.f32 %v1936_v6, %v1871_v12  ;;  %v1969_v48 = vadd.f32 %v1937_v60, %v1872_v46  ;;  %v1745_v36 = vmul.f32 %v2001_v45, %v4486_v42 }
  0xcc   : > { %v2066_v8 = vadd.f32 %v2034_v31, %v1969_v48 }
  0xcf   : > { %v1405_v32 = vpop.f32.mrf.mxu0 }
  0xd0   : > { %v1406_v16 = vadd.f32 %v4389_v7, %v1405_v32  ;;  %v4544_v32 = vperm.slane %v1546_v58, 1 }
  0xd2   : > { %v1482_v34 = vmax.f32 %v1406_v16, 0.0  ;;  %3421 = vmatmul.msk.bf16.gmra.mxu0 %vm440_vm2, %v1327_v59  ;;  %v2033_v59 = vmul.f32 %v4529_v24, %v2000_v14  ;;  %v1648_v16 = vmul.f32 %v1904_v26, %v4479_v21 }
  0xd4   : > { %1514 = vst.msk [vmem:[#allocation2 + $0x48] sm:$0xff] %vm393_vm1, %v1482_v34  ;;  %v2065_v37 = vadd.f32 %v2033_v59, %v1968_v27  ;;  %v1647_v34 = vmul.f32 %v1903_v2, %v4479_v21  ;;  %v1680_v10 = vadd.f32 %v1648_v16, %v1583_v5 }
  0xd6   : > { %v1679_v41 = vadd.f32 %v1647_v34, %v1582_v61 }
  0xd7   : > { %v1407_v28 = vpop.f32.mrf.mxu0 }
  0xd8   : > { %v1408_v35 = vadd.f32 %v4389_v7, %v1407_v28 }
  0xda   : > { %v1483_v0 = vmax.f32 %v1408_v35, 0.0  ;;  %v1776_v35 = vadd.f32 %v1744_v52, %v1679_v41 }
  0xdb   : > { %v4534_v23 = vld [vmem:[#allocation2 + $0x47] sm:$0xff] }
  0xdc   : > { %1515 = vst.msk [vmem:[#allocation2 + $0x50] sm:$0xff] %vm393_vm1, %v1483_v0  ;;  %v2130_v30 = vmul.f32 %v4531_v3, %v4534_v23  ;;  %v2194_v20 = vld [vmem:[#allocation2 + $0x48] sm:$0xff]  ;;  %v1841_v43 = vmul.f32 %v4534_v23, %v4507_v22  ;;  %v1777_v0 = vadd.f32 %v1745_v36, %v1680_v10 }
  0xdd   : > { %2561 = vst.msk [vmem:[#allocation2 + $0x40] sm:$0xff] %vm393_vm1, %v5497_v56  ;;  %v2227_v50 = vmul.f32 %v4544_v32, %v2194_v20  ;;  %v1938_v14 = vmul.f32 %v2194_v20, %v4527_v38  ;;  %v1649_v61 = vmul.f32 %v2194_v20, %v4479_v21 }
  0xde   : > { %v2162_v33 = vadd.f32 %v2130_v30, %v2065_v37  ;;  %v1873_v63 = vadd.f32 %v1841_v43, %v1776_v35 }
  0xdf   : > { %v1410_v40 = vpop.f32.mrf.mxu0 }
  0xe0   : > { %v1411_v18 = vadd.f32 %v4389_v7, %v1410_v40  ;;  %v2259_v47 = vadd.f32 %v2227_v50, %v2162_v33  ;;  %v1970_v6 = vadd.f32 %v1938_v14, %v1873_v63  ;;  %v1584_v33 = vmul.f32 %v4534_v23, %v4477_v53 }
  0xe2   : > { %v1484_v4 = vmax.f32 %v1411_v18, 0.0  ;;  %3422 = vmatmul.msk.bf16.gmra.mxu0 %vm440_vm2, %v1328_v1 }
  0xe3   : > { %v2098_v39 = vld [vmem:[#allocation2 + $0x4f] sm:$0xff] }
  0xe4   : > { %v2195_v19 = vld [vmem:[#allocation2 + $0x50] sm:$0xff]  ;;  %1516 = vst.msk [vmem:[#allocation2 + $0x68] sm:$0xff] %vm393_vm1, %v1484_v4  ;;  %v2131_v44 = vmul.f32 %v4531_v3, %v2098_v39  ;;  %v1842_v15 = vmul.f32 %v2098_v39, %v4507_v22  ;;  %v1585_v48 = vmul.f32 %v2098_v39, %v4477_v53 }
  0xe5   : > { %v2291_v57 = vld [vmem:[#allocation2 + $0x49] sm:$0xff]  ;;  %v4556_v11 = vld [vmem:[#allocation2 + $0x51] sm:$0xff]  ;;  %v2228_v13 = vmul.f32 %v4544_v32, %v2195_v19  ;;  %v1939_v26 = vmul.f32 %v2195_v19, %v4527_v38  ;;  %v1650_v37 = vmul.f32 %v2195_v19, %v4479_v21 }
  0xe6   : > { %2579 = vst.msk [vmem:[#allocation2 + $0x58] sm:$0xff] %vm393_vm1, %v5497_v56  ;;  %v2163_v17 = vadd.f32 %v2131_v44, %v2066_v8  ;;  %v2324_v29 = vmul.f32 %v4546_v9, %v2291_v57  ;;  %v2325_v62 = vmul.f32 %v4546_v9, %v4556_v11  ;;  %v1874_v55 = vadd.f32 %v1842_v15, %v1777_v0 }
  0xe7   : > { %v1412_v51 = vpop.f32.mrf.mxu0  ;;  %v2035_v12 = vmul.f32 %v2291_v57, %v4529_v24  ;;  %v2036_v30 = vmul.f32 %v4556_v11, %v4529_v24  ;;  %v1746_v19 = vmul.f32 %v2291_v57, %v4486_v42  ;;  %v1682_v52 = vadd.f32 %v1650_v37, %v1585_v48 }
  0xe8   : > { %v1413_v49 = vadd.f32 %v4389_v7, %v1412_v51  ;;  %v2260_v28 = vadd.f32 %v2228_v13, %v2163_v17  ;;  %v2356_v25 = vadd.f32 %v2324_v29, %v2259_v47  ;;  %v1971_v60 = vadd.f32 %v1939_v26, %v1874_v55 }
  0xe9   : > { %v2067_v40 = vadd.f32 %v2035_v12, %v1970_v6  ;;  %v1681_v29 = vadd.f32 %v1649_v61, %v1584_v33  ;;  %v1747_v10 = vmul.f32 %v4556_v11, %v4486_v42 }
  0xea   : > { %v1485_v58 = vmax.f32 %v1413_v49, 0.0  ;;  %v2357_v54 = vadd.f32 %v2325_v62, %v2260_v28  ;;  %v2068_v34 = vadd.f32 %v2036_v30, %v1971_v60 }
  0xeb   : > { %v4572_v2 = vld [vmem:[#allocation2 + $0x67] sm:$0xff]  ;;  %v1778_v43 = vadd.f32 %v1746_v19, %v1681_v29  ;;  %v1779_v15 = vadd.f32 %v1747_v10, %v1682_v52 }
  0xec   : > { %1517 = vst.msk [vmem:[#allocation2 + $0x70] sm:$0xff] %vm393_vm1, %v1485_v58  ;;  %v2388_v45 = vpack.c.bf16 %v2357_v54, %v2356_v25  ;;  %v2132_v59 = vmul.f32 %v4531_v3, %v4572_v2  ;;  %v4585_v18 = vld [vmem:[#allocation2 + $0x68] sm:$0xff]  ;;  %v1843_v51 = vmul.f32 %v4572_v2, %v4507_v22 }
  0xed   : > { %2562 = vst.msk [vmem:[#allocation2 + $0x60] sm:$0xff] %vm393_vm1, %v5497_v56  ;;  %v2229_v39 = vmul.f32 %v4544_v32, %v4585_v18  ;;  %v1940_v54 = vmul.f32 %v4585_v18, %v4527_v38 }
  0xee   : > { %3428 = vmatmul.msk.bf16.vlgmr.msra.gmra.mxu1 %vm393_vm1, %v2388_v45  ;;  %v2164_v31 = vadd.f32 %v2132_v59, %v2067_v40  ;;  %v1875_v35 = vadd.f32 %v1843_v51, %v1778_v43 }
  0xef   : > { %v1415_v46 = vpop.f32.mrf.mxu0 }
  0xf0   : > { %v1416_v1 = vadd.f32 %v4389_v7, %v1415_v46  ;;  %v2261_v13 = vadd.f32 %v2229_v39, %v2164_v31  ;;  %v1972_v55 = vadd.f32 %v1940_v54, %v1875_v35 }
  0xf2   : > { %v1486_v27 = vmax.f32 %v1416_v1, 0.0 }
  0xf3   : > { %v2100_v4 = vld [vmem:[#allocation2 + $0x6f] sm:$0xff] }
  0xf4   : > { %v2197_v5 = vld [vmem:[#allocation2 + $0x70] sm:$0xff]  ;;  %1518 = vst.msk [vmem:[#allocation2 + $0x88] sm:$0xff] %vm393_vm1, %v1486_v27  ;;  %v2133_v8 = vmul.f32 %v4531_v3, %v2100_v4  ;;  %v1844_v36 = vmul.f32 %v2100_v4, %v4507_v22  ;;  %v1587_v27 = vmul.f32 %v2100_v4, %v4477_v53 }
  0xf5   : > { %v4589_v16 = vld [vmem:[#allocation2 + $0x69] sm:$0xff]  ;;  %v4596_v44 = vld [vmem:[#allocation2 + $0x71] sm:$0xff]  ;;  %v2230_v23 = vmul.f32 %v4544_v32, %v2197_v5  ;;  %v1941_v63 = vmul.f32 %v2197_v5, %v4527_v38  ;;  %v1652_v30 = vmul.f32 %v2197_v5, %v4479_v21 }
  0xf6   : > { %2580 = vst.msk [vmem:[#allocation2 + $0x78] sm:$0xff] %vm393_vm1, %v5497_v56  ;;  %v2165_v50 = vadd.f32 %v2133_v8, %v2068_v34  ;;  %v2326_v20 = vmul.f32 %v4546_v9, %v4589_v16  ;;  %v2327_v41 = vmul.f32 %v4546_v9, %v4596_v44  ;;  %v1876_v58 = vadd.f32 %v1844_v36, %v1779_v15 }
  0xf7   : > { %v1417_v17 = vpop.f32.mrf.mxu0  ;;  %v2037_v0 = vmul.f32 %v4589_v16, %v4529_v24  ;;  %v2038_v60 = vmul.f32 %v4596_v44, %v4529_v24  ;;  %v1586_v34 = vmul.f32 %v4572_v2, %v4477_v53  ;;  %v1651_v8 = vmul.f32 %v4585_v18, %v4479_v21 }
  0xf8   : > { %v1418_v57 = vadd.f32 %v4389_v7, %v1417_v17  ;;  %v2262_v47 = vadd.f32 %v2230_v23, %v2165_v50  ;;  %v2358_v28 = vadd.f32 %v2326_v20, %v2261_v13  ;;  %v1973_v26 = vadd.f32 %v1941_v63, %v1876_v58 }
  0xf9   : > { %v2069_v6 = vadd.f32 %v2037_v0, %v1972_v55  ;;  %v1748_v50 = vmul.f32 %v4589_v16, %v4486_v42  ;;  %v1684_v20 = vadd.f32 %v1652_v30, %v1587_v27  ;;  %v1683_v13 = vadd.f32 %v1651_v8, %v1586_v34 }
  0xfa   : > { %v1487_v49 = vmax.f32 %v1418_v57, 0.0  ;;  %v2359_v62 = vadd.f32 %v2327_v41, %v2262_v47  ;;  %v2070_v39 = vadd.f32 %v2038_v60, %v1973_v26  ;;  %v1749_v29 = vmul.f32 %v4596_v44, %v4486_v42 }
  0xfb   : > { %v4615_v25 = vld [vmem:[#allocation2 + $0x87] sm:$0xff]  ;;  %v1780_v36 = vadd.f32 %v1748_v50, %v1683_v13 }
  0xfc   : > { %1519 = vst.msk [vmem:[#allocation2 + $0x90] sm:$0xff] %vm393_vm1, %v1487_v49  ;;  %v2389_v11 = vpack.c.bf16 %v2359_v62, %v2358_v28  ;;  %v2134_v14 = vmul.f32 %v4531_v3, %v4615_v25  ;;  %v4631_v40 = vld [vmem:[#allocation2 + $0x88] sm:$0xff]  ;;  %v1845_v10 = vmul.f32 %v4615_v25, %v4507_v22  ;;  %v1781_v15 = vadd.f32 %v1749_v29, %v1684_v20 }
  0xfd   : > { %2563 = vst.msk [vmem:[#allocation2 + $0x80] sm:$0xff] %vm393_vm1, %v5497_v56  ;;  %v1455_v46 = vpop.f32.mrf.mxu3  ;;  %v2231_v4 = vmul.f32 %v4544_v32, %v4631_v40  ;;  %v1942_v0 = vmul.f32 %v4631_v40, %v4527_v38  ;;  %v1653_v50 = vmul.f32 %v4631_v40, %v4479_v21 }
  0xfe   : > { %3429 = vmatmul.msk.bf16.gmra.mxu1 %vm393_vm1, %v2389_v11  ;;  %v1456_v59 = vadd.f32 %v4389_v7, %v1455_v46  ;;  %v2166_v37 = vadd.f32 %v2134_v14, %v2069_v6  ;;  %v1877_v44 = vadd.f32 %v1845_v10, %v1780_v36 }
  0xff   : > { %v1420_v45 = vpop.f32.mrf.mxu0 }
 0x100   : > { %v1421_v12 = vadd.f32 %v4389_v7, %v1420_v45  ;;  %v1502_v61 = vmax.f32 %v1456_v59, 0.0  ;;  %v2263_v17 = vadd.f32 %v2231_v4, %v2166_v37  ;;  %v1974_v14 = vadd.f32 %v1942_v0, %v1877_v44 }
 0x101   : > { %v1588_v4 = vmul.f32 %v4615_v25, %v4477_v53 }
 0x102   : > { %v1488_v1 = vmax.f32 %v1421_v12, 0.0  ;;  %1534 = vst.msk [vmem:[#allocation2 + $0x188] sm:$0xff] %vm393_vm1, %v1502_v61 }
 0x103   : > { %v2102_v48 = vld [vmem:[#allocation2 + $0x8f] sm:$0xff]  ;;  %v1685_v10 = vadd.f32 %v1653_v50, %v1588_v4 }
 0x104   : > { %v2199_v31 = vld [vmem:[#allocation2 + $0x90] sm:$0xff]  ;;  %1520 = vst.msk [vmem:[#allocation2 + $0xa8] sm:$0xff] %vm393_vm1, %v1488_v1  ;;  %v2135_v19 = vmul.f32 %v4531_v3, %v2102_v48  ;;  %v1846_v47 = vmul.f32 %v2102_v48, %v4507_v22  ;;  %v1589_v1 = vmul.f32 %v2102_v48, %v4477_v53 }
 0x105   : > { %v4635_v33 = vld [vmem:[#allocation2 + $0x89] sm:$0xff]  ;;  %v4645_v5 = vld [vmem:[#allocation2 + $0x91] sm:$0xff]  ;;  %v2232_v2 = vmul.f32 %v4544_v32, %v2199_v31  ;;  %v1457_v41 = vpop.f32.mrf.mxu3  ;;  %v1943_v45 = vmul.f32 %v2199_v31, %v4527_v38  ;;  %v1654_v60 = vmul.f32 %v2199_v31, %v4479_v21 }
 0x106   : > { %v2167_v23 = vadd.f32 %v2135_v19, %v2070_v39  ;;  %v2328_v18 = vmul.f32 %v4546_v9, %v4635_v33  ;;  %2581 = vst.msk [vmem:[#allocation2 + $0x98] sm:$0xff] %vm393_vm1, %v5497_v56  ;;  %v2329_v57 = vmul.f32 %v4546_v9, %v4645_v5  ;;  %v1458_v43 = vadd.f32 %v4389_v7, %v1457_v41 }
 0x107   : > { %v1422_v52 = vpop.f32.mrf.mxu0  ;;  %v1878_v58 = vadd.f32 %v1846_v47, %v1781_v15  ;;  %v2039_v63 = vmul.f32 %v4635_v33, %v4529_v24  ;;  %v2040_v30 = vmul.f32 %v4645_v5, %v4529_v24  ;;  %v1686_v20 = vadd.f32 %v1654_v60, %v1589_v1 }
 0x108   : > { %v1423_v16 = vadd.f32 %v4389_v7, %v1422_v52  ;;  %v2264_v51 = vadd.f32 %v2232_v2, %v2167_v23  ;;  %v2360_v28 = vadd.f32 %v2328_v18, %v2263_v17  ;;  %v1503_v35 = vmax.f32 %v1458_v43, 0.0 }
 0x109   : > { %v1975_v46 = vadd.f32 %v1943_v45, %v1878_v58  ;;  %v2071_v6 = vadd.f32 %v2039_v63, %v1974_v14  ;;  %v1750_v52 = vmul.f32 %v4635_v33, %v4486_v42 }
 0x10a   : > { %v1489_v49 = vmax.f32 %v1423_v16, 0.0  ;;  %v2361_v62 = vadd.f32 %v2329_v57, %v2264_v51  ;;  %1535 = vst.msk [vmem:[#allocation2 + $0x190] sm:$0xff] %vm393_vm1, %v1503_v35  ;;  %v1751_v16 = vmul.f32 %v4645_v5, %v4486_v42 }
 0x10b   : > { %v4665_v54 = vld [vmem:[#allocation2 + $0xa7] sm:$0xff]  ;;  %v2072_v48 = vadd.f32 %v2040_v30, %v1975_v46  ;;  %v1782_v36 = vadd.f32 %v1750_v52, %v1685_v10 }
 0x10c   : > { %1521 = vst.msk [vmem:[#allocation2 + $0xb0] sm:$0xff] %vm393_vm1, %v1489_v49  ;;  %v2390_v11 = vpack.c.bf16 %v2361_v62, %v2360_v28  ;;  %v2136_v12 = vmul.f32 %v4531_v3, %v4665_v54  ;;  %v2200_v37 = vld [vmem:[#allocation2 + $0xa8] sm:$0xff]  ;;  %v1847_v51 = vmul.f32 %v4665_v54, %v4507_v22  ;;  %v1783_v43 = vadd.f32 %v1751_v16, %v1686_v20 }
 0x10d   : > { %2564 = vst.msk [vmem:[#allocation2 + $0xa0] sm:$0xff] %vm393_vm1, %v5497_v56  ;;  %v1460_v59 = vpop.f32.mrf.mxu3  ;;  %v2233_v18 = vmul.f32 %v4544_v32, %v2200_v37  ;;  %v1944_v63 = vmul.f32 %v2200_v37, %v4527_v38  ;;  %v1655_v60 = vmul.f32 %v2200_v37, %v4479_v21 }
 0x10e   : > { %3430 = vmatmul.msk.bf16.gmra.mxu1 %vm393_vm1, %v2390_v11  ;;  %v1461_v61 = vadd.f32 %v4389_v7, %v1460_v59  ;;  %v2168_v8 = vadd.f32 %v2136_v12, %v2071_v6  ;;  %v1879_v35 = vadd.f32 %v1847_v51, %v1782_v36  ;;  %v1590_v59 = vmul.f32 %v4665_v54, %v4477_v53 }
 0x10f   : > { %v1425_v55 = vpop.f32.mrf.mxu0 }
 0x110   : > { %v1426_v26 = vadd.f32 %v4389_v7, %v1425_v55  ;;  %v1504_v2 = vmax.f32 %v1461_v61, 0.0  ;;  %v2265_v29 = vadd.f32 %v2233_v18, %v2168_v8 }
 0x112   : > { %v1490_v27 = vmax.f32 %v1426_v26, 0.0  ;;  %1536 = vst.msk [vmem:[#allocation2 + $0x1a8] sm:$0xff] %vm393_vm1, %v1504_v2  ;;  %v1976_v26 = vadd.f32 %v1944_v63, %v1879_v35 }
 0x113   : > { %v2104_v34 = vld [vmem:[#allocation2 + $0xaf] sm:$0xff] }
 0x114   : > { %v2201_v39 = vld [vmem:[#allocation2 + $0xb0] sm:$0xff]  ;;  %1522 = vst.msk [vmem:[#allocation2 + $0xc8] sm:$0xff] %vm393_vm1, %v1490_v27  ;;  %v2137_v31 = vmul.f32 %v4531_v3, %v2104_v34  ;;  %v1848_v41 = vmul.f32 %v2104_v34, %v4507_v22  ;;  %v1591_v1 = vmul.f32 %v2104_v34, %v4477_v53 }
 0x115   : > { %v2297_v19 = vld [vmem:[#allocation2 + $0xa9] sm:$0xff]  ;;  %v4690_v23 = vld [vmem:[#allocation2 + $0xb1] sm:$0xff]  ;;  %v2234_v40 = vmul.f32 %v4544_v32, %v2201_v39  ;;  %v1462_v49 = vpop.f32.mrf.mxu3  ;;  %v1945_v45 = vmul.f32 %v2201_v39, %v4527_v38  ;;  %v1656_v27 = vmul.f32 %v2201_v39, %v4479_v21 }
 0x116   : > { %2582 = vst.msk [vmem:[#allocation2 + $0xb8] sm:$0xff] %vm393_vm1, %v5497_v56  ;;  %v2169_v25 = vadd.f32 %v2137_v31, %v2072_v48  ;;  %v2330_v17 = vmul.f32 %v4546_v9, %v2297_v19  ;;  %v2331_v47 = vmul.f32 %v4546_v9, %v4690_v23  ;;  %v1463_v44 = vadd.f32 %v4389_v7, %v1462_v49 }
 0x117   : > { %v1427_v13 = vpop.f32.mrf.mxu0  ;;  %v1880_v11 = vadd.f32 %v1848_v41, %v1783_v43  ;;  %v2041_v55 = vmul.f32 %v2297_v19, %v4529_v24  ;;  %v2042_v61 = vmul.f32 %v4690_v23, %v4529_v24  ;;  %v1752_v18 = vmul.f32 %v2297_v19, %v4486_v42 }
 0x118   : > { %v1428_v33 = vadd.f32 %v4389_v7, %v1427_v13  ;;  %v2266_v57 = vadd.f32 %v2234_v40, %v2169_v25  ;;  %v2362_v62 = vadd.f32 %v2330_v17, %v2265_v29  ;;  %v1505_v0 = vmax.f32 %v1463_v44, 0.0 }
 0x119   : > { %v1977_v46 = vadd.f32 %v1945_v45, %v1880_v11  ;;  %v2073_v8 = vadd.f32 %v2041_v55, %v1976_v26  ;;  %v1687_v25 = vadd.f32 %v1655_v60, %v1590_v59  ;;  %v1688_v40 = vadd.f32 %v1656_v27, %v1591_v1 }
 0x11a   : > { %v1491_v28 = vmax.f32 %v1428_v33, 0.0  ;;  %v2363_v15 = vadd.f32 %v2331_v47, %v2266_v57  ;;  %1537 = vst.msk [vmem:[#allocation2 + $0x1b0] sm:$0xff] %vm393_vm1, %v1505_v0  ;;  %v1753_v51 = vmul.f32 %v4690_v23, %v4486_v42 }
 0x11b   : > { %v4710_v58 = vld [vmem:[#allocation2 + $0xc7] sm:$0xff]  ;;  %v2074_v54 = vadd.f32 %v2042_v61, %v1977_v46  ;;  %v1784_v33 = vadd.f32 %v1752_v18, %v1687_v25 }
 0x11c   : > { %1523 = vst.msk [vmem:[#allocation2 + $0xd0] sm:$0xff] %vm393_vm1, %v1491_v28  ;;  %v2391_v5 = vpack.c.bf16 %v2363_v15, %v2362_v62  ;;  %v2138_v6 = vmul.f32 %v4531_v3, %v4710_v58  ;;  %v2202_v4 = vld [vmem:[#allocation2 + $0xc8] sm:$0xff]  ;;  %v1849_v17 = vmul.f32 %v4710_v58, %v4507_v22  ;;  %v1785_v49 = vadd.f32 %v1753_v51, %v1688_v40  ;;  %v4775_v51 = vld [vmem:[%s5465_s3] ss:$0 sm:$0xff] }
 0x11d   : > { %2565 = vst.msk [vmem:[#allocation2 + $0xc0] sm:$0xff] %vm393_vm1, %v5497_v56  ;;  %v1465_v2 = vpop.f32.mrf.mxu3  ;;  %v2235_v52 = vmul.f32 %v4544_v32, %v2202_v4  ;;  %v1657_v26 = vmul.f32 %v2202_v4, %v4479_v21 }
 0x11e   : > { %3431 = vmatmul.msk.bf16.gmra.mxu1 %vm393_vm1, %v2391_v5  ;;  %v2170_v37 = vadd.f32 %v2138_v6, %v2073_v8  ;;  %v1466_v39 = vadd.f32 %v4389_v7, %v1465_v2  ;;  %v1881_v28 = vadd.f32 %v1849_v17, %v1784_v33  ;;  %v1946_v5 = vmul.f32 %v2202_v4, %v4527_v38 }
 0x11f   : > { %v1430_v14 = vpop.f32.mrf.mxu0 }
 0x120   : > { %v1431_v12 = vadd.f32 %v4389_v7, %v1430_v14  ;;  %v1506_v10 = vmax.f32 %v1466_v39, 0.0  ;;  %v2267_v41 = vadd.f32 %v2235_v52, %v2170_v37  ;;  %v1978_v6 = vadd.f32 %v1946_v5, %v1881_v28  ;;  %v4784_v28 = vld [vmem:[#allocation2 + $0x187] sm:$0xff] }
 0x121   : > { %2571 = vst.msk [vmem:[#allocation2 + $0x180] sm:$0xff] %vm393_vm1, %v5497_v56 }
 0x122   : > { %v1492_v30 = vmax.f32 %v1431_v12, 0.0  ;;  %1538 = vst.msk [vmem:[#allocation2 + $0x1c8] sm:$0xff] %vm393_vm1, %v1506_v10  ;;  %v1592_v12 = vmul.f32 %v4710_v58, %v4477_v53 }
 0x123   : > { %v2106_v50 = vld [vmem:[#allocation2 + $0xcf] sm:$0xff] }
 0x124   : > { %v2203_v48 = vld [vmem:[#allocation2 + $0xd0] sm:$0xff]  ;;  %1524 = vst.msk [vmem:[#allocation2 + $0xe8] sm:$0xff] %vm393_vm1, %v1492_v30  ;;  %v2139_v34 = vmul.f32 %v4531_v3, %v2106_v50  ;;  %v1850_v57 = vmul.f32 %v2106_v50, %v4507_v22  ;;  %v1593_v63 = vmul.f32 %v2106_v50, %v4477_v53  ;;  %v1689_v50 = vadd.f32 %v1657_v26, %v1592_v12 }
 0x125   : > { %v2299_v31 = vld [vmem:[#allocation2 + $0xc9] sm:$0xff]  ;;  %v2300_v20 = vld [vmem:[#allocation2 + $0xd1] sm:$0xff]  ;;  %v2236_v13 = vmul.f32 %v4544_v32, %v2203_v48  ;;  %v1467_v0 = vpop.f32.mrf.mxu3  ;;  %v1658_v45 = vmul.f32 %v2203_v48, %v4479_v21  ;;  %v1947_v46 = vmul.f32 %v2203_v48, %v4527_v38 }
 0x126   : > { %2583 = vst.msk [vmem:[#allocation2 + $0xd8] sm:$0xff] %vm393_vm1, %v5497_v56  ;;  %v2171_v19 = vadd.f32 %v2139_v34, %v2074_v54  ;;  %v2332_v29 = vmul.f32 %v4546_v9, %v2299_v31  ;;  %v2333_v43 = vmul.f32 %v4546_v9, %v2300_v20  ;;  %v1882_v35 = vadd.f32 %v1850_v57, %v1785_v49 }
 0x127   : > { %v1432_v16 = vpop.f32.mrf.mxu0  ;;  %v2043_v23 = vmul.f32 %v2299_v31, %v4529_v24  ;;  %v1468_v14 = vadd.f32 %v4389_v7, %v1467_v0  ;;  %v1690_v61 = vadd.f32 %v1658_v45, %v1593_v63  ;;  %v1754_v8 = vmul.f32 %v2299_v31, %v4486_v42 }
 0x128   : > { %v1433_v47 = vadd.f32 %v4389_v7, %v1432_v16  ;;  %v2268_v36 = vadd.f32 %v2236_v13, %v2171_v19  ;;  %v2364_v15 = vadd.f32 %v2332_v29, %v2267_v41  ;;  %v1979_v27 = vadd.f32 %v1947_v46, %v1882_v35 }
 0x129   : > { %v1507_v1 = vmax.f32 %v1468_v14, 0.0  ;;  %v2075_v30 = vadd.f32 %v2043_v23, %v1978_v6  ;;  %v2044_v48 = vmul.f32 %v2300_v20, %v4529_v24  ;;  %v1755_v18 = vmul.f32 %v2300_v20, %v4486_v42  ;;  %v4795_v14 = vld [vmem:[#allocation2 + $0x191] sm:$0xff] }
 0x12a   : > { %v1493_v62 = vmax.f32 %v1433_v47, 0.0  ;;  %v2365_v44 = vadd.f32 %v2333_v43, %v2268_v36  ;;  %v1786_v40 = vadd.f32 %v1754_v8, %v1689_v50  ;;  %5528 = vst [vmem:[#allocation6_spill] sm:$0xff] %v4795_v14 }
 0x12b   : > { %v2107_v11 = vld [vmem:[#allocation2 + $0xe7] sm:$0xff]  ;;  %1539 = vst.msk [vmem:[#allocation2 + $0x1d0] sm:$0xff] %vm393_vm1, %v1507_v1  ;;  %v2076_v37 = vadd.f32 %v2044_v48, %v1979_v27 }
 0x12c   : > { %1525 = vst.msk [vmem:[#allocation2 + $0xf0] sm:$0xff] %vm393_vm1, %v1493_v62  ;;  %v2392_v55 = vpack.c.bf16 %v2365_v44, %v2364_v15  ;;  %v2140_v59 = vmul.f32 %v4531_v3, %v2107_v11  ;;  %v2204_v4 = vld [vmem:[#allocation2 + $0xe8] sm:$0xff]  ;;  %v1851_v54 = vmul.f32 %v2107_v11, %v4507_v22  ;;  %v1594_v10 = vmul.f32 %v2107_v11, %v4477_v53 }
 0x12d   : > { %2566 = vst.msk [vmem:[#allocation2 + $0xe0] sm:$0xff] %vm393_vm1, %v5497_v56  ;;  %v2237_v25 = vmul.f32 %v4544_v32, %v2204_v4  ;;  %v1948_v20 = vmul.f32 %v2204_v4, %v4527_v38  ;;  %v1659_v47 = vmul.f32 %v2204_v4, %v4479_v21 }
 0x12e   : > { %3432 = vmatmul.msk.bf16.gmra.mxu1 %vm393_vm1, %v2392_v55  ;;  %v2172_v2 = vadd.f32 %v2140_v59, %v2075_v30  ;;  %v1883_v57 = vadd.f32 %v1851_v54, %v1786_v40  ;;  %v4797_v59 = vld [vmem:[#allocation2 + $0x1a7] sm:$0xff]  ;;  %2589 = vst.msk [vmem:[#allocation2 + $0x198] sm:$0xff] %vm393_vm1, %v5497_v56  ;;  %v1829_v40 = vld [vmem:[#allocation2 + $0x18f] sm:$0xff] }
 0x12f   : > { %v1435_v60 = vpop.f32.mrf.mxu0  ;;  %v1691_v6 = vadd.f32 %v1659_v47, %v1594_v10  ;;  %2572 = vst.msk [vmem:[#allocation2 + $0x1a0] sm:$0xff] %vm393_vm1, %v5497_v56  ;;  %v4829_v10 = vld [vmem:[#allocation2 + $0x1b1] sm:$0xff] }
 0x130   : > { %v1436_v58 = vadd.f32 %v4389_v7, %v1435_v60  ;;  %v1787_v7 = vadd.f32 %v1755_v18, %v1690_v61  ;;  %v2269_v16 = vadd.f32 %v2237_v25, %v2172_v2  ;;  %v1980_v55 = vadd.f32 %v1948_v20, %v1883_v57  ;;  %5531 = vst [vmem:[#allocation22_spill] sm:$0xff] %v4829_v10 }
 0x131   : > { %v1470_v13 = vpop.f32.mrf.mxu3  ;;  %v4827_v20 = vmul.f32 %v4507_v22, %v1829_v40  ;;  %2590 = vst.msk [vmem:[#allocation2 + $0x1b8] sm:$0xff] %vm393_vm1, %v5497_v56 }
 0x132   : > { %v1494_v34 = vmax.f32 %v1436_v58, 0.0  ;;  %v1471_v33 = vadd.f32 %v4775_v51, %v1470_v13 }
 0x133   : > { %v2108_v39 = vld [vmem:[#allocation2 + $0xef] sm:$0xff] }
 0x134   : > { %v2205_v52 = vld [vmem:[#allocation2 + $0xf0] sm:$0xff]  ;;  %1526 = vst.msk [vmem:[#allocation2 + $0x108] sm:$0xff] %vm393_vm1, %v1494_v34  ;;  %v2141_v17 = vmul.f32 %v4531_v3, %v2108_v39  ;;  %v1852_v29 = vmul.f32 %v2108_v39, %v4507_v22  ;;  %v1508_v15 = vmax.f32 %v1471_v33, 0.0  ;;  %v1595_v5 = vmul.f32 %v2108_v39, %v4477_v53 }
 0x135   : > { %v2301_v31 = vld [vmem:[#allocation2 + $0xe9] sm:$0xff]  ;;  %v2302_v19 = vld [vmem:[#allocation2 + $0xf1] sm:$0xff]  ;;  %v2238_v36 = vmul.f32 %v4544_v32, %v2205_v52  ;;  %v1660_v35 = vmul.f32 %v2205_v52, %v4479_v21  ;;  %v1949_v45 = vmul.f32 %v2205_v52, %v4527_v38 }
 0x136   : > { %2584 = vst.msk [vmem:[#allocation2 + $0xf8] sm:$0xff] %vm393_vm1, %v5497_v56  ;;  %v2173_v41 = vadd.f32 %v2141_v17, %v2076_v37  ;;  %v2334_v43 = vmul.f32 %v4546_v9, %v2301_v31  ;;  %v2045_v49 = vmul.f32 %v2301_v31, %v4529_v24  ;;  %v1884_v44 = vadd.f32 %v1852_v29, %v1787_v7  ;;  %v4812_v37 = vld [vmem:[#allocation2 + $0x1c7] sm:$0xff] }
 0x137   : > { %v1437_v62 = vpop.f32.mrf.mxu0  ;;  %v2335_v0 = vmul.f32 %v4546_v9, %v2302_v19  ;;  %v1756_v63 = vmul.f32 %v2301_v31, %v4486_v42  ;;  %1540 = vst.msk [vmem:[#allocation2 + $0x1e8] sm:$0xff] %vm393_vm1, %v1508_v15  ;;  %v1692_v61 = vadd.f32 %v1660_v35, %v1595_v5  ;;  %v2046_v2 = vmul.f32 %v2302_v19, %v4529_v24  ;;  %v4816_v31 = vld [vmem:[#allocation2 + $0x1d1] sm:$0xff]  ;;  %v4818_v7 = vld [vmem:[#allocation2 + $0x189] sm:$0xff] }
 0x138   : > { %v1438_v23 = vadd.f32 %v4775_v51, %v1437_v62  ;;  %v2270_v11 = vadd.f32 %v2238_v36, %v2173_v41  ;;  %v2366_v26 = vadd.f32 %v2334_v43, %v2269_v16  ;;  %v1981_v1 = vadd.f32 %v1949_v45, %v1884_v44  ;;  %5529 = vst [vmem:[#allocation5_spill] sm:$0xff] %v4812_v37  ;;  %v1925_v41 = vld [vmem:[#allocation2 + $0x188] sm:$0xff]  ;;  %v1926_v36 = vld [vmem:[#allocation2 + $0x190] sm:$0xff] }
 0x139   : > { %v2077_v60 = vadd.f32 %v2045_v49, %v1980_v55  ;;  %v1472_v4 = vpop.f32.mrf.mxu3  ;;  %v1788_v50 = vadd.f32 %v1756_v63, %v1691_v6  ;;  %v1757_v54 = vmul.f32 %v2302_v19, %v4486_v42  ;;  %5530 = vst [vmem:[#allocation21_spill] sm:$0xff] %v4816_v31  ;;  %v4824_v29 = vmul.f32 %v4507_v22, %v4784_v28 }
 0x13a   : > { %v1495_v12 = vmax.f32 %v1438_v23, 0.0  ;;  %v2367_v46 = vadd.f32 %v2335_v0, %v2270_v11  ;;  %v1473_v18 = vadd.f32 %v4775_v51, %v1472_v4  ;;  %2573 = vst.msk [vmem:[#allocation2 + $0x1c0] sm:$0xff] %vm393_vm1, %v5497_v56  ;;  %v2078_v19 = vadd.f32 %v2046_v2, %v1981_v1 }
 0x13b   : > { %v2109_v27 = vld [vmem:[#allocation2 + $0x107] sm:$0xff]  ;;  %2591 = vst.msk [vmem:[#allocation2 + $0x1d8] sm:$0xff] %vm393_vm1, %v5497_v56  ;;  %v1789_v57 = vadd.f32 %v1757_v54, %v1692_v61  ;;  %v4840_v43 = vmul.f32 %v4527_v38, %v1925_v41  ;;  %v4843_v49 = vmul.f32 %v4527_v38, %v1926_v36  ;;  %v4847_v62 = vmul.f32 %v4529_v24, %v4818_v7 }
 0x13c   : > { %v2206_v30 = vld [vmem:[#allocation2 + $0x108] sm:$0xff]  ;;  %1527 = vst.msk [vmem:[#allocation2 + $0x110] sm:$0xff] %vm393_vm1, %v1495_v12  ;;  %v2393_v8 = vpack.c.bf16 %v2367_v46, %v2366_v26  ;;  %v2142_v58 = vmul.f32 %v4531_v3, %v2109_v27  ;;  %v1853_v48 = vmul.f32 %v2109_v27, %v4507_v22  ;;  %v1596_v34 = vmul.f32 %v2109_v27, %v4477_v53 }
 0x13d   : > { %2567 = vst.msk [vmem:[#allocation2 + $0x100] sm:$0xff] %vm393_vm1, %v5497_v56  ;;  %v1661_v25 = vmul.f32 %v2206_v30, %v4479_v21  ;;  %v1509_v13 = vmax.f32 %v1473_v18, 0.0  ;;  %v2239_v33 = vmul.f32 %v4544_v32, %v2206_v30  ;;  %v1950_v47 = vmul.f32 %v2206_v30, %v4527_v38 }
 0x13e   : > { %3433 = vmatmul.msk.bf16.gmra.mxu1 %vm393_vm1, %v2393_v8  ;;  %v2174_v39 = vadd.f32 %v2142_v58, %v2077_v60  ;;  %v1885_v52 = vadd.f32 %v1853_v48, %v1788_v50  ;;  %v4851_v15 = vmul.f32 %v4529_v24, %v4795_v14  ;;  %v4855_v45 = vmul.f32 %v4784_v28, %v4477_v53 }
 0x13f   : > { %v1440_v17 = vpop.f32.mrf.mxu0  ;;  %1541 = vst.msk [vmem:[#allocation2 + $0x1f0] sm:$0xff] %vm393_vm1, %v1509_v13  ;;  %v1693_v23 = vadd.f32 %v1661_v25, %v1596_v34  ;;  %v4858_v55 = vmul.f32 %v1829_v40, %v4477_v53  ;;  %v4861_v12 = vmul.f32 %v1925_v41, %v4479_v21  ;;  %v4864_v26 = vmul.f32 %v1926_v36, %v4479_v21 }
 0x140   : > { %v1441_v16 = vadd.f32 %v4775_v51, %v1440_v17  ;;  %5532 = vst [vmem:[#allocation23_spill] sm:$0xff] %v4851_v15  ;;  %v2271_v5 = vadd.f32 %v2239_v33, %v2174_v39  ;;  %v1982_v35 = vadd.f32 %v1950_v47, %v1885_v52  ;;  %v4874_v27 = vmul.f32 %v4531_v3, %v4784_v28  ;;  %v4903_v47 = vld [vmem:[#allocation2 + $0x1cf] sm:$0xff] }
 0x141   : > { %v4879_v30 = vmul.f32 %v4531_v3, %v1829_v40  ;;  %v4882_v61 = vmul.f32 %v4544_v32, %v1925_v41  ;;  %v4885_v8 = vmul.f32 %v4544_v32, %v1926_v36  ;;  %v4889_v58 = vmul.f32 %v4546_v9, %v4818_v7  ;;  %v1475_v48 = vpop.f32.mrf.mxu3  ;;  %5538 = vst [vmem:[#allocation29_spill] sm:$0xff] %v4903_v47 }
 0x142   : > { %v1496_v44 = vmax.f32 %v1441_v16, 0.0  ;;  %5533 = vst [vmem:[#allocation24_spill] sm:$0xff] %v4874_v27  ;;  %v1476_v54 = vadd.f32 %v4775_v51, %v1475_v48 }
 0x143   : > { %v2110_v11 = vld [vmem:[#allocation2 + $0x10f] sm:$0xff]  ;;  %5534 = vst [vmem:[#allocation25_spill] sm:$0xff] %v4879_v30 }
 0x144   : > { %v2207_v0 = vld [vmem:[#allocation2 + $0x110] sm:$0xff]  ;;  %1528 = vst.msk [vmem:[#allocation2 + $0x128] sm:$0xff] %vm393_vm1, %v1496_v44  ;;  %v2143_v46 = vmul.f32 %v4531_v3, %v2110_v11  ;;  %v1854_v60 = vmul.f32 %v2110_v11, %v4507_v22  ;;  %v1510_v13 = vmax.f32 %v1476_v54, 0.0  ;;  %v1597_v16 = vmul.f32 %v2110_v11, %v4477_v53 }
 0x145   : > { %v2303_v63 = vld [vmem:[#allocation2 + $0x109] sm:$0xff]  ;;  %v4868_v6 = vld [vmem:[#allocation2 + $0x111] sm:$0xff]  ;;  %5535 = vst [vmem:[#allocation26_spill] sm:$0xff] %v4882_v61  ;;  %v2240_v28 = vmul.f32 %v4544_v32, %v2207_v0  ;;  %v1951_v39 = vmul.f32 %v2207_v0, %v4527_v38  ;;  %v1662_v33 = vmul.f32 %v2207_v0, %v4479_v21 }
 0x146   : > { %v2336_v1 = vmul.f32 %v4546_v9, %v2303_v63  ;;  %2585 = vst.msk [vmem:[#allocation2 + $0x118] sm:$0xff] %vm393_vm1, %v5497_v56  ;;  %v2175_v4 = vadd.f32 %v2143_v46, %v2078_v19  ;;  %v2337_v50 = vmul.f32 %v4546_v9, %v4868_v6  ;;  %v2047_v2 = vmul.f32 %v2303_v63, %v4529_v24 }
 0x147   : > { %5536 = vst [vmem:[#allocation27_spill] sm:$0xff] %v4885_v8  ;;  %v1442_v18 = vpop.f32.mrf.mxu0  ;;  %v1886_v34 = vadd.f32 %v1854_v60, %v1789_v57  ;;  %v2048_v52 = vmul.f32 %v4868_v6, %v4529_v24  ;;  %v1758_v19 = vmul.f32 %v2303_v63, %v4486_v42  ;;  %v1608_v57 = vmul.f32 %v4477_v53, %v4812_v37  ;;  %v4909_v60 = vld [vmem:[#allocation2 + $0x1c8] sm:$0xff] }
 0x148   : > { %5537 = vst [vmem:[#allocation28_spill] sm:$0xff] %v4889_v58  ;;  %v1443_v25 = vadd.f32 %v4775_v51, %v1442_v18  ;;  %v2272_v40 = vadd.f32 %v2240_v28, %v2175_v4  ;;  %v2368_v17 = vadd.f32 %v2336_v1, %v2271_v5  ;;  %v2079_v44 = vadd.f32 %v2047_v2, %v1982_v35  ;;  %v4911_v5 = vld [vmem:[#allocation2 + $0x1d0] sm:$0xff] }
 0x149   : > { %v1609_v46 = vmul.f32 %v4477_v53, %v4903_v47  ;;  %5539 = vst [vmem:[#allocation30_spill] sm:$0xff] %v4909_v60  ;;  %v4913_v63 = vld [vmem:[#allocation2 + $0x1c9] sm:$0xff]  ;;  %v1983_v11 = vadd.f32 %v1951_v39, %v1886_v34  ;;  %v1673_v1 = vmul.f32 %v4479_v21, %v4909_v60  ;;  %v1674_v35 = vmul.f32 %v4479_v21, %v4911_v5 }
 0x14a   : > { %v1497_v41 = vmax.f32 %v1443_v25, 0.0  ;;  %v2369_v36 = vadd.f32 %v2337_v50, %v2272_v40  ;;  %5540 = vst [vmem:[#allocation31_spill] sm:$0xff] %v4911_v5  ;;  %v1770_v4 = vmul.f32 %v4486_v42, %v4913_v63  ;;  %v1790_v48 = vadd.f32 %v1758_v19, %v1693_v23  ;;  %v4933_v40 = vld [vmem:[#allocation2 + $0x1e7] sm:$0xff] }
 0x14b   : > { %5541 = vst [vmem:[#allocation32_spill] sm:$0xff] %v4913_v63  ;;  %v4916_v0 = vld [vmem:[#allocation2 + $0x127] sm:$0xff]  ;;  %v1694_v54 = vadd.f32 %v1662_v33, %v1597_v16  ;;  %v1705_v34 = vadd.f32 %v1673_v1, %v1608_v57  ;;  %v1706_v39 = vadd.f32 %v1674_v35, %v1609_v46  ;;  %v1771_v25 = vmul.f32 %v4486_v42, %v4816_v31 }
 0x14c   : > { %1542 = vst.msk [vmem:[#allocation2 + $0x208] sm:$0xff] %vm393_vm1, %v1510_v13  ;;  %v2394_v28 = vpack.c.bf16 %v2369_v36, %v2368_v17  ;;  %v2144_v50 = vmul.f32 %v4531_v3, %v4916_v0  ;;  %v1855_v2 = vmul.f32 %v4916_v0, %v4507_v22  ;;  %v4929_v18 = vld [vmem:[#allocation2 + $0x128] sm:$0xff]  ;;  %v1477_v17 = vpop.f32.mrf.mxu3  ;;  %v1867_v16 = vmul.f32 %v4507_v22, %v4933_v40 }
 0x14d   : > { %1529 = vst.msk [vmem:[#allocation2 + $0x130] sm:$0xff] %vm393_vm1, %v1497_v41  ;;  %v4935_v13 = vld [vmem:[#allocation2 + $0x1ef] sm:$0xff]  ;;  %v1478_v36 = vadd.f32 %v4775_v51, %v1477_v17  ;;  %v1802_v46 = vadd.f32 %v1770_v4, %v1705_v34  ;;  %v1803_v1 = vadd.f32 %v1771_v25, %v1706_v39  ;;  %v1952_v4 = vmul.f32 %v4929_v18, %v4527_v38 }
 0x14e   : > { %2568 = vst.msk [vmem:[#allocation2 + $0x120] sm:$0xff] %vm393_vm1, %v5497_v56  ;;  %3434 = vmatmul.msk.bf16.gmra.mxu1 %vm393_vm1, %v2394_v28  ;;  %v2176_v23 = vadd.f32 %v2144_v50, %v2079_v44  ;;  %v1887_v19 = vadd.f32 %v1855_v2, %v1790_v48  ;;  %v1868_v33 = vmul.f32 %v4507_v22, %v4935_v13  ;;  %v4944_v57 = vld [vmem:[#allocation2 + $0x1e8] sm:$0xff]  ;;  %v4949_v28 = vld [vmem:[#allocation2 + $0x1f1] sm:$0xff] }
 0x14f   : > { %5542 = vst [vmem:[#allocation33_spill] sm:$0xff] %v4944_v57  ;;  %v1445_v41 = vpop.f32.mrf.mxu0  ;;  %v1964_v35 = vmul.f32 %v4527_v38, %v4944_v57  ;;  %v2241_v50 = vmul.f32 %v4544_v32, %v4929_v18  ;;  %v1759_v48 = vmul.f32 %v4868_v6, %v4486_v42  ;;  %v4960_v2 = vld [vmem:[#allocation2 + $0x1f0] sm:$0xff]  ;;  %v1511_v34 = vmax.f32 %v1478_v36, 0.0 }
 0x150   : > { %5543 = vst [vmem:[#allocation34_spill] sm:$0xff] %v4949_v28  ;;  %v1446_v44 = vadd.f32 %v4775_v51, %v1445_v41  ;;  %v1899_v39 = vadd.f32 %v1867_v16, %v1802_v46  ;;  %v1900_v25 = vadd.f32 %v1868_v33, %v1803_v1  ;;  %v1965_v17 = vmul.f32 %v4527_v38, %v4960_v2  ;;  %v4966_v41 = vld [vmem:[#allocation2 + $0x1e9] sm:$0xff] }
 0x151   : > { %2574 = vst.msk [vmem:[#allocation2 + $0x1e0] sm:$0xff] %vm393_vm1, %v5497_v56  ;;  %v2080_v63 = vadd.f32 %v2048_v52, %v1983_v11  ;;  %v2061_v6 = vmul.f32 %v4529_v24, %v4966_v41  ;;  %v4974_v60 = vadd.f32 %v4861_v12, %v4855_v45  ;;  %v2273_v16 = vadd.f32 %v2241_v50, %v2176_v23 }
 0x152   : > { %5544 = vst [vmem:[#allocation35_spill] sm:$0xff] %v4960_v2  ;;  %v1498_v31 = vmax.f32 %v1446_v44, 0.0  ;;  %v1791_v46 = vadd.f32 %v1759_v48, %v1694_v54  ;;  %v1984_v1 = vadd.f32 %v1952_v4, %v1887_v19  ;;  %v1996_v58 = vadd.f32 %v1964_v35, %v1899_v39 }
 0x153   : > { %2592 = vst.msk [vmem:[#allocation2 + $0x1f8] sm:$0xff] %vm393_vm1, %v5497_v56  ;;  %v4970_v5 = vld [vmem:[#allocation2 + $0x207] sm:$0xff]  ;;  %v2062_v45 = vmul.f32 %v4529_v24, %v4949_v28  ;;  %v1997_v19 = vadd.f32 %v1965_v17, %v1900_v25  ;;  %v5547_v35 = vmov -inf  }
 0x154   : > { %5545 = vst [vmem:[#allocation36_spill] sm:$0xff] %v4966_v41  ;;  %v2112_v56 = vld [vmem:[#allocation2 + $0x12f] sm:$0xff]  ;;  %v2158_v12 = vmul.f32 %v4531_v3, %v4970_v5  ;;  %v2093_v39 = vadd.f32 %v2061_v6, %v1996_v58 }
 0x155   : > { %5546 = vst [vmem:[#allocation37_spill] sm:$0xff] %v4974_v60  ;;  %v2209_v36 = vld [vmem:[#allocation2 + $0x130] sm:$0xff]  ;;  %v2145_v52 = vmul.f32 %v4531_v3, %v2112_v56  ;;  %v1856_v44 = vmul.f32 %v2112_v56, %v4507_v22  ;;  %v4984_v23 = vld [vmem:[#allocation2 + $0x208] sm:$0xff]  ;;  %v1599_v58 = vmul.f32 %v2112_v56, %v4477_v53 }
 0x156   : > { %v2305_v33 = vld [vmem:[#allocation2 + $0x129] sm:$0xff]  ;;  %1543 = vst.msk [vmem:[#allocation2 + $0x210] sm:$0xff] %vm393_vm1, %v1511_v34  ;;  %v2306_v11 = vld [vmem:[#allocation2 + $0x131] sm:$0xff]  ;;  %v2242_v4 = vmul.f32 %v4544_v32, %v2209_v36  ;;  %v1953_v8 = vmul.f32 %v2209_v36, %v4527_v38  ;;  %v2255_v25 = vmul.f32 %v4544_v32, %v4984_v23  ;;  %v1664_v61 = vmul.f32 %v2209_v36, %v4479_v21 }
 0x157   : > { %1530 = vst.msk [vmem:[#allocation2 + $0x148] sm:$0xff] %vm393_vm1, %v1498_v31  ;;  %v2338_v50 = vmul.f32 %v4546_v9, %v2305_v33  ;;  %v2049_v54 = vmul.f32 %v2305_v33, %v4529_v24  ;;  %v1598_v31 = vmul.f32 %v4916_v0, %v4477_v53  ;;  %v2177_v48 = vadd.f32 %v2145_v52, %v2080_v63  ;;  %v1447_v47 = vpop.f32.mrf.mxu0 }
 0x158   : > { %2586 = vst.msk [vmem:[#allocation2 + $0x138] sm:$0xff] %vm393_vm1, %v5547_v35  ;;  %v1888_v34 = vadd.f32 %v1856_v44, %v1791_v46  ;;  %v2339_v37 = vmul.f32 %v4546_v9, %v2306_v11  ;;  %v1663_v0 = vmul.f32 %v4929_v18, %v4479_v21  ;;  %v1448_v63 = vadd.f32 %v4775_v51, %v1447_v47 }
 0x159   : > { %2575 = vst.msk [vmem:[#allocation2 + $0x200] sm:$0xff] %vm393_vm1, %v5547_v35  ;;  %v2274_v17 = vadd.f32 %v2242_v4, %v2177_v48  ;;  %v2190_v52 = vadd.f32 %v2158_v12, %v2093_v39  ;;  %v2370_v6 = vadd.f32 %v2338_v50, %v2273_v16  ;;  %v2081_v46 = vadd.f32 %v2049_v54, %v1984_v1 }
 0x15a   : > { %v2094_v44 = vadd.f32 %v2062_v45, %v1997_v19  ;;  %v1499_v10 = vmax.f32 %v1448_v63, 0.0  ;;  %v1985_v60 = vadd.f32 %v1953_v8, %v1888_v34  ;;  %v1760_v47 = vmul.f32 %v2305_v33, %v4486_v42 }
 0x15b   : > { %v2371_v30 = vadd.f32 %v2339_v37, %v2274_v17  ;;  %v2287_v36 = vadd.f32 %v2255_v25, %v2190_v52  ;;  %v1695_v12 = vadd.f32 %v1663_v0, %v1598_v31  ;;  %v1696_v50 = vadd.f32 %v1664_v61, %v1599_v58 }
 0x15c   : > { %1531 = vst.msk [vmem:[#allocation2 + $0x150] sm:$0xff] %vm393_vm1, %v1499_v10  ;;  %v2050_v54 = vmul.f32 %v2306_v11, %v4529_v24  ;;  %v5031_v4 = vmul.f32 %v4531_v3, %v4797_v59 }
 0x15d   : > { %v5004_v27 = vld [vmem:[#allocation2 + $0x20f] sm:$0xff]  ;;  %v2395_v8 = vpack.c.bf16 %v2371_v30, %v2370_v6  ;;  %v1761_v30 = vmul.f32 %v2306_v11, %v4486_v42  ;;  %v1792_v31 = vadd.f32 %v1760_v47, %v1695_v12  ;;  %v1675_v47 = vmul.f32 %v4944_v57, %v4479_v21 }
 0x15e   : > { %v5006_v15 = vld [vmem:[#allocation2 + $0x210] sm:$0xff]  ;;  %v5011_v18 = vld [vmem:[#allocation2 + $0x147] sm:$0xff]  ;;  %v2159_v56 = vmul.f32 %v4531_v3, %v5004_v27  ;;  %v2082_v39 = vadd.f32 %v2050_v54, %v1985_v60 }
 0x15f   : > { %v5008_v14 = vld [vmem:[#allocation2 + $0x209] sm:$0xff]  ;;  %v2256_v16 = vmul.f32 %v4544_v32, %v5006_v15  ;;  %v5017_v1 = vld [vmem:[#allocation2 + $0x211] sm:$0xff]  ;;  %v2146_v33 = vmul.f32 %v4531_v3, %v5011_v18  ;;  %3435 = vmatmul.msk.bf16.gmra.mxu1 %vm393_vm1, %v2395_v8  ;;  %v1857_v61 = vmul.f32 %v5011_v18, %v4507_v22  ;;  %v1450_v34 = vpop.f32.mrf.mxu0  ;;  %2569 = vst.msk [vmem:[#allocation2 + $0x140] sm:$0xff] %vm393_vm1, %v5547_v35 }
 0x160   : > { %v2352_v37 = vmul.f32 %v4546_v9, %v5008_v14  ;;  %v5024_v45 = vld [vmem:[#allocation2 + $0x148] sm:$0xff]  ;;  %v2191_v19 = vadd.f32 %v2159_v56, %v2094_v44  ;;  %v2353_v48 = vmul.f32 %v4546_v9, %v5017_v1  ;;  %2593 = vst.msk [vmem:[#allocation2 + $0x218] sm:$0xff] %vm393_vm1, %v5547_v35  ;;  %v1451_v17 = vadd.f32 %v4775_v51, %v1450_v34 }
 0x161   : > { %v2178_v10 = vadd.f32 %v2146_v33, %v2081_v46  ;;  %v2243_v25 = vmul.f32 %v4544_v32, %v5024_v45  ;;  %v1793_v52 = vadd.f32 %v1761_v30, %v1696_v50  ;;  %v1889_v58 = vadd.f32 %v1857_v61, %v1792_v31  ;;  %v5046_v6 = vld [vmem:[#allocation2 + $0x1af] sm:$0xff] }
 0x162   : > { %v2288_v0 = vadd.f32 %v2256_v16, %v2191_v19  ;;  %v2384_v63 = vadd.f32 %v2352_v37, %v2287_v36  ;;  %v1954_v11 = vmul.f32 %v5024_v45, %v4527_v38  ;;  %v5050_v60 = vmul.f32 %v4531_v3, %v5046_v6 }
 0x163   : > { %v1610_v44 = vmul.f32 %v4933_v40, %v4477_v53  ;;  %v1500_v56 = vmax.f32 %v1451_v17, 0.0  ;;  %v2275_v16 = vadd.f32 %v2243_v25, %v2178_v10  ;;  %v1611_v36 = vmul.f32 %v4935_v13, %v4477_v53  ;;  %v5060_v8 = vld [vmem:[#allocation2 + $0x14f] sm:$0xff] }
 0x164   : > { %v2385_v46 = vadd.f32 %v2353_v48, %v2288_v0  ;;  %v1676_v37 = vmul.f32 %v4960_v2, %v4479_v21  ;;  %v5062_v33 = vld [vmem:[#allocation2 + $0x150] sm:$0xff]  ;;  %v1986_v54 = vadd.f32 %v1954_v11, %v1889_v58  ;;  %v1772_v48 = vmul.f32 %v4966_v41, %v4486_v42  ;;  %v2127_v41 = vld [vmem:[#allocation2 + $0x227] sm:$0xff] }
 0x165   : > { %v5064_v12 = vld [vmem:[#allocation2 + $0x149] sm:$0xff]  ;;  %v1707_v19 = vadd.f32 %v1675_v47, %v1610_v44  ;;  %1532 = vst.msk [vmem:[#allocation2 + $0x168] sm:$0xff] %vm393_vm1, %v1500_v56  ;;  %v2147_v10 = vmul.f32 %v4531_v3, %v5060_v8  ;;  %v5071_v30 = vld [vmem:[#allocation2 + $0x151] sm:$0xff]  ;;  %v1858_v61 = vmul.f32 %v5060_v8, %v4507_v22  ;;  %v1773_v34 = vmul.f32 %v4949_v28, %v4486_v42 }
 0x166   : > { %v2402_v50 = vpack.c.bf16 %v2385_v46, %v2384_v63  ;;  %v2340_v31 = vmul.f32 %v4546_v9, %v5064_v12  ;;  %v2244_v25 = vmul.f32 %v4544_v32, %v5062_v33  ;;  %v2341_v0 = vmul.f32 %v4546_v9, %v5071_v30  ;;  %2587 = vst.msk [vmem:[#allocation2 + $0x158] sm:$0xff] %vm393_vm1, %v5547_v35 }
 0x167   : > { %v2051_v63 = vmul.f32 %v5064_v12, %v4529_v24  ;;  %v1869_v17 = vmul.f32 %v4970_v5, %v4507_v22  ;;  %v2179_v58 = vadd.f32 %v2147_v10, %v2082_v39  ;;  %v1890_v11 = vadd.f32 %v1858_v61, %v1793_v52  ;;  %v1452_v47 = vpop.f32.mrf.mxu0  ;;  %v5548_v39 = vld [vmem:[#allocation8_spill] sm:$0xff]  ;;  %2555 = vst.msk [vmem:[#allocation2 + $0x220] sm:$0xff] %vm393_vm1, %v5547_v35 }
 0x168   : > { %3442 = vmatmul.msk.bf16.vlgmr.msrb.gmra.mxu3 %vm393_vm1, %v2402_v50  ;;  %v1955_v46 = vmul.f32 %v5062_v33, %v4527_v38  ;;  %v1708_v44 = vadd.f32 %v1676_v37, %v1611_v36  ;;  %v2052_v56 = vmul.f32 %v5071_v30, %v4529_v24  ;;  %v1804_v50 = vadd.f32 %v1772_v48, %v1707_v19  ;;  %v5103_v36 = vld [vmem:[%s5468_s6] ss:$0 sm:$0xff]  ;;  %v2128_v19 = vld [vmem:[#allocation2 + $0x22f] sm:$0xff] }
 0x169   : > { %v1870_v28 = vmul.f32 %v5004_v27, %v4507_v22  ;;  %v1966_v5 = vmul.f32 %v4984_v23, %v4527_v38  ;;  %2782 = vmatpush.msrb.mxu3 %v5548_v39  ;;  %v1453_v52 = vadd.f32 %v4775_v51, %v1452_v47  ;;  %v2276_v37 = vadd.f32 %v2244_v25, %v2179_v58  ;;  %v2224_v39 = vld [vmem:[#allocation2 + $0x228] sm:$0xff] }
 0x16a   : > { %v2372_v10 = vadd.f32 %v2340_v31, %v2275_v16  ;;  %v1805_v61 = vadd.f32 %v1773_v34, %v1708_v44  ;;  %v2083_v48 = vadd.f32 %v2051_v63, %v1986_v54  ;;  %v1901_v2 = vadd.f32 %v1869_v17, %v1804_v50  ;;  %v2321_v51 = vld [vmem:[#allocation2 + $0x229] sm:$0xff]  ;;  %v2322_v34 = vld [vmem:[#allocation2 + $0x231] sm:$0xff]  ;;  %2576 = vst.msk [vmem:[#allocation2 + $0x220] sm:$0xff] %vm393_vm1, %v5547_v35 }
 0x16b   : > { %v1967_v27 = vmul.f32 %v5006_v15, %v4527_v38  ;;  %v2063_v23 = vmul.f32 %v5008_v14, %v4529_v24  ;;  %v1501_v47 = vmax.f32 %v1453_v52, 0.0  ;;  %v2373_v57 = vadd.f32 %v2341_v0, %v2276_v37  ;;  %v2225_v31 = vld [vmem:[#allocation2 + $0x230] sm:$0xff]  ;;  %2556 = vst.msk [vmem:[#allocation2 + $0x228] sm:$0xff] %vm393_vm1, %v5547_v35  ;;  %v2470_v15 = vpop.f32.mrf.mxu1 }
 0x16c   : > { %v1987_v25 = vadd.f32 %v1955_v46, %v1890_v11  ;;  %v1902_v16 = vadd.f32 %v1870_v28, %v1805_v61  ;;  %v5549_v54 = vld [vmem:[#allocation7_spill] sm:$0xff]  ;;  %v2115_v63 = vld [vmem:[#allocation2 + $0x167] sm:$0xff]  ;;  %v1998_v14 = vadd.f32 %v1966_v5, %v1901_v2  ;;  %v2064_v58 = vmul.f32 %v5017_v1, %v4529_v24  ;;  %2557 = vst.msk [vmem:[#allocation2 + $0x230] sm:$0xff] %vm393_vm1, %v5547_v35 }
 0x16d   : > { %2783 = vmatpush.msrb.mxu3 %v5549_v54  ;;  %v2212_v17 = vld [vmem:[#allocation2 + $0x168] sm:$0xff]  ;;  %v2160_v44 = vmul.f32 %v4531_v3, %v2127_v41  ;;  %v2161_v0 = vmul.f32 %v4531_v3, %v2128_v19  ;;  %1533 = vst.msk [vmem:[#allocation2 + $0x170] sm:$0xff] %vm393_vm1, %v1501_v47  ;;  %v2471_v28 = vadd.f32 %v5103_v36, %v2470_v15 }
 0x16e   : > { %v2396_v11 = vpack.c.bf16 %v2373_v57, %v2372_v10  ;;  %v2148_v46 = vmul.f32 %v4531_v3, %v2115_v63  ;;  %v2257_v50 = vmul.f32 %v4544_v32, %v2224_v39  ;;  %v1602_v2 = vmul.f32 %v2115_v63, %v4477_v53  ;;  %2558 = vst.msk [vmem:[#allocation2 + $0x238] sm:$0xff] %vm393_vm1, %v5547_v35 }
 0x16f   : > { %v1667_v1 = vmul.f32 %v2212_v17, %v4479_v21  ;;  %v1999_v5 = vadd.f32 %v1967_v27, %v1902_v16  ;;  %v2095_v41 = vadd.f32 %v2063_v23, %v1998_v14  ;;  %2595 = vst.msk [vmem:[#allocation2 + $0x28] sm:$0xff] %vm393_vm1, %v2471_v28  ;;  %v2084_v52 = vadd.f32 %v2052_v56, %v1987_v25 }
 0x170   : > { %3436 = vmatmul.msk.bf16.gmra.mxu1 %vm393_vm1, %v2396_v11  ;;  %v2180_v37 = vadd.f32 %v2148_v46, %v2083_v48  ;;  %v2245_v57 = vmul.f32 %v4544_v32, %v2212_v17  ;;  %v2258_v19 = vmul.f32 %v4544_v32, %v2225_v31  ;;  %v2354_v39 = vmul.f32 %v4546_v9, %v2321_v51 }
 0x171   : > { %v2096_v10 = vadd.f32 %v2064_v58, %v1999_v5  ;;  %v2192_v61 = vadd.f32 %v2160_v44, %v2095_v41  ;;  %v1699_v27 = vadd.f32 %v1667_v1, %v1602_v2  ;;  %2594 = vst.msk [vmem:[#allocation2 + $0x238] sm:$0xff] %vm393_vm1, %v5547_v35  ;;  %v1600_v23 = vmul.f32 %v5011_v18, %v4477_v53 }
 0x172   : > { %v1601_v56 = vmul.f32 %v5060_v8, %v4477_v53  ;;  %v1665_v48 = vmul.f32 %v5024_v45, %v4479_v21  ;;  %v2355_v51 = vmul.f32 %v4546_v9, %v2322_v34  ;;  %v1666_v16 = vmul.f32 %v5062_v33, %v4479_v21  ;;  %2570 = vst.msk [vmem:[#allocation2 + $0x160] sm:$0xff] %vm393_vm1, %v5547_v35 }
 0x173   : > { %v2193_v47 = vadd.f32 %v2161_v0, %v2096_v10  ;;  %v2289_v25 = vadd.f32 %v2257_v50, %v2192_v61  ;;  %v2277_v31 = vadd.f32 %v2245_v57, %v2180_v37  ;;  %v1762_v18 = vmul.f32 %v5064_v12, %v4486_v42  ;;  %v2472_v15 = vpop.f32.mrf.mxu1 }
 0x174   : > { %v1697_v54 = vadd.f32 %v1665_v48, %v1600_v23  ;;  %v1763_v8 = vmul.f32 %v5071_v30, %v4486_v42  ;;  %v2116_v45 = vld [vmem:[#allocation2 + $0x16f] sm:$0xff]  ;;  %v1859_v0 = vmul.f32 %v2115_v63, %v4507_v22  ;;  %v1956_v33 = vmul.f32 %v2212_v17, %v4527_v38 }
 0x175   : > { %v2213_v14 = vld [vmem:[#allocation2 + $0x170] sm:$0xff]  ;;  %v2290_v44 = vadd.f32 %v2258_v19, %v2193_v47  ;;  %v2386_v34 = vadd.f32 %v2354_v39, %v2289_v25  ;;  %v2473_v28 = vadd.f32 %v5103_v36, %v2472_v15  ;;  %v2149_v11 = vmul.f32 %v4531_v3, %v2116_v45 }
 0x176   : > { %v2309_v58 = vld [vmem:[#allocation2 + $0x169] sm:$0xff]  ;;  %v2310_v46 = vld [vmem:[#allocation2 + $0x171] sm:$0xff]  ;;  %v1698_v50 = vadd.f32 %v1666_v16, %v1601_v56  ;;  %v1702_v12 = vadd.f32 %v4864_v26, %v4858_v55  ;;  %v2246_v30 = vmul.f32 %v4544_v32, %v2213_v14  ;;  %v1603_v2 = vmul.f32 %v2116_v45, %v4477_v53 }
 0x177   : > { %v1668_v1 = vmul.f32 %v2213_v14, %v4479_v21  ;;  %v1764_v5 = vmul.f32 %v2309_v58, %v4486_v42  ;;  %2588 = vst.msk [vmem:[#allocation2 + $0x178] sm:$0xff] %vm393_vm1, %v5547_v35  ;;  %v2181_v63 = vadd.f32 %v2149_v11, %v2084_v52  ;;  %v2342_v17 = vmul.f32 %v4546_v9, %v2309_v58 }
 0x178   : > { %2596 = vst.msk [vmem:[#allocation2 + $0x30] sm:$0xff] %vm393_vm1, %v2473_v28  ;;  %v2343_v41 = vmul.f32 %v4546_v9, %v2310_v46  ;;  %v2387_v37 = vadd.f32 %v2355_v51, %v2290_v44  ;;  %v1765_v26 = vmul.f32 %v2310_v46, %v4486_v42  ;;  %v1794_v10 = vadd.f32 %v1762_v18, %v1697_v54 }
 0x179   : > { %v1700_v55 = vadd.f32 %v1668_v1, %v1603_v2  ;;  %v1796_v57 = vadd.f32 %v1764_v5, %v1699_v27  ;;  %v2278_v61 = vadd.f32 %v2246_v30, %v2181_v63  ;;  %v1795_v39 = vadd.f32 %v1763_v8, %v1698_v50  ;;  %v5553_v2 = vld [vmem:[#allocation37_spill] sm:$0xff]  ;;  %v2313_v5 = vld [vmem:[#allocation2 + $0x1a9] sm:$0xff] }
 0x17a   : > { %v2403_v19 = vpack.c.bf16 %v2387_v37, %v2386_v34  ;;  %v1860_v23 = vmul.f32 %v2116_v45, %v4507_v22  ;;  %v1891_v48 = vadd.f32 %v1859_v0, %v1794_v10  ;;  %v2053_v52 = vmul.f32 %v2309_v58, %v4529_v24  ;;  %v2217_v0 = vld [vmem:[#allocation2 + $0x1b0] sm:$0xff]  ;;  %v5554_v63 = vld [vmem:[#allocation25_spill] sm:$0xff] }
 0x17b   : > { %v1797_v56 = vadd.f32 %v1765_v26, %v1700_v55  ;;  %v1893_v35 = vadd.f32 %v4824_v29, %v1796_v57  ;;  %v2374_v47 = vadd.f32 %v2342_v17, %v2277_v31  ;;  %v2375_v25 = vadd.f32 %v2343_v41, %v2278_v61  ;;  %v2475_v27 = vpop.f32.mrf.mxu1  ;;  %v5555_v61 = vld [vmem:[#allocation22_spill] sm:$0xff] }
 0x17c   : > { %3443 = vmatmul.msk.bf16.gmra.mxu3 %vm393_vm1, %v2403_v19  ;;  %v1892_v51 = vadd.f32 %v1860_v23, %v1795_v39  ;;  %v1957_v16 = vmul.f32 %v2213_v14, %v4527_v38  ;;  %v1988_v8 = vadd.f32 %v1956_v33, %v1891_v48  ;;  %v2054_v15 = vmul.f32 %v2310_v46, %v4529_v24  ;;  %v2216_v14 = vld [vmem:[#allocation2 + $0x1a8] sm:$0xff] }
 0x17d   : > { %v1894_v54 = vadd.f32 %v4827_v20, %v1797_v56  ;;  %v1990_v18 = vadd.f32 %v4840_v43, %v1893_v35  ;;  %v2476_v29 = vadd.f32 %v5103_v36, %v2475_v27  ;;  %v2397_v45 = vpack.c.bf16 %v2375_v25, %v2374_v47  ;;  %v5550_v20 = vld [vmem:[#allocation6_spill] sm:$0xff]  ;;  %v5557_v47 = vld [vmem:[#allocation27_spill] sm:$0xff] }
 0x17e   : > { %v1989_v44 = vadd.f32 %v1957_v16, %v1892_v51  ;;  %v1766_v31 = vmul.f32 %v4818_v7, %v4486_v42  ;;  %v2085_v28 = vadd.f32 %v2053_v52, %v1988_v8  ;;  %v1767_v43 = vmul.f32 %v5550_v20, %v4486_v42  ;;  %v5551_v7 = vld [vmem:[#allocation23_spill] sm:$0xff]  ;;  %v5556_v48 = vld [vmem:[#allocation26_spill] sm:$0xff] }
 0x17f   : > { %v1991_v58 = vadd.f32 %v4843_v49, %v1894_v54  ;;  %v2087_v34 = vadd.f32 %v4847_v62, %v1990_v18  ;;  %2597 = vst.msk [vmem:[#allocation2 + $0x48] sm:$0xff] %vm393_vm1, %v2476_v29  ;;  %v2249_v33 = vmul.f32 %v4544_v32, %v2216_v14  ;;  %v2250_v11 = vmul.f32 %v4544_v32, %v2217_v0  ;;  %v5552_v62 = vld [vmem:[#allocation24_spill] sm:$0xff]  ;;  %v2628_v51 = vld [vmem:[#allocation2 + $0xf] sm:$0xff] }
 0x180   : > { %3437 = vmatmul.msk.bf16.gmra.mxu1 %vm393_vm1, %v2397_v45  ;;  %v2086_v46 = vadd.f32 %v2054_v15, %v1989_v44  ;;  %v2182_v30 = vadd.f32 %v5552_v62, %v2085_v28  ;;  %v1798_v1 = vadd.f32 %v1766_v31, %v5553_v2  ;;  %v1799_v41 = vadd.f32 %v1767_v43, %v1702_v12  ;;  %v5558_v44 = vld [vmem:[#allocation5_spill] sm:$0xff] }
 0x181   : > { %v2088_v50 = vadd.f32 %v5551_v7, %v1991_v58  ;;  %v2184_v49 = vadd.f32 %v5031_v4, %v2087_v34  ;;  %v1863_v37 = vmul.f32 %v4797_v59, %v4507_v22  ;;  %v1864_v55 = vmul.f32 %v5046_v6, %v4507_v22  ;;  %v2627_v58 = vld [vmem:[#allocation2 + $0x7] sm:$0xff] }
 0x182   : > { %v2183_v17 = vadd.f32 %v5554_v63, %v2086_v46  ;;  %v2346_v10 = vmul.f32 %v4546_v9, %v2313_v5  ;;  %v1960_v4 = vmul.f32 %v2216_v14, %v4527_v38  ;;  %v2347_v19 = vmul.f32 %v4546_v9, %v5555_v61  ;;  %v2630_v34 = vld [vmem:[#allocation2 + $0x27] sm:$0xff]  ;;  %v5560_v46 = vld [vmem:[#allocation28_spill] sm:$0xff] }
 0x183   : > { %v2185_v26 = vadd.f32 %v5050_v60, %v2088_v50  ;;  %v2281_v57 = vadd.f32 %v2249_v33, %v2184_v49  ;;  %v1895_v39 = vadd.f32 %v1863_v37, %v1798_v1  ;;  %v1896_v23 = vadd.f32 %v1864_v55, %v1799_v41  ;;  %v2477_v56 = vpop.f32.mrf.mxu1  ;;  %v2631_v60 = vld [vmem:[#allocation2 + $0x2f] sm:$0xff]  ;;  %v5559_v33 = vld [vmem:[#allocation29_spill] sm:$0xff]  ;;  %v2629_v41 = vld [vmem:[#allocation2 + $0x17] sm:$0x3] }
 0x184   : > { %v1961_v12 = vmul.f32 %v2217_v0, %v4527_v38  ;;  %v2279_v52 = vadd.f32 %v5556_v48, %v2182_v30  ;;  %v2280_v25 = vadd.f32 %v5557_v47, %v2183_v17  ;;  %v2057_v16 = vmul.f32 %v2313_v5, %v4529_v24  ;;  %v5561_v30 = vld [vmem:[#allocation30_spill] sm:$0xff]  ;;  %v2632_v37 = vld [vmem:[#allocation2 + $0x37] sm:$0x3] }
 0x185   : > { %v2282_v35 = vadd.f32 %v2250_v11, %v2185_v26  ;;  %v2478_v27 = vadd.f32 %v5103_v36, %v2477_v56  ;;  %v2345_v54 = vmul.f32 %v4546_v9, %v5550_v20  ;;  %v1992_v18 = vadd.f32 %v1960_v4, %v1895_v39 }
 0x186   : > { %v1993_v8 = vadd.f32 %v1961_v12, %v1896_v23  ;;  %v2378_v15 = vadd.f32 %v2346_v10, %v2281_v57  ;;  %v2058_v45 = vmul.f32 %v5555_v61, %v4529_v24  ;;  %v2154_v31 = vmul.f32 %v4531_v3, %v5558_v44  ;;  %v5216_v62 = vld [vmem:[#allocation2 + $0x47] sm:$0xff] }
 0x187   : > { %v2379_v29 = vadd.f32 %v2347_v19, %v2282_v35  ;;  %2598 = vst.msk [vmem:[#allocation2 + $0x50] sm:$0xff] %vm393_vm1, %v2478_v27  ;;  %v2637_v28 = vmax.f32 %v2628_v51, %v2631_v60  ;;  %v2089_v43 = vadd.f32 %v2057_v16, %v1992_v18  ;;  %v2155_v11 = vmul.f32 %v4531_v3, %v5559_v33  ;;  %v5562_v19 = vld [vmem:[#allocation31_spill] sm:$0xff]  ;;  %v5563_v35 = vld [vmem:[#allocation32_spill] sm:$0xff] }
 0x188   : > { %v2376_v7 = vadd.f32 %v5560_v46, %v2279_v52  ;;  %v2377_v50 = vadd.f32 %v2345_v54, %v2280_v25  ;;  %v2090_v49 = vadd.f32 %v2058_v45, %v1993_v8  ;;  %v2251_v2 = vmul.f32 %v4544_v32, %v5561_v30 }
 0x189   : > { %v2399_v20 = vpack.c.bf16 %v2379_v29, %v2378_v15  ;;  %v2636_v1 = vmax.f32 %v2627_v58, %v2630_v34  ;;  %v1606_v63 = vmul.f32 %v4797_v59, %v4477_v53  ;;  %v1607_v17 = vmul.f32 %v5046_v6, %v4477_v53 }
 0x18a   : > { %v2186_v55 = vadd.f32 %v2154_v31, %v2089_v43  ;;  %v1671_v26 = vmul.f32 %v2216_v14, %v4479_v21  ;;  %v1672_v57 = vmul.f32 %v2217_v0, %v4479_v21  ;;  %v1768_v10 = vmul.f32 %v2313_v5, %v4486_v42 }
 0x18b   : > { %3439 = vmatmul.msk.bf16.vlgmr.msra.gmra.mxu2 %vm393_vm1, %v2399_v20  ;;  %v2187_v4 = vadd.f32 %v2155_v11, %v2090_v49  ;;  %v2252_v39 = vmul.f32 %v4544_v32, %v5562_v19  ;;  %v2639_v59 = vmax.f32 %v2636_v1, %v5216_v62  ;;  %v1769_v53 = vmul.f32 %v5555_v61, %v4486_v42  ;;  %v2480_v6 = vpop.f32.mrf.mxu1  ;;  %v5564_v61 = vld [vmem:[#allocation21_spill] sm:$0xff] }
 0x18c   : > { %v1703_v23 = vadd.f32 %v1671_v26, %v1606_v63  ;;  %v1704_v12 = vadd.f32 %v1672_v57, %v1607_v17  ;;  %v1865_v56 = vmul.f32 %v4507_v22, %v5558_v44  ;;  %v1866_v21 = vmul.f32 %v4507_v22, %v5559_v33 }
 0x18d   : > { %v2481_v14 = vadd.f32 %v5103_v36, %v2480_v6  ;;  %v2398_v0 = vpack.c.bf16 %v2377_v50, %v2376_v7  ;;  %v2638_v5 = vmax.f32 %v2629_v41, %v2632_v37  ;;  %v2348_v48 = vmul.f32 %v4546_v9, %v5563_v35 }
 0x18e   : > { %v5240_v52 = vld [vmem:[#allocation2 + $0x4f] sm:$0xff]  ;;  %v2635_v47 = vld [vmem:[#allocation2 + $0x57] sm:$0x3]  ;;  %v2283_v42 = vadd.f32 %v2251_v2, %v2186_v55  ;;  %v2349_v25 = vmul.f32 %v4546_v9, %v5564_v61  ;;  %v1800_v51 = vadd.f32 %v1768_v10, %v1703_v23  ;;  %v1801_v60 = vadd.f32 %v1769_v53, %v1704_v12 }
 0x18f   : > { %2599 = vst.msk [vmem:[#allocation2 + $0x68] sm:$0xff] %vm393_vm1, %v2481_v14  ;;  %v2640_v22 = vmax.f32 %v2637_v28, %v5240_v52  ;;  %v2641_v16 = vmax.f32 %v2638_v5, %v2635_v47  ;;  %v2284_v27 = vadd.f32 %v2252_v39, %v2187_v4  ;;  %v2646_v54 = vrot.slane %v2639_v59, 1  ;;  %v5565_v39 = vld [vmem:[#allocation33_spill] sm:$0xff]  ;;  %v5566_v53 = vld [vmem:[#allocation35_spill] sm:$0xff]  ;;  %v5567_v12 = vld [vmem:[#allocation36_spill] sm:$0xff] }
 0x190   : > { %3438 = vmatmul.msk.bf16.gmra.mxu1 %vm393_vm1, %v2398_v0  ;;  %v1897_v18 = vadd.f32 %v1865_v56, %v1800_v51  ;;  %v1898_v8 = vadd.f32 %v1866_v21, %v1801_v60  ;;  %v1962_v15 = vmul.f32 %v4527_v38, %v5561_v30  ;;  %v1963_v29 = vmul.f32 %v4527_v38, %v5562_v19  ;;  %v5568_v21 = vld [vmem:[#allocation34_spill] sm:$0xff]  ;;  %v5570_v0 = vld [vmem:[#allocation9_spill] sm:$0xff] }
 0x191   : > { %v2647_v45 = vrot.slane %v2640_v22, 1  ;;  %v2649_v44 = vrot.slane %v2641_v16, 1  ;;  %v2657_v31 = vrot.slane %v2640_v22, 2  ;;  %v2659_v58 = vrot.slane %v2641_v16, 2  ;;  %v5572_v16 = vld [vmem:[#allocation13_spill] sm:$0xff] }
 0x192   : > { %v2380_v34 = vadd.f32 %v2348_v48, %v2283_v42  ;;  %v2381_v28 = vadd.f32 %v2349_v25, %v2284_v27  ;;  %v2059_v11 = vmul.f32 %v4529_v24, %v5563_v35  ;;  %v1994_v7 = vadd.f32 %v1962_v15, %v1897_v18  ;;  %v5571_v25 = vld [vmem:[#allocation14_spill] sm:$0xff] }
 0x193   : > { %v2650_v43 = vsel %vm2645_vm4, %v2647_v45, %v2649_v44  ;;  %v2648_v33 = vsel %vm2645_vm4, %v2646_v54, %v2647_v45  ;;  %v2482_v20 = vpop.f32.mrf.mxu1  ;;  %v1995_v50 = vadd.f32 %v1963_v29, %v1898_v8  ;;  %v2060_v38 = vmul.f32 %v4529_v24, %v5564_v61  ;;  %v2713_v54 = vld [vmem:[#allocation2 + $0x57] sm:$0x3] }
 0x194   : > { %v2654_v46 = vmax.f32 %v2640_v22, %v2650_v43  ;;  %v2483_v49 = vadd.f32 %v5103_v36, %v2482_v20  ;;  %v2660_v30 = vsel %vm2655_vm5, %v2657_v31, %v2659_v58  ;;  %v2653_v2 = vmax.f32 %v2639_v59, %v2648_v33 }
 0x195   : > { %v2656_v63 = vrot.slane %v2639_v59, 2  ;;  %v2400_v17 = vpack.c.bf16 %v2381_v28, %v2380_v34  ;;  %v2156_v41 = vmul.f32 %v4531_v3, %v4933_v40  ;;  %v2091_v55 = vadd.f32 %v2059_v11, %v1994_v7  ;;  %v5573_v11 = vld [vmem:[#allocation18_spill] sm:$0xff] }
 0x196   : > { %v2664_v1 = vmax.f32 %v2654_v46, %v2660_v30  ;;  %2600 = vst.msk [vmem:[#allocation2 + $0x70] sm:$0xff] %vm393_vm1, %v2483_v49  ;;  %v2092_v26 = vadd.f32 %v2060_v38, %v1995_v50  ;;  %v2157_v24 = vmul.f32 %v4531_v3, %v4935_v13  ;;  %v2253_v59 = vmul.f32 %v4544_v32, %v5565_v39  ;;  %v5275_v3 = vld [vmem:[%s5471_s9] sm:$0xff] }
 0x197   : > { %v2658_v37 = vsel %vm2655_vm5, %v2656_v63, %v2657_v31  ;;  %v2188_v4 = vadd.f32 %v2156_v41, %v2091_v55  ;;  %v2254_v40 = vmul.f32 %v4544_v32, %v5566_v53  ;;  %v2350_v56 = vmul.f32 %v4546_v9, %v5567_v12  ;;  %3445 = vmatmul.msk.f32.vlgmr.msra.gmra.mxu3 %vm2665_vm6, %v5275_v3  ;;  %v5569_v32 = vld [vmem:[#allocation10_spill] sm:$0xff]  ;;  %v5574_v46 = vld [vmem:[#allocation17_spill] sm:$0xff]  ;;  %v5575_v41 = vld [vmem:[#allocation12_spill] sm:$0xff] }
 0x198   : > { %2683 = vmatpush.msrb.mxu2 %v2664_v1  ;;  %v2663_v57 = vmax.f32 %v2653_v2, %v2658_v37  ;;  %v2189_v19 = vadd.f32 %v2157_v24, %v2092_v26  ;;  %v2351_v14 = vmul.f32 %v4546_v9, %v5568_v21  ;;  %2861 = vmatpush.msra.mxu3 %v5569_v32  ;;  %v2714_v42 = vld [vmem:[#allocation2 + $0x67] sm:$0xff]  ;;  %v5576_v37 = vld [vmem:[#allocation11_spill] sm:$0xff]  ;;  %v5577_v24 = vld [vmem:[#allocation16_spill] sm:$0xff] }
 0x199   : > { %v2285_v13 = vadd.f32 %v2253_v59, %v2188_v4  ;;  %v2720_v22 = vmax.f32 %v5216_v62, %v2714_v42  ;;  %v5579_v59 = vld [vmem:[#allocation20_spill] sm:$0xff] }
 0x19a   : > { %2684 = vmatpush.msrb.mxu2 %v2663_v57  ;;  %v2286_v23 = vadd.f32 %v2254_v40, %v2189_v19  ;;  %2862 = vmatpush.msra.mxu3 %v5570_v0  ;;  %v5578_v57 = vld [vmem:[#allocation15_spill] sm:$0xff] }
 0x19b   : > { %3440 = vmatmul.msk.bf16.gmra.mxu2 %vm393_vm1, %v2400_v17  ;;  %v2485_v10 = vpop.f32.mrf.mxu1  ;;  %v2382_v35 = vadd.f32 %v2350_v56, %v2285_v13  ;;  %v5580_v13 = vld [vmem:[#allocation19_spill] sm:$0xff] }
 0x19c   : > { %v2486_v6 = vadd.f32 %v5103_v36, %v2485_v10  ;;  %v2383_v48 = vadd.f32 %v2351_v14, %v2286_v23 }
 0x19d   : > { %v2715_v51 = vld [vmem:[#allocation2 + $0x6f] sm:$0xff]  ;;  %v2716_v60 = vld [vmem:[#allocation2 + $0x77] sm:$0x3] }
 0x19e   : > { %2601 = vst.msk [vmem:[#allocation2 + $0x88] sm:$0xff] %vm393_vm1, %v2486_v6  ;;  %v2401_v61 = vpack.c.bf16 %v2383_v48, %v2382_v35  ;;  %v2721_v15 = vmax.f32 %v5240_v52, %v2715_v51  ;;  %v2722_v29 = vmax.f32 %v2713_v54, %v2716_v60 }
 0x19f   : > { %3447 = vmatmul.msk.f32.vlgmr.msrb.gmra.mxu3 %vm2665_vm6, %v5275_v3 }
 0x1a0   : > { %2940 = vmatpush.msrb.mxu3 %v5571_v25 }
 0x1a2   : > { %2941 = vmatpush.msrb.mxu3 %v5572_v16 }
 0x1a3   : > { %v2487_v5 = vpop.f32.mrf.mxu1 }
 0x1a4   : > { %v2488_v47 = vadd.f32 %v5103_v36, %v2487_v5 }
 0x1a5   : > { %v5289_v9 = vld [vmem:[#allocation2 + $0x87] sm:$0xff] }
 0x1a6   : > { %2602 = vst.msk [vmem:[#allocation2 + $0x90] sm:$0xff] %vm393_vm1, %v2488_v47  ;;  %v2723_v18 = vmax.f32 %v2720_v22, %v5289_v9 }
 0x1a7   : > { %3449 = vmatmul.msk.f32.vlgmr.msra.gmra.mxu3 %vm2665_vm6, %v5275_v3 }
 0x1a8   : > { %v2729_v34 = vrot.slane %v2723_v18, 1  ;;  %3019 = vmatpush.msra.mxu3 %v5573_v11  ;;  %v2738_v2 = vrot.slane %v2723_v18, 2 }
 0x1aa   : > { %3020 = vmatpush.msra.mxu3 %v5574_v46 }
 0x1ab   : > { %3441 = vmatmul.msk.bf16.gmra.mxu2 %vm393_vm1, %v2401_v61  ;;  %v2490_v27 = vpop.f32.mrf.mxu1 }
 0x1ac   : > { %v2491_v8 = vadd.f32 %v5103_v36, %v2490_v27 }
 0x1ad   : > { %v2718_v45 = vld [vmem:[#allocation2 + $0x8f] sm:$0xff]  ;;  %v2719_v44 = vld [vmem:[#allocation2 + $0x97] sm:$0x3] }
 0x1ae   : > { %2603 = vst.msk [vmem:[#allocation2 + $0xa8] sm:$0xff] %vm393_vm1, %v2491_v8  ;;  %v2724_v31 = vmax.f32 %v2721_v15, %v2718_v45  ;;  %v2725_v58 = vmax.f32 %v2722_v29, %v2719_v44  ;;  %v2792_v12 = vld [vmem:[#allocation2 + $0x97] sm:$0x3] }
 0x1af   : > { %3451 = vmatmul.msk.f32.vlgmr.msrb.gmra.mxu3 %vm2665_vm6, %v5275_v3 }
 0x1b0   : > { %v2730_v62 = vrot.slane %v2724_v31, 1  ;;  %v2732_v43 = vrot.slane %v2725_v58, 1  ;;  %v2739_v28 = vrot.slane %v2724_v31, 2  ;;  %v2741_v33 = vrot.slane %v2725_v58, 2  ;;  %3098 = vmatpush.msrb.mxu3 %v5575_v41 }
 0x1b2   : > { %v2733_v20 = vsel %vm2645_vm4, %v2730_v62, %v2732_v43  ;;  %v2731_v52 = vsel %vm2645_vm4, %v2729_v34, %v2730_v62  ;;  %v2742_v30 = vsel %vm2655_vm5, %v2739_v28, %v2741_v33  ;;  %v2740_v63 = vsel %vm2655_vm5, %v2738_v2, %v2739_v28  ;;  %3099 = vmatpush.msrb.mxu3 %v5576_v37 }
 0x1b3   : > { %v2492_v7 = vpop.f32.mrf.mxu1  ;;  %v2737_v50 = vmax.f32 %v2724_v31, %v2733_v20  ;;  %v2736_v38 = vmax.f32 %v2723_v18, %v2731_v52 }
 0x1b4   : > { %v2493_v49 = vadd.f32 %v5103_v36, %v2492_v7 }
 0x1b5   : > { %v2746_v1 = vmax.f32 %v2737_v50, %v2742_v30  ;;  %v2745_v17 = vmax.f32 %v2736_v38, %v2740_v63  ;;  %v2793_v19 = vld [vmem:[#allocation2 + $0xa7] sm:$0xff] }
 0x1b6   : > { %2604 = vst.msk [vmem:[#allocation2 + $0xb0] sm:$0xff] %vm393_vm1, %v2493_v49  ;;  %v2799_v6 = vmax.f32 %v5289_v9, %v2793_v19 }
 0x1b7   : > { %2761 = vmatpush.msra.mxu2 %v2746_v1  ;;  %3453 = vmatmul.msk.f32.vlgmr.msra.gmra.mxu3 %vm2665_vm6, %v5275_v3 }
 0x1b8   : > { %3177 = vmatpush.msra.mxu3 %v5577_v24 }
 0x1b9   : > { %2762 = vmatpush.msra.mxu2 %v2745_v17 }
 0x1ba   : > { %3178 = vmatpush.msra.mxu3 %v5578_v57 }
 0x1bb   : > { %3444 = vmatmul.msk.f32.vlgmr.msrb.gmra.mxu2 %vm2665_vm6, %v5275_v3  ;;  %v2495_v55 = vpop.f32.mrf.mxu1 }
 0x1bc   : > { %v2496_v26 = vadd.f32 %v5103_v36, %v2495_v55 }
 0x1bd   : > { %v2794_v53 = vld [vmem:[#allocation2 + $0xaf] sm:$0xff]  ;;  %v2795_v40 = vld [vmem:[#allocation2 + $0xb7] sm:$0x3] }
 0x1be   : > { %2605 = vst.msk [vmem:[#allocation2 + $0xc8] sm:$0xff] %vm393_vm1, %v2496_v26  ;;  %v2800_v14 = vmax.f32 %v2718_v45, %v2794_v53  ;;  %v2801_v32 = vmax.f32 %v2792_v12, %v2795_v40 }
 0x1bf   : > { %3455 = vmatmul.msk.f32.vlgmr.msrb.gmra.mxu3 %vm2665_vm6, %v5275_v3 }
 0x1c0   : > { %3256 = vmatpush.msrb.mxu3 %v5579_v59 }
 0x1c2   : > { %3257 = vmatpush.msrb.mxu3 %v5580_v13 }
 0x1c3   : > { %3446 = vmatmul.msk.f32.vlgmr.msra.gmra.mxu2 %vm2665_vm6, %v5275_v3  ;;  %v2497_v10 = vpop.f32.mrf.mxu1 }
 0x1c4   : > { %v2498_v4 = vadd.f32 %v5103_v36, %v2497_v10 }
 0x1c5   : > { %v2796_v39 = vld [vmem:[#allocation2 + $0xc7] sm:$0xff] }
 0x1c6   : > { %2606 = vst.msk [vmem:[#allocation2 + $0xd0] sm:$0xff] %vm393_vm1, %v2498_v4  ;;  %v2802_v56 = vmax.f32 %v2799_v6, %v2796_v39 }
 0x1c7   : > { %3457 = vmatmul.msk.f32.vlgmr.msra.gmra.mxu3 %vm2665_vm6, %v5275_v3 }
 0x1c8   : > { %v2808_v47 = vrot.slane %v2802_v56, 1  ;;  %v2817_v8 = vrot.slane %v2802_v56, 2 }
 0x1cb   : > { %v2500_v23 = vpop.f32.mrf.mxu1 }
 0x1cc   : > { %v2501_v21 = vadd.f32 %v5103_v36, %v2500_v23 }
 0x1cd   : > { %v2797_v0 = vld [vmem:[#allocation2 + $0xcf] sm:$0xff]  ;;  %v2798_v5 = vld [vmem:[#allocation2 + $0xd7] sm:$0x3] }
 0x1ce   : > { %2607 = vst.msk [vmem:[#allocation2 + $0xe8] sm:$0xff] %vm393_vm1, %v2501_v21  ;;  %v2803_v35 = vmax.f32 %v2800_v14, %v2797_v0  ;;  %v2804_v48 = vmax.f32 %v2801_v32, %v2798_v5  ;;  %v2871_v7 = vld [vmem:[#allocation2 + $0xd7] sm:$0x3] }
 0x1cf   : > { %3459 = vmatmul.msk.f32.vlgmr.msrb.gmra.mxu3 %vm2665_vm6, %v5275_v3 }
 0x1d0   : > { %v2809_v42 = vrot.slane %v2803_v35, 1  ;;  %v2811_v61 = vrot.slane %v2804_v48, 1  ;;  %v2818_v9 = vrot.slane %v2803_v35, 2  ;;  %v2820_v25 = vrot.slane %v2804_v48, 2 }
 0x1d2   : > { %v2812_v51 = vsel %vm2645_vm4, %v2809_v42, %v2811_v61  ;;  %v2810_v60 = vsel %vm2645_vm4, %v2808_v47, %v2809_v42  ;;  %v2821_v18 = vsel %vm2655_vm5, %v2818_v9, %v2820_v25  ;;  %v2819_v29 = vsel %vm2655_vm5, %v2817_v8, %v2818_v9 }
 0x1d3   : > { %v2502_v22 = vpop.f32.mrf.mxu1  ;;  %v2816_v16 = vmax.f32 %v2803_v35, %v2812_v51  ;;  %v2815_v27 = vmax.f32 %v2802_v56, %v2810_v60 }
 0x1d4   : > { %v2503_v54 = vadd.f32 %v5103_v36, %v2502_v22 }
 0x1d5   : > { %v2825_v15 = vmax.f32 %v2816_v16, %v2821_v18  ;;  %v2824_v45 = vmax.f32 %v2815_v27, %v2819_v29  ;;  %v2872_v62 = vld [vmem:[#allocation2 + $0xe7] sm:$0xff] }
 0x1d6   : > { %2608 = vst.msk [vmem:[#allocation2 + $0xf0] sm:$0xff] %vm393_vm1, %v2503_v54  ;;  %v2878_v20 = vmax.f32 %v2796_v39, %v2872_v62 }
 0x1d7   : > { %2840 = vmatpush.msrb.mxu2 %v2825_v15 }
 0x1d9   : > { %2841 = vmatpush.msrb.mxu2 %v2824_v45 }
 0x1da   : > { %3448 = vmatmul.msk.f32.vlgmr.msrb.gmra.mxu2 %vm2665_vm6, %v5275_v3 }
 0x1dc   : > { %v2505_v44 = vpop.f32.mrf.mxu1 }
 0x1dd   : > { %v2506_v31 = vadd.f32 %v5103_v36, %v2505_v44  ;;  %v2873_v33 = vld [vmem:[#allocation2 + $0xef] sm:$0xff]  ;;  %v2874_v11 = vld [vmem:[#allocation2 + $0xf7] sm:$0x3] }
 0x1de   : > { %v2879_v49 = vmax.f32 %v2797_v0, %v2873_v33  ;;  %v2880_v30 = vmax.f32 %v2871_v7, %v2874_v11 }
 0x1df   : > { %2609 = vst.msk [vmem:[#allocation2 + $0x108] sm:$0xff] %vm393_vm1, %v2506_v31 }
 0x1e4   : > { %v2507_v58 = vpop.f32.mrf.mxu1 }
 0x1e5   : > { %v2508_v34 = vadd.f32 %v5103_v36, %v2507_v58 }
 0x1e6   : > { %v2875_v43 = vld [vmem:[#allocation2 + $0x107] sm:$0xff] }
 0x1e7   : > { %2610 = vst.msk [vmem:[#allocation2 + $0x110] sm:$0xff] %vm393_vm1, %v2508_v34  ;;  %v2881_v50 = vmax.f32 %v2878_v20, %v2875_v43 }
 0x1e9   : > { %v2887_v41 = vrot.slane %v2881_v50, 1  ;;  %v2896_v13 = vrot.slane %v2881_v50, 2 }
 0x1eb   : > { %v2540_v28 = vpop.f32.mrf.mxu3 }
 0x1ec   : > { %v2541_v52 = vadd.f32 %v5103_v36, %v2540_v28 }
 0x1ed   : > { %v2510_v46 = vpop.f32.mrf.mxu1 }
 0x1ee   : > { %2623 = vst.msk [vmem:[#allocation2 + $0x1e8] sm:$0xff] %vm393_vm1, %v2541_v52  ;;  %v2511_v38 = vadd.f32 %v5103_v36, %v2510_v46  ;;  %v2876_v2 = vld [vmem:[#allocation2 + $0x10f] sm:$0xff]  ;;  %v2877_v1 = vld [vmem:[#allocation2 + $0x117] sm:$0x3] }
 0x1ef   : > { %v2882_v63 = vmax.f32 %v2879_v49, %v2876_v2  ;;  %v2883_v17 = vmax.f32 %v2880_v30, %v2877_v1  ;;  %v2950_v22 = vld [vmem:[#allocation2 + $0x117] sm:$0x3] }
 0x1f0   : > { %2611 = vst.msk [vmem:[#allocation2 + $0x128] sm:$0xff] %vm393_vm1, %v2511_v38 }
 0x1f1   : > { %v2888_v37 = vrot.slane %v2882_v63, 1  ;;  %v2890_v55 = vrot.slane %v2883_v17, 1  ;;  %v2897_v26 = vrot.slane %v2882_v63, 2  ;;  %v2899_v24 = vrot.slane %v2883_v17, 2 }
 0x1f3   : > { %v2542_v57 = vpop.f32.mrf.mxu3  ;;  %v2891_v4 = vsel %vm2645_vm4, %v2888_v37, %v2890_v55  ;;  %v2889_v19 = vsel %vm2645_vm4, %v2887_v41, %v2888_v37  ;;  %v2900_v6 = vsel %vm2655_vm5, %v2897_v26, %v2899_v24  ;;  %v2898_v12 = vsel %vm2655_vm5, %v2896_v13, %v2897_v26 }
 0x1f4   : > { %v2543_v10 = vadd.f32 %v5103_v36, %v2542_v57  ;;  %v2895_v59 = vmax.f32 %v2882_v63, %v2891_v4  ;;  %v2894_v53 = vmax.f32 %v2881_v50, %v2889_v19 }
 0x1f5   : > { %v2512_v39 = vpop.f32.mrf.mxu1 }
 0x1f6   : > { %2624 = vst.msk [vmem:[#allocation2 + $0x1f0] sm:$0xff] %vm393_vm1, %v2543_v10  ;;  %v2513_v40 = vadd.f32 %v5103_v36, %v2512_v39  ;;  %v2904_v23 = vmax.f32 %v2895_v59, %v2900_v6  ;;  %v2903_v56 = vmax.f32 %v2894_v53, %v2898_v12 }
 0x1f7   : > { %v2951_v42 = vld [vmem:[#allocation2 + $0x127] sm:$0xff] }
 0x1f8   : > { %2612 = vst.msk [vmem:[#allocation2 + $0x130] sm:$0xff] %vm393_vm1, %v2513_v40  ;;  %2919 = vmatpush.msra.mxu2 %v2904_v23  ;;  %v2957_v51 = vmax.f32 %v2875_v43, %v2951_v42 }
 0x1fa   : > { %2920 = vmatpush.msra.mxu2 %v2903_v56 }
 0x1fb   : > { %3450 = vmatmul.msk.f32.vlgmr.msra.gmra.mxu2 %vm2665_vm6, %v5275_v3 }
 0x1fd   : > { %v2515_v21 = vpop.f32.mrf.mxu1 }
 0x1fe   : > { %v2516_v14 = vadd.f32 %v5103_v36, %v2515_v21 }
 0x1ff   : > { %v2545_v32 = vpop.f32.mrf.mxu3  ;;  %v2952_v9 = vld [vmem:[#allocation2 + $0x12f] sm:$0xff]  ;;  %v2953_v25 = vld [vmem:[#allocation2 + $0x137] sm:$0x3] }
 0x200   : > { %2613 = vst.msk [vmem:[#allocation2 + $0x148] sm:$0xff] %vm393_vm1, %v2516_v14  ;;  %v2546_v0 = vadd.f32 %v5103_v36, %v2545_v32  ;;  %v2958_v18 = vmax.f32 %v2876_v2, %v2952_v9  ;;  %v2959_v8 = vmax.f32 %v2950_v22, %v2953_v25 }
 0x202   : > { %2625 = vst.msk [vmem:[#allocation2 + $0x208] sm:$0xff] %vm393_vm1, %v2546_v0 }
 0x205   : > { %v2517_v5 = vpop.f32.mrf.mxu1 }
 0x206   : > { %v2518_v35 = vadd.f32 %v5103_v36, %v2517_v5 }
 0x207   : > { %v2547_v48 = vpop.f32.mrf.mxu3  ;;  %v2954_v61 = vld [vmem:[#allocation2 + $0x147] sm:$0xff] }
 0x208   : > { %2614 = vst.msk [vmem:[#allocation2 + $0x150] sm:$0xff] %vm393_vm1, %v2518_v35  ;;  %v2548_v47 = vadd.f32 %v5103_v36, %v2547_v48  ;;  %v2960_v16 = vmax.f32 %v2957_v51, %v2954_v61 }
 0x20a   : > { %2626 = vst.msk [vmem:[#allocation2 + $0x210] sm:$0xff] %vm393_vm1, %v2548_v47  ;;  %v2966_v58 = vrot.slane %v2960_v16, 1  ;;  %v2975_v49 = vrot.slane %v2960_v16, 2 }
 0x20d   : > { %v2520_v60 = vpop.f32.mrf.mxu1 }
 0x20e   : > { %v2521_v27 = vadd.f32 %v5103_v36, %v2520_v60  ;;  %v2525_v54 = vpop.f32.mrf.mxu2 }
 0x20f   : > { %v2526_v15 = vadd.f32 %v5103_v36, %v2525_v54  ;;  %v2955_v29 = vld [vmem:[#allocation2 + $0x14f] sm:$0xff]  ;;  %v2956_v45 = vld [vmem:[#allocation2 + $0x157] sm:$0x3] }
 0x210   : > { %2615 = vst.msk [vmem:[#allocation2 + $0x168] sm:$0xff] %vm393_vm1, %v2521_v27  ;;  %v2961_v44 = vmax.f32 %v2958_v18, %v2955_v29  ;;  %v2962_v31 = vmax.f32 %v2959_v8, %v2956_v45  ;;  %v3029_v24 = vld [vmem:[#allocation2 + $0x157] sm:$0x3] }
 0x211   : > { %2617 = vst.msk [vmem:[#allocation2 + $0x188] sm:$0xff] %vm393_vm1, %v2526_v15 }
 0x212   : > { %v2967_v34 = vrot.slane %v2961_v44, 1  ;;  %v2969_v62 = vrot.slane %v2962_v31, 1  ;;  %v2976_v43 = vrot.slane %v2961_v44, 2  ;;  %v2978_v28 = vrot.slane %v2962_v31, 2 }
 0x214   : > { %v2970_v33 = vsel %vm2645_vm4, %v2967_v34, %v2969_v62  ;;  %v2968_v11 = vsel %vm2645_vm4, %v2966_v58, %v2967_v34  ;;  %v2979_v38 = vsel %vm2655_vm5, %v2976_v43, %v2978_v28  ;;  %v2977_v1 = vsel %vm2655_vm5, %v2975_v49, %v2976_v43 }
 0x215   : > { %v2522_v20 = vpop.f32.mrf.mxu1  ;;  %v2974_v52 = vmax.f32 %v2961_v44, %v2970_v33  ;;  %v2973_v46 = vmax.f32 %v2960_v16, %v2968_v11  ;;  %v3189_v11 = vld [vmem:[#allocation2 + $0x1ef] sm:$0xff] }
 0x216   : > { %v2523_v7 = vadd.f32 %v5103_v36, %v2522_v20  ;;  %v2527_v50 = vpop.f32.mrf.mxu2  ;;  %v3190_v20 = vld [vmem:[#allocation2 + $0x1f7] sm:$0x3] }
 0x217   : > { %v2528_v30 = vadd.f32 %v5103_v36, %v2527_v50  ;;  %v2983_v2 = vmax.f32 %v2974_v52, %v2979_v38  ;;  %v3030_v63 = vld [vmem:[#allocation2 + $0x167] sm:$0xff]  ;;  %v2982_v17 = vmax.f32 %v2973_v46, %v2977_v1 }
 0x218   : > { %2616 = vst.msk [vmem:[#allocation2 + $0x170] sm:$0xff] %vm393_vm1, %v2523_v7  ;;  %v3036_v41 = vmax.f32 %v2954_v61, %v3030_v63  ;;  %v3033_v55 = vld [vmem:[#allocation2 + $0x187] sm:$0xff]  ;;  %v3192_v63 = vld [vmem:[#allocation2 + $0x20f] sm:$0xff] }
 0x219   : > { %2618 = vst.msk [vmem:[#allocation2 + $0x190] sm:$0xff] %vm393_vm1, %v2528_v30  ;;  %2998 = vmatpush.msrb.mxu2 %v2983_v2  ;;  %v3191_v52 = vld [vmem:[#allocation2 + $0x207] sm:$0xff] }
 0x21a   : > { %v3039_v4 = vmax.f32 %v3036_v41, %v3033_v55  ;;  %v2707_v14 = vpop.f32.mrf.mxu3 }
 0x21b   : > { %2999 = vmatpush.msrb.mxu2 %v2982_v17  ;;  %2710 = vst.msk [vmem:[#allocation4] sm:$0xff] %vm440_vm2, %v2707_v14 }
 0x21c   : > { %3452 = vmatmul.msk.f32.vlgmr.msrb.gmra.mxu2 %vm2665_vm6, %v5275_v3  ;;  %v3045_v13 = vrot.slane %v3039_v4, 1  ;;  %v3054_v61 = vrot.slane %v3039_v4, 2 }
 0x21e   : > { %v2530_v37 = vpop.f32.mrf.mxu2 }
 0x21f   : > { %v2531_v26 = vadd.f32 %v5103_v36, %v2530_v37  ;;  %v3031_v57 = vld [vmem:[#allocation2 + $0x16f] sm:$0xff]  ;;  %v3032_v10 = vld [vmem:[#allocation2 + $0x177] sm:$0x3] }
 0x220   : > { %v3037_v19 = vmax.f32 %v2955_v29, %v3031_v57  ;;  %v3038_v39 = vmax.f32 %v3029_v24, %v3032_v10  ;;  %v3034_v59 = vld [vmem:[#allocation2 + $0x18f] sm:$0xff]  ;;  %v3035_v53 = vld [vmem:[#allocation2 + $0x197] sm:$0x3]  ;;  %v3188_v29 = vld [vmem:[#allocation2 + $0x1e7] sm:$0xff] }
 0x221   : > { %2619 = vst.msk [vmem:[#allocation2 + $0x1a8] sm:$0xff] %vm393_vm1, %v2531_v26  ;;  %v3108_v34 = vld [vmem:[#allocation2 + $0x197] sm:$0x3] }
 0x222   : > { %v3040_v40 = vmax.f32 %v3037_v19, %v3034_v59  ;;  %v3041_v6 = vmax.f32 %v3038_v39, %v3035_v53  ;;  %v2785_v22 = vpop.f32.mrf.mxu3  ;;  %v3193_v26 = vld [vmem:[#allocation2 + $0x217] sm:$0x3] }
 0x223   : > { %2788 = vst.msk [vmem:[#allocation4 + $0x8] sm:$0xff] %vm440_vm2, %v2785_v22 }
 0x224   : > { %v3046_v23 = vrot.slane %v3040_v40, 1  ;;  %v3048_v12 = vrot.slane %v3041_v6, 1  ;;  %v3055_v56 = vrot.slane %v3040_v40, 2  ;;  %v3057_v21 = vrot.slane %v3041_v6, 2 }
 0x226   : > { %v2532_v32 = vpop.f32.mrf.mxu2  ;;  %v3049_v0 = vsel %vm2645_vm4, %v3046_v23, %v3048_v12  ;;  %v3047_v5 = vsel %vm2645_vm4, %v3045_v13, %v3046_v23  ;;  %v3058_v42 = vsel %vm2655_vm5, %v3055_v56, %v3057_v21  ;;  %v3056_v25 = vsel %vm2655_vm5, %v3054_v61, %v3055_v56 }
 0x227   : > { %v2533_v35 = vadd.f32 %v5103_v36, %v2532_v32  ;;  %v3053_v48 = vmax.f32 %v3040_v40, %v3049_v0  ;;  %v3052_v47 = vmax.f32 %v3039_v4, %v3047_v5 }
 0x228   : > { %v3109_v8 = vld [vmem:[#allocation2 + $0x1a7] sm:$0xff] }
 0x229   : > { %2620 = vst.msk [vmem:[#allocation2 + $0x1b0] sm:$0xff] %vm393_vm1, %v2533_v35  ;;  %v3062_v9 = vmax.f32 %v3053_v48, %v3058_v42  ;;  %v3061_v51 = vmax.f32 %v3052_v47, %v3056_v25  ;;  %v3115_v31 = vmax.f32 %v3033_v55, %v3109_v8  ;;  %v3283_v42 = vld [vmem:[%s5469_s7] sm:$0x3] }
 0x22a   : > { %v2864_v54 = vpop.f32.mrf.mxu3 }
 0x22b   : > { %3077 = vmatpush.msra.mxu2 %v3062_v9  ;;  %2867 = vst.msk [vmem:[#allocation4 + $0x10] sm:$0xff] %vm440_vm2, %v2864_v54  ;;  %v3272_v54 = vld [vmem:[#allocation4 + $0x8] sm:$0xff] }
 0x22d   : > { %3078 = vmatpush.msra.mxu2 %v3061_v51  ;;  %v3301_v51 = vsel %vm1387_vm0, %v3283_v42, 0 }
 0x22e   : > { %v2535_v60 = vpop.f32.mrf.mxu2  ;;  %3454 = vmatmul.msk.f32.vlgmr.msra.gmra.mxu2 %vm2665_vm6, %v5275_v3 }
 0x22f   : > { %v2536_v16 = vadd.f32 %v5103_v36, %v2535_v60 }
 0x230   : > { %v3110_v45 = vld [vmem:[#allocation2 + $0x1af] sm:$0xff]  ;;  %v3111_v44 = vld [vmem:[#allocation2 + $0x1b7] sm:$0x3] }
 0x231   : > { %2621 = vst.msk [vmem:[#allocation2 + $0x1c8] sm:$0xff] %vm393_vm1, %v2536_v16  ;;  %v3116_v28 = vmax.f32 %v3034_v59, %v3110_v45  ;;  %v3117_v33 = vmax.f32 %v3108_v34, %v3111_v44 }
 0x232   : > { %v2943_v43 = vpop.f32.mrf.mxu3 }
 0x233   : > { %2946 = vst.msk [vmem:[#allocation4 + $0x18] sm:$0xff] %vm440_vm2, %v2943_v43 }
 0x236   : > { %v2537_v27 = vpop.f32.mrf.mxu2 }
 0x237   : > { %v2538_v18 = vadd.f32 %v5103_v36, %v2537_v27  ;;  %v3271_v27 = vld [vmem:[#allocation4] sm:$0xff] }
 0x238   : > { %v3112_v15 = vld [vmem:[#allocation2 + $0x1c7] sm:$0xff] }
 0x239   : > { %2622 = vst.msk [vmem:[#allocation2 + $0x1d0] sm:$0xff] %vm393_vm1, %v2538_v18  ;;  %v3194_v58 = vmax.f32 %v3112_v15, %v3188_v29  ;;  %v3118_v62 = vmax.f32 %v3115_v31, %v3112_v15  ;;  %v3279_v18 = vpack.c.bf16 %v3272_v54, %v3271_v27  ;;  %v3273_v15 = vld [vmem:[#allocation4 + $0x10] sm:$0xff] }
 0x23a   : > { %v3022_v6 = vpop.f32.mrf.mxu3  ;;  %v3274_v29 = vld [vmem:[#allocation4 + $0x18] sm:$0xff] }
 0x23b   : > { %v3197_v50 = vmax.f32 %v3194_v58, %v3191_v52  ;;  %v3124_v1 = vrot.slane %v3118_v62, 1  ;;  %v3133_v23 = vrot.slane %v3118_v62, 2  ;;  %3025 = vst.msk [vmem:[#allocation4 + $0x20] sm:$0xff] %vm440_vm2, %v3022_v6  ;;  %v3280_v45 = vpack.c.bf16 %v3274_v29, %v3273_v15 }
 0x23d   : > { %v3203_v19 = vrot.slane %v3197_v50, 1  ;;  %v3212_v9 = vrot.slane %v3197_v50, 2 }
 0x23e   : > { %v2686_v44 = vpop.f32.mrf.mxu2 }
 0x23f   : > { %2689 = vst.msk [vmem:[#allocation3] sm:$0xff] %vm393_vm1, %v2686_v44 }
 0x240   : > { %v3113_v36 = vld [vmem:[#allocation2 + $0x1cf] sm:$0xff]  ;;  %v3114_v46 = vld [vmem:[#allocation2 + $0x1d7] sm:$0x3] }
 0x241   : > { %v3187_v7 = vld [vmem:[#allocation2 + $0x1d7] sm:$0x3]  ;;  %v3119_v38 = vmax.f32 %v3116_v28, %v3113_v36  ;;  %v3120_v49 = vmax.f32 %v3117_v33, %v3114_v46  ;;  %v3195_v30 = vmax.f32 %v3113_v36, %v3189_v11 }
 0x242   : > { %v3196_v2 = vmax.f32 %v3187_v7, %v3190_v20  ;;  %v3101_v22 = vpop.f32.mrf.mxu3  ;;  %v3275_v31 = vld [vmem:[#allocation4 + $0x20] sm:$0xff] }
 0x243   : > { %v3125_v17 = vrot.slane %v3119_v38, 1  ;;  %v3127_v41 = vrot.slane %v3120_v49, 1  ;;  %v3134_v37 = vrot.slane %v3119_v38, 2  ;;  %v3136_v55 = vrot.slane %v3120_v49, 2  ;;  %3104 = vst.msk [vmem:[#allocation4 + $0x28] sm:$0xff] %vm440_vm2, %v3101_v22 }
 0x244   : > { %v3198_v24 = vmax.f32 %v3195_v30, %v3192_v63  ;;  %v3199_v57 = vmax.f32 %v3196_v2, %v3193_v26  ;;  %v3483_v7 = vld [vmem:[%s5470_s8] ss:$0 sm:$0xff] }
 0x245   : > { %v3128_v10 = vsel %vm2645_vm4, %v3125_v17, %v3127_v41  ;;  %v3126_v4 = vsel %vm2645_vm4, %v3124_v1, %v3125_v17  ;;  %v3137_v13 = vsel %vm2655_vm5, %v3134_v37, %v3136_v55  ;;  %v3135_v0 = vsel %vm2655_vm5, %v3133_v23, %v3134_v37 }
 0x246   : > { %v3132_v39 = vmax.f32 %v3119_v38, %v3128_v10  ;;  %v3131_v59 = vmax.f32 %v3118_v62, %v3126_v4  ;;  %v3204_v53 = vrot.slane %v3198_v24, 1  ;;  %v3206_v40 = vrot.slane %v3199_v57, 1  ;;  %v3263_v49 = vld [vmem:[#allocation3] sm:$0xff] }
 0x247   : > { %v3213_v12 = vrot.slane %v3198_v24, 2  ;;  %v3215_v56 = vrot.slane %v3199_v57, 2 }
 0x248   : > { %v3141_v21 = vmax.f32 %v3132_v39, %v3137_v13  ;;  %v3207_v14 = vsel %vm2645_vm4, %v3204_v53, %v3206_v40  ;;  %v3205_v32 = vsel %vm2645_vm4, %v3203_v19, %v3204_v53  ;;  %v3140_v35 = vmax.f32 %v3131_v59, %v3135_v0 }
 0x249   : > { %v3211_v5 = vmax.f32 %v3198_v24, %v3207_v14  ;;  %v3216_v48 = vsel %vm2655_vm5, %v3213_v12, %v3215_v56  ;;  %v3210_v47 = vmax.f32 %v3197_v50, %v3205_v32  ;;  %v3214_v25 = vsel %vm2655_vm5, %v3212_v9, %v3213_v12 }
 0x24a   : > { %3156 = vmatpush.msrb.mxu2 %v3141_v21  ;;  %v3180_v16 = vpop.f32.mrf.mxu3  ;;  %v3276_v58 = vld [vmem:[#allocation4 + $0x28] sm:$0xff] }
 0x24b   : > { %v3220_v61 = vmax.f32 %v3211_v5, %v3216_v48  ;;  %v3219_v60 = vmax.f32 %v3210_v47, %v3214_v25  ;;  %3183 = vst.msk [vmem:[#allocation4 + $0x30] sm:$0xff] %vm440_vm2, %v3180_v16  ;;  %v3281_v34 = vpack.c.bf16 %v3276_v58, %v3275_v31 }
 0x24c   : > { %3157 = vmatpush.msrb.mxu2 %v3140_v35 }
 0x24d   : > { %3456 = vmatmul.msk.f32.vlgmr.msrb.gmra.mxu2 %vm2665_vm6, %v5275_v3 }
 0x24e   : > { %3235 = vmatpush.msra.mxu2 %v3220_v61 }
 0x250   : > { %3236 = vmatpush.msra.mxu2 %v3219_v60 }
 0x252   : > { %3310 = vmatpush.bf16.msrb.mxu2 %v3301_v51  ;;  %v3259_v8 = vpop.f32.mrf.mxu3  ;;  %v3277_v28 = vld [vmem:[#allocation4 + $0x30] sm:$0xff] }
 0x253   : > { %3262 = vst.msk [vmem:[#allocation4 + $0x38] sm:$0xff] %vm440_vm2, %v3259_v8 }
 0x255   : > { %3458 = vmatmul.msk.f32.vlgmr.msra.gmra.mxu2 %vm2665_vm6, %v5275_v3  ;;  %v2764_v3 = vpop.f32.mrf.mxu2 }
 0x256   : > { %2767 = vst.msk [vmem:[#allocation3 + $0x8] sm:$0xff] %vm393_vm1, %v2764_v3 }
 0x25a   : > { %v3278_v33 = vld [vmem:[#allocation4 + $0x38] sm:$0xff] }
 0x25b   : > { %v3282_v11 = vpack.c.bf16 %v3278_v33, %v3277_v28 }
 0x25d   : > { %3460 = vmatmul.msk.bf16.vlgmr.msrb.gmra.mxu2 %vm440_vm2, %v3279_v18  ;;  %v2843_v62 = vpop.f32.mrf.mxu2  ;;  %v3264_v63 = vld [vmem:[#allocation3 + $0x8] sm:$0xff] }
 0x25e   : > { %2846 = vst.msk [vmem:[#allocation3 + $0x10] sm:$0xff] %vm393_vm1, %v2843_v62 }
 0x265   : > { %v3265_v55 = vld [vmem:[#allocation3 + $0x10] sm:$0xff] }
 0x26d   : > { %3461 = vmatmul.msk.bf16.gmra.mxu2 %vm440_vm2, %v3280_v45 }
 0x27d   : > { %3462 = vmatmul.msk.bf16.gmra.mxu2 %vm440_vm2, %v3281_v34 }
 0x27e   : > { %v2922_v43 = vpop.f32.mrf.mxu2 }
 0x27f   : > { %2925 = vst.msk [vmem:[#allocation3 + $0x18] sm:$0xff] %vm393_vm1, %v2922_v43 }
 0x286   : > { %v3266_v10 = vld [vmem:[#allocation3 + $0x18] sm:$0xff] }
 0x28d   : > { %3463 = vmatmul.msk.bf16.gmra.mxu2 %vm440_vm2, %v3282_v11 }
 0x29f   : > { %v3001_v20 = vpop.f32.mrf.mxu2 }
 0x2a0   : > { %3004 = vst.msk [vmem:[#allocation3 + $0x20] sm:$0xff] %vm393_vm1, %v3001_v20 }
 0x2a7   : > { %v3267_v59 = vld [vmem:[#allocation3 + $0x20] sm:$0xff] }
 0x2b1   : > { %v3080_v52 = vpop.f32.mrf.mxu2 }
 0x2b2   : > { %3083 = vst.msk [vmem:[#allocation3 + $0x28] sm:$0xff] %vm393_vm1, %v3080_v52 }
 0x2b9   : > { %v3268_v13 = vld [vmem:[#allocation3 + $0x28] sm:$0xff] }
 0x2d0   : > { %v3159_v36 = vpop.f32.mrf.mxu2 }
 0x2d1   : > { %3162 = vst.msk [vmem:[#allocation3 + $0x30] sm:$0xff] %vm393_vm1, %v3159_v36 }
 0x2d8   : > { %v3238_v46 = vpop.f32.mrf.mxu2  ;;  %v3269_v21 = vld [vmem:[#allocation3 + $0x30] sm:$0xff] }
 0x2d9   : > { %3241 = vst.msk [vmem:[#allocation3 + $0x38] sm:$0xff] %vm393_vm1, %v3238_v46 }
 0x2e0   : > { %v3312_v50 = vpop.f32.mrf.mxu2  ;;  %v3270_v5 = vld [vmem:[#allocation3 + $0x38] sm:$0xff] }
 0x2e1   : > { %v3313_v38 = vadd.f32 %v3483_v7, %v3312_v50 }
 0x2e3   : > { %v3332_v30 = vadd.f32 %v3313_v38, %v3263_v49 }
 0x2e5   : > { %3340 = vst.msk [vmem:[%s5441_s12] sm:$0xff] %vm393_vm1, %v3332_v30 }
 0x2e8   : > { %v3314_v2 = vpop.f32.mrf.mxu2 }
 0x2e9   : > { %v3315_v1 = vadd.f32 %v3483_v7, %v3314_v2 }
 0x2eb   : > { %v3333_v17 = vadd.f32 %v3315_v1, %v3264_v63 }
 0x2ed   : > { %3341 = vst.msk [vmem:[%s5441_s12 + $0x8] sm:$0xff] %vm393_vm1, %v3333_v17 }
 0x2f0   : > { %v3317_v41 = vpop.f32.mrf.mxu2 }
 0x2f1   : > { %v3318_v37 = vadd.f32 %v3483_v7, %v3317_v41 }
 0x2f3   : > { %v3334_v26 = vadd.f32 %v3318_v37, %v3265_v55 }
 0x2f5   : > { %3342 = vst.msk [vmem:[%s5441_s12 + $0x10] sm:$0xff] %vm393_vm1, %v3334_v26 }
 0x2f8   : > { %v3319_v24 = vpop.f32.mrf.mxu2 }
 0x2f9   : > { %v3320_v57 = vadd.f32 %v3483_v7, %v3319_v24 }
 0x2fb   : > { %v3335_v4 = vadd.f32 %v3320_v57, %v3266_v10 }
 0x2fd   : > { %3343 = vst.msk [vmem:[%s5441_s12 + $0x18] sm:$0xff] %vm393_vm1, %v3335_v4 }
 0x300   : > { %v3322_v19 = vpop.f32.mrf.mxu2 }
 0x301   : > { %v3323_v39 = vadd.f32 %v3483_v7, %v3322_v19 }
 0x303   : > { %v3336_v53 = vadd.f32 %v3323_v39, %v3267_v59 }
 0x305   : > { %3344 = vst.msk [vmem:[%s5441_s12 + $0x20] sm:$0xff] %vm393_vm1, %v3336_v53 }
 0x308   : > { %v3324_v40 = vpop.f32.mrf.mxu2 }
 0x309   : > { %v3325_v6 = vadd.f32 %v3483_v7, %v3324_v40 }
 0x30b   : > { %v3337_v23 = vadd.f32 %v3325_v6, %v3268_v13 }
 0x30d   : > { %3345 = vst.msk [vmem:[%s5441_s12 + $0x28] sm:$0xff] %vm393_vm1, %v3337_v23 }
 0x310   : > { %v3327_v12 = vpop.f32.mrf.mxu2 }
 0x311   : > { %v3328_v56 = vadd.f32 %v3483_v7, %v3327_v12 }
 0x313   : > { %v3338_v14 = vadd.f32 %v3328_v56, %v3269_v21 }
 0x315   : > { %3346 = vst.msk [vmem:[%s5441_s12 + $0x30] sm:$0xff] %vm393_vm1, %v3338_v14 }
 0x318   : > { %v3329_v32 = vpop.f32.mrf.mxu2 }
 0x319   : > { %v3330_v0 = vadd.f32 %v3483_v7, %v3329_v32 }
 0x31b   : > { %v3339_v35 = vadd.f32 %v3330_v0, %v3270_v5 }
 0x31d   : > { %3347 = vst.msk [vmem:[%s5441_s12 + $0x38] sm:$0xff] %vm393_vm1, %v3339_v35 }
 0x31e PF: > { %s20_s13 = sadd.s32 1, %s3491_s13  }
 0x31f   : > { %p17_p4 = scmp.ge.s32.totalorder %s20_s13, 4  }
 0x321   :  { %19 = sbr.rel (!%p17_p4) target bundleno = 1 (0x1), region = 99 }

</bundles_post_ra>
